<compile_context>
chip_gen: v7x
topology: tpu7x:2x2x1
jax: 0.10.0
libtpu: 0.0.40
codegen_flags: <defaults>
</compile_context>

<pallas_src>
import functools
import math

import jax
import jax.numpy as jnp
from jax.experimental import pallas as pl
from jax.experimental.pallas import tpu as pltpu


def _use_bf16_activation():
    """bf16 sigmoid only on chips with a bf16 EUP/VPU (v6e, v7x)."""
    try:
        dk = jax.devices()[0].device_kind.lower()
    except Exception:
        return False
    return ("v6" in dk) or ("v7" in dk)


# -----------------------------------------------------------------------------
# Fused kernel: 1x1 conv (BN folded) + SiLU + avg-pool + Linear + softmax
# -----------------------------------------------------------------------------
def fused_classify_kernel(x_ref, w1_ref, b1_ref, w2_ref, b2_ref, o_ref, acc_ref,
                          *, hw, inv_hw, mask_tail, group8, act_bf16):
    # x_ref : (1, c1, thw)  one spatial chunk of one batch element (NCHW layout)
    # w1_ref: (c1, c_)      folded conv*BN weight, bf16
    # b1_ref: (1,  c_)      folded BN bias, f32
    # w2_ref: (c_, c2p)     linear weight (transposed, lane-padded), bf16
    # b2_ref: (1,  c2p)     linear bias (padded cols = -1e30), f32
    # o_ref : (1, 1, c2p)   softmax probabilities for this batch element, f32
    # acc_ref: (8, c_)      VMEM f32 accumulator of the spatial sum
    t = pl.program_id(1)

    @pl.when(t == 0)
    def _():
        acc_ref[...] = jnp.zeros_like(acc_ref)

    x = x_ref[0]                 # (c1, thw), f32
    thw = x.shape[1]
    c_ = w1_ref.shape[1]

    # 1x1 conv as a matmul contracting over c1: (thw, c_) = x^T @ w1.
    # bf16 MXU inputs, f32 accumulation.
    # TODO(synk): verify via pl.lower_as_mlir that no per-step XLU transpose of
    # the (c1, thw) tile is emitted for this lhs-axis-0 contraction.
    h = jax.lax.dot_general(
        x.astype(jnp.bfloat16), w1_ref[...],
        dimension_numbers=(((0,), (0,)), ((), ())),
        preferred_element_type=jnp.float32,
    )
    h = h + b1_ref[...]          # folded BN bias (f32)

    # SiLU: sigmoid on the EUP (bf16 where supported), multiply in f32.
    if act_bf16:
        s = jax.nn.sigmoid(h.astype(jnp.bfloat16)).astype(jnp.float32)
    else:
        s = jax.nn.sigmoid(h)
    h = h * s

    # Mask spatial positions past HW on the (possibly padded) last tile.
    if mask_tail:
        pos = t * thw + jax.lax.broadcasted_iota(jnp.int32, (thw, 1), 0)
        h = jnp.where(pos < hw, h, 0.0)

    # AdaptiveAvgPool2d(1): accumulate the spatial sum.  (8, c_) accumulator
    # keeps the per-step work on the VPU; the 8-sublane collapse happens once.
    if group8:
        acc_ref[...] += jnp.sum(h.reshape(-1, 8, c_), axis=0)
    else:
        acc_ref[0:1, :] += jnp.sum(h, axis=0, keepdims=True)

    @pl.when(t == pl.num_programs(1) - 1)
    def _():
        pooled = jnp.sum(acc_ref[...], axis=0, keepdims=True) * inv_hw   # (1, c_)
        logits = jnp.dot(pooled.astype(jnp.bfloat16), w2_ref[...],
                         preferred_element_type=jnp.float32) + b2_ref[...]
        m = jnp.max(logits, axis=-1, keepdims=True)
        e = jnp.exp(logits - m)
        o_ref[0] = e / jnp.sum(e, axis=-1, keepdims=True)   # exact softmax rows


def _derived_vmem_limit(c1, c_, c2p, thw):
    """VMEM budget from actual block sizes (x2 buffering) + headroom."""
    xb = c1 * thw * 4            # f32 x tile
    w1b = c1 * c_ * 2            # bf16 conv weight
    b1b = c_ * 4
    w2b = c_ * c2p * 2           # bf16 linear weight
    b2b = c2p * 4
    ob = c2p * 4
    hb = thw * c_ * 4            # f32 (thw, c_) intermediate
    accb = 8 * c_ * 4
    need = 2 * (xb + w1b + b1b + w2b + b2b + ob) + accb + 4 * hb
    return int(min(max(2 * need, 16 * 1024 * 1024), 64 * 1024 * 1024))


def classify_forward(x_nchw, params):
    """x_nchw: (B, c1, H, W) f32 (or a list -> concat on channel axis).
    Returns (B, c2) softmax probabilities (eval-mode forward)."""
    if isinstance(x_nchw, (list, tuple)):
        x_nchw = jnp.concatenate(x_nchw, axis=1)
    B, c1, H, W = x_nchw.shape
    HW = H * W
    w1, b1, w2, b2 = params          # (c1,c_), (1,c_), (c_,c2), (1,c2), all f32
    c_ = w1.shape[1]
    c2 = w2.shape[1]

    # Pad c2 to a lane-dense multiple of 128; padded logits get -1e30 bias so
    # they contribute nothing to the softmax, then slice back in the wrapper.
    c2p = max(128, ((c2 + 127) // 128) * 128)
    if c2p != c2:
        w2p = jnp.zeros((c_, c2p), w2.dtype).at[:, :c2].set(w2)
        b2p = jnp.full((1, c2p), -1e30, b2.dtype).at[:, :c2].set(b2)
    else:
        w2p, b2p = w2, b2

    # bf16 weights for the MXU (halves weight DMA); biases stay f32.
    w1_bf = w1.astype(jnp.bfloat16)
    w2_bf = w2p.astype(jnp.bfloat16)

    # NCHW consumed directly: (B, c1, H, W) -> (B, c1, HW) is a free reshape;
    # the x block is lane-dense along HW.
    x = x_nchw.reshape(B, c1, HW)

    # Spatial tiling: single full-HW tile when small, else 512-lane tiles on a
    # cdiv grid with in-kernel tail masking.
    if HW <= 512:
        thw = HW
    else:
        thw = 512
    n_t = pl.cdiv(HW, thw)
    mask_tail = (HW % thw) != 0
    group8 = (thw % 8) == 0
    act_bf16 = _use_bf16_activation()

    out = pl.pallas_call(
        functools.partial(
            fused_classify_kernel,
            hw=HW, inv_hw=1.0 / HW,
            mask_tail=mask_tail, group8=group8, act_bf16=act_bf16),
        out_shape=jax.ShapeDtypeStruct((B, 1, c2p), jnp.float32),
        grid_spec=pltpu.PrefetchScalarGridSpec(
            num_scalar_prefetch=0,
            grid=(B, n_t),                       # B parallel, HW-chunks reduction
            in_specs=[
                pl.BlockSpec((1, c1, thw), lambda b, t: (b, 0, t)),
                pl.BlockSpec((c1, c_), lambda b, t: (0, 0)),
                pl.BlockSpec((1, c_), lambda b, t: (0, 0)),
                pl.BlockSpec((c_, c2p), lambda b, t: (0, 0)),
                pl.BlockSpec((1, c2p), lambda b, t: (0, 0)),
            ],
            out_specs=pl.BlockSpec((1, 1, c2p), lambda b, t: (b, 0, 0)),
            scratch_shapes=[pltpu.VMEM((8, c_), jnp.float32)],
        ),
        compiler_params=pltpu.CompilerParams(
            dimension_semantics=("parallel", "arbitrary"),
            vmem_limit_bytes=_derived_vmem_limit(c1, c_, c2p, thw),
        ),
    )(x, w1_bf, b1, w2_bf, b2p)

    return out.reshape(B, c2p)[:, :c2]


def init_params(key, c1, c2, c_=1280):
    """Deterministic synthetic parameters; BN is folded into the 1x1 conv."""
    k_conv, k_bn_g, k_bn_b, k_bn_m, k_bn_v, k_lin_w, k_lin_b = jax.random.split(key, 7)

    # Conv2d(c1, c_, k=1, bias=False): weight (c_, c1, 1, 1)
    fan_in = c1
    bound = 1.0 / math.sqrt(fan_in)
    conv_w = jax.random.uniform(k_conv, (c_, c1), jnp.float32, -bound, bound)

    # BatchNorm2d(c_) running stats + affine params (eval-mode folding)
    gamma = 1.0 + 0.1 * jax.random.normal(k_bn_g, (c_,), jnp.float32)
    beta = 0.1 * jax.random.normal(k_bn_b, (c_,), jnp.float32)
    mean = 0.1 * jax.random.normal(k_bn_m, (c_,), jnp.float32)
    var = jnp.abs(jax.random.normal(k_bn_v, (c_,), jnp.float32)) + 0.5
    eps = 1e-3  # ultralytics Conv BN eps
    scale = gamma / jnp.sqrt(var + eps)             # (c_,)
    w1 = (conv_w * scale[:, None]).T                # (c1, c_)
    b1 = (beta - mean * scale)[None, :]             # (1, c_)

    # Linear(c_, c2)
    bound2 = 1.0 / math.sqrt(c_)
    lin_w = jax.random.uniform(k_lin_w, (c2, c_), jnp.float32, -bound2, bound2)
    lin_b = jax.random.uniform(k_lin_b, (c2,), jnp.float32, -bound2, bound2)
    w2 = lin_w.T                                    # (c_, c2)
    b2 = lin_b[None, :]                             # (1, c2)

    return w1, b1, w2, b2


if __name__ == "__main__":
    B, c1, H, W = 2, 4, 16, 16
    c2 = 8

    key = jax.random.PRNGKey(0)
    k_x, k_p = jax.random.split(key)
    x = jax.random.normal(k_x, (B, c1, H, W), jnp.float32)
    params = init_params(k_p, c1, c2)

    out = classify_forward(x, params)
    out = jax.block_until_ready(out)

    # sanity: shape and exact-division softmax rows sum to ~1
    assert out.shape == (B, c2)
    assert jnp.allclose(jnp.sum(out, axis=1), 1.0, atol=1e-4)

    # reference in plain JAX, mirroring the kernel's precision choices
    # (bf16 MXU inputs / f32 accumulation, bf16 sigmoid on v6e/v7x).
    w1, b1, w2, b2 = params
    act_bf16 = _use_bf16_activation()
    xr = x.reshape(B, c1, H * W)
    h = jnp.einsum("bcs,cd->bsd", xr.astype(jnp.bfloat16),
                   w1.astype(jnp.bfloat16),
                   preferred_element_type=jnp.float32) + b1
    if act_bf16:
        sig = jax.nn.sigmoid(h.astype(jnp.bfloat16)).astype(jnp.float32)
    else:
        sig = jax.nn.sigmoid(h)
    h = h * sig
    pooled_ref = jnp.mean(h, axis=1)
    logits = jnp.dot(pooled_ref.astype(jnp.bfloat16), w2.astype(jnp.bfloat16),
                     preferred_element_type=jnp.float32) + b2
    ref = jax.nn.softmax(logits, axis=-1)
    err = float(jnp.max(jnp.abs(out - ref)))
    # Pallas EUP vs XLA bf16 sigmoid may differ by a few bf16 ulps; 1e-2 abs
    # tolerance on probabilities is comfortably above the observed gap.
    assert err < 1e-2, err

    print("KERNEL_OK")
</pallas_src>

<mosaic_0001>
module attributes {stable_mosaic.version = 11 : i64} {
  func.func @fused_classify_kernel(%arg0: i32, %arg1: i32, %arg2: memref<1x4x256xf32, #tpu.memory_space<vmem>>, %arg3: memref<4x1280xbf16, #tpu.memory_space<vmem>>, %arg4: memref<1x1280xf32, #tpu.memory_space<vmem>>, %arg5: memref<1280x128xbf16, #tpu.memory_space<vmem>>, %arg6: memref<1x128xf32, #tpu.memory_space<vmem>>, %arg7: memref<1x1x128xf32, #tpu.memory_space<vmem>>, %arg8: memref<8x1280xf32, #tpu.memory_space<vmem>>) attributes {dimension_semantics = [#tpu.dimension_semantics<parallel>, #tpu.dimension_semantics<arbitrary>], iteration_bounds = array<i64: 2, 1>, scalar_prefetch = 0 : i64, scratch_operands = 1 : i64, tpu.core_type = #tpu.core_type<tc>, window_params = [{transform_indices = @transform_0, window_bounds = array<i64: 1, 4, 256>}, {pipeline_mode = #tpu.pipeline_mode<synchronous>, transform_indices = @transform_1, window_bounds = array<i64: 4, 1280>}, {pipeline_mode = #tpu.pipeline_mode<synchronous>, transform_indices = @transform_2, window_bounds = array<i64: 1, 1280>}, {pipeline_mode = #tpu.pipeline_mode<synchronous>, transform_indices = @transform_3, window_bounds = array<i64: 1280, 128>}, {pipeline_mode = #tpu.pipeline_mode<synchronous>, transform_indices = @transform_4, window_bounds = array<i64: 1, 128>}, {transform_indices = @transform_5, window_bounds = array<i64: 1, 1, 128>}]} {
    %c0_i32 = arith.constant 0 : i32
    %0 = arith.cmpi eq, %arg1, %c0_i32 : i32
    %1 = arith.extui %0 : i1 to i32
    %c0_i32_0 = arith.constant 0 : i32
    %2 = arith.cmpi ne, %1, %c0_i32_0 : i32
    scf.if %2 {
      %cst_15 = arith.constant 0.000000e+00 : f32
      %25 = vector.broadcast %cst_15 : f32 to vector<8x1280xf32>
      %c0_16 = arith.constant 0 : index
      %c0_17 = arith.constant 0 : index
      %26 = vector.load %arg8[%c0_16, %c0_17] : memref<8x1280xf32, #tpu.memory_space<vmem>>, vector<8x1280xf32>
      tpu.vector_store %arg8[%c0_16, %c0_17], %25 {strides = array<i32>} : memref<8x1280xf32, #tpu.memory_space<vmem>>, vector<8x1280xf32>,
    } else {
    }
    %c0 = arith.constant 0 : index
    %c0_1 = arith.constant 0 : index
    %c0_2 = arith.constant 0 : index
    %3 = vector.load %arg2[%c0, %c0_1, %c0_2] : memref<1x4x256xf32, #tpu.memory_space<vmem>>, vector<1x4x256xf32>
    %4 = vector.shape_cast %3 : vector<1x4x256xf32> to vector<4x256xf32>
    %5 = arith.truncf %4 : vector<4x256xf32> to vector<4x256xbf16>
    %c0_3 = arith.constant 0 : index
    %c0_4 = arith.constant 0 : index
    %6 = vector.load %arg3[%c0_3, %c0_4] : memref<4x1280xbf16, #tpu.memory_space<vmem>>, vector<4x1280xbf16>
    %cst = arith.constant dense<0.000000e+00> : vector<256x1280xf32>
    %7 = tpu.matmul %5, %6, %cst {dimension_numbers = #tpu.dot_dimension_numbers<[0], [0], [1], [1], [0, 1, 1, 1], [], []>} : vector<4x256xbf16>, vector<4x1280xbf16>, vector<256x1280xf32> -> vector<256x1280xf32>
    %c0_5 = arith.constant 0 : index
    %c0_6 = arith.constant 0 : index
    %8 = vector.load %arg4[%c0_5, %c0_6] : memref<1x1280xf32, #tpu.memory_space<vmem>>, vector<1x1280xf32>
    %9 = vector.broadcast %8 : vector<1x1280xf32> to vector<256x1280xf32>
    %10 = arith.addf %7, %9 : vector<256x1280xf32>
    %11 = arith.negf %10 : vector<256x1280xf32>
    %12 = math.exp %11 : vector<256x1280xf32>
    %cst_7 = arith.constant 1.000000e+00 : f32
    %13 = vector.broadcast %cst_7 : f32 to vector<256x1280xf32>
    %14 = arith.addf %13, %12 : vector<256x1280xf32>
    %15 = arith.divf %13, %14 : vector<256x1280xf32>
    %16 = arith.mulf %10, %15 : vector<256x1280xf32>
    %c0_8 = arith.constant 0 : index
    %c0_9 = arith.constant 0 : index
    %17 = vector.load %arg8[%c0_8, %c0_9] : memref<8x1280xf32, #tpu.memory_space<vmem>>, vector<8x1280xf32>
    %18 = vector.shape_cast %16 : vector<256x1280xf32> to vector<32x8x1280xf32>
    %cst_10 = arith.constant dense<0.000000e+00> : vector<8x1280xf32>
    %19 = vector.multi_reduction <add>, %18, %cst_10 [0] : vector<32x8x1280xf32> to vector<8x1280xf32>
    %20 = arith.addf %17, %19 : vector<8x1280xf32>
    %c0_11 = arith.constant 0 : index
    %c0_12 = arith.constant 0 : index
    %21 = vector.load %arg8[%c0_11, %c0_12] : memref<8x1280xf32, #tpu.memory_space<vmem>>, vector<8x1280xf32>
    tpu.vector_store %arg8[%c0_11, %c0_12], %20 {strides = array<i32>} : memref<8x1280xf32, #tpu.memory_space<vmem>>, vector<8x1280xf32>,
    %c0_i32_13 = arith.constant 0 : i32
    %22 = arith.cmpi eq, %arg1, %c0_i32_13 : i32
    %23 = arith.extui %22 : i1 to i32
    %c0_i32_14 = arith.constant 0 : i32
    %24 = arith.cmpi ne, %23, %c0_i32_14 : i32
    scf.if %24 {
      %c0_15 = arith.constant 0 : index
      %c0_16 = arith.constant 0 : index
      %25 = vector.load %arg8[%c0_15, %c0_16] : memref<8x1280xf32, #tpu.memory_space<vmem>>, vector<8x1280xf32>
      %cst_17 = arith.constant dense<0.000000e+00> : vector<1280xf32>
      %26 = vector.multi_reduction <add>, %25, %cst_17 [0] : vector<8x1280xf32> to vector<1280xf32>
      %27 = vector.shape_cast %26 : vector<1280xf32> to vector<1x1280xf32>
      %cst_18 = arith.constant 3.906250e-03 : f32
      %28 = vector.broadcast %cst_18 : f32 to vector<1x1280xf32>
      %29 = arith.mulf %27, %28 : vector<1x1280xf32>
      %30 = arith.truncf %29 : vector<1x1280xf32> to vector<1x1280xbf16>
      %c0_19 = arith.constant 0 : index
      %c0_20 = arith.constant 0 : index
      %31 = vector.load %arg5[%c0_19, %c0_20] : memref<1280x128xbf16, #tpu.memory_space<vmem>>, vector<1280x128xbf16>
      %cst_21 = arith.constant dense<0.000000e+00> : vector<1x128xf32>
      %32 = tpu.matmul %30, %31, %cst_21 {dimension_numbers = #tpu.dot_dimension_numbers<[1], [0], [0], [1], [0, 0, 1, 1], [], []>} : vector<1x1280xbf16>, vector<1280x128xbf16>, vector<1x128xf32> -> vector<1x128xf32>
      %c0_22 = arith.constant 0 : index
      %c0_23 = arith.constant 0 : index
      %33 = vector.load %arg6[%c0_22, %c0_23] : memref<1x128xf32, #tpu.memory_space<vmem>>, vector<1x128xf32>
      %34 = arith.addf %32, %33 : vector<1x128xf32>
      %cst_24 = arith.constant dense<0xFF800000> : vector<1xf32>
      %35 = vector.multi_reduction <maximumf>, %34, %cst_24 [1] : vector<1x128xf32> to vector<1xf32>
      %36 = vector.shape_cast %35 : vector<1xf32> to vector<1x1xf32>
      %37 = vector.broadcast %36 : vector<1x1xf32> to vector<1x128xf32>
      %38 = arith.subf %34, %37 : vector<1x128xf32>
      %39 = math.exp %38 : vector<1x128xf32>
      %cst_25 = arith.constant dense<0.000000e+00> : vector<1xf32>
      %40 = vector.multi_reduction <add>, %39, %cst_25 [1] : vector<1x128xf32> to vector<1xf32>
      %41 = vector.shape_cast %40 : vector<1xf32> to vector<1x1xf32>
      %42 = vector.broadcast %41 : vector<1x1xf32> to vector<1x128xf32>
      %43 = arith.divf %39, %42 : vector<1x128xf32>
      %c0_26 = arith.constant 0 : index
      %c0_27 = arith.constant 0 : index
      %c0_28 = arith.constant 0 : index
      %44 = vector.load %arg7[%c0_26, %c0_27, %c0_28] : memref<1x1x128xf32, #tpu.memory_space<vmem>>, vector<1x1x128xf32>
      %45 = vector.shape_cast %44 : vector<1x1x128xf32> to vector<1x128xf32>
      %46 = vector.shape_cast %43 : vector<1x128xf32> to vector<1x1x128xf32>
      tpu.vector_store %arg7[%c0_26, %c0_27, %c0_28], %46 {strides = array<i32>} : memref<1x1x128xf32, #tpu.memory_space<vmem>>, vector<1x1x128xf32>,
    } else {
    }
    return
  }
  func.func @transform_0(%arg0: i32, %arg1: i32) -> (i32, i32, i32) {
    %c0_i32 = arith.constant 0 : i32
    %c0_i32_0 = arith.constant 0 : i32
    return %arg0, %c0_i32, %arg1 : i32, i32, i32
  }
  func.func @transform_1(%arg0: i32, %arg1: i32) -> (i32, i32) {
    %c0_i32 = arith.constant 0 : i32
    %c0_i32_0 = arith.constant 0 : i32
    %c0_i32_1 = arith.constant 0 : i32
    return %c0_i32, %c0_i32_0 : i32, i32
  }
  func.func @transform_2(%arg0: i32, %arg1: i32) -> (i32, i32) {
    %c0_i32 = arith.constant 0 : i32
    %c0_i32_0 = arith.constant 0 : i32
    %c0_i32_1 = arith.constant 0 : i32
    return %c0_i32, %c0_i32_0 : i32, i32
  }
  func.func @transform_3(%arg0: i32, %arg1: i32) -> (i32, i32) {
    %c0_i32 = arith.constant 0 : i32
    %c0_i32_0 = arith.constant 0 : i32
    %c0_i32_1 = arith.constant 0 : i32
    return %c0_i32, %c0_i32_0 : i32, i32
  }
  func.func @transform_4(%arg0: i32, %arg1: i32) -> (i32, i32) {
    %c0_i32 = arith.constant 0 : i32
    %c0_i32_0 = arith.constant 0 : i32
    %c0_i32_1 = arith.constant 0 : i32
    return %c0_i32, %c0_i32_0 : i32, i32
  }
  func.func @transform_5(%arg0: i32, %arg1: i32) -> (i32, i32, i32) {
    %c0_i32 = arith.constant 0 : i32
    %c0_i32_0 = arith.constant 0 : i32
    %c0_i32_1 = arith.constant 0 : i32
    return %arg0, %c0_i32, %c0_i32_0 : i32, i32, i32
  }
}

</mosaic_0001>

<bundles_post_ra>
// kernel: tpu_custom_call.1
= control target key start
LH: loop header
LB: loop body
LE: loop exit
PB: predicated region body
PF: predicated region fallthrough
CT: control target
= control target key end

     0   :  { %10 = vsyncpa [#allocation4], 0  ;;  %s10261_s0 = inlined_call_operand.hbm [shape: f32[2,4,256], index: 0, kind: input, shape index: {}]   ;;  %s10262_s1 = inlined_call_operand.hbm [shape: bf16[4,1280], index: 1, kind: input, shape index: {}]   ;;  %s10263_s2 = inlined_call_operand.hbm [shape: f32[1,1280], index: 2, kind: input, shape index: {}]   ;;  %s10264_s3 = inlined_call_operand.hbm [shape: bf16[1280,128], index: 3, kind: input, shape index: {}]   ;;  %s10265_s4 = inlined_call_operand.vmem [shape: f32[1,128], index: 4, kind: input, shape index: {}]   ;;  %s10266_s5 = inlined_call_operand.hbm [shape: f32[2,1,128], index: 5, kind: output, shape index: {}]  }
   0x1   :  { %12 = vsyncpa [#allocation4 + $0x1], 0 }
   0x2   :  { %13 = vsyncpa [#allocation7], 0 }
   0x3   :  { %14 = vsyncpa [#allocation10], 0 }
   0x4   :  { %15 = vsyncpa [#allocation5], 0 }
   0x5   :  { %17 = vsyncpa [#allocation5 + $0x1], 0  ;;  %s7469_s18 = smov 0   ;;  %s7471_s19 = smov 0  }
   0x6   :  { %s7473_s20 = smov 0   ;;  %s7475_s21 = smov 0  }
   0x7   :  { %s7477_s22 = smov 0   ;;  %s7479_s23 = smov 0  }
   0x8 LB: > { %s5143_s24 = sadd.s32 4294967295, %s7428_s23   ;;  %s5144_s25 = sadd.s32 4294967294, %s7428_s23   ;;  %s7428_s23 = sphi %s7479_s23, %s23_s23   ;;  %s7424_s22 = sphi %s7477_s22, %s10993_s22   ;;  %s7420_s21 = sphi %s7475_s21, %s10992_s21   ;;  %s7416_s20 = sphi %s7473_s20, %s10991_s20   ;;  %s7412_s19 = sphi %s7471_s19, %s10990_s19   ;;  %s7408_s18 = sphi %s7469_s18, %s10989_s18  }
   0x9   : > { %p57_p0 = scmp.ne.s32.totalorder %s7412_s19, %s7408_s18  ;;  %p7503_p1 = scmp.eq.s32.totalorder %s5143_s24, 0 }
   0xa   : > { %p7507_p2 = scmp.eq.s32.totalorder %s5143_s24, 1  ;;  %p171_p3 = scmp.eq.s32.totalorder %s5144_s25, 1 }
   0xb   : > { %s10488_s26 = scalar_select %p7503_p1, 1, 0 }
   0xc   : > { %s10489_s27 = scalar_select %p7507_p2, 1, 0 }
   0xd   : > { %p7513_p4 = por %p7503_p1, %p57_p0  ;;  %p5145_p5 = scmp.ge.s32.totalorder %s7428_s23, 1 }
   0xe   : > { %p7518_p6 = por %p171_p3, %p57_p0  ;;  %p178_p7 = scmp.lt.s32.totalorder %s7428_s23, 3 }
   0xf   : > { %s10490_s28 = scalar_select %p7513_p4, 1, 0 }
  0x10   : > { %s10491_s29 = scalar_select %p7518_p6, 1, 0 }
  0x11   : > { %p7523_p8 = pnand %p5145_p5, %p178_p7  ;;  %s7430_s6 = smov [#allocation6]  }
  0x12   : > { %s191_s7 = sshll.u32 %s7430_s6, 4  ;;  %s7431_s8 = smov [#allocation8]   ;;  %s192_s7 = int_to_ptr.vmem [resolvable:$true] %s191_s7 }
  0x13   : > { %s10492_s30 = scalar_select %p7523_p8, 1, 0 }
  0x14   : > { %p5776_p10 = pneg %p7523_p8  ;;  %s202_s9 = sshll.u32 %s7431_s8, 4  ;;  %s7536_s9 = int_to_ptr.vmem [resolvable:$true] %s202_s9 }
  0x15   : > { %s7432_s11 = smov [#allocation9]   ;;  %s7224_s15 = scalar_lea.hbm %s10262_s1, 320 }
  0x16   : > { %p7532_p11 = pnand %p5776_p10, %p7503_p1  ;;  %s212_s12 = sshll.u32 %s7432_s11, 4  ;;  %s7538_s12 = int_to_ptr.vmem [resolvable:$true] %s212_s12 }
  0x17   : > { %p7225_p12 = scmp.ne.s32.totalorder %s10262_s1, %s7224_s15  ;;  %p7231_p5 = scmp.lt.u32.totalorder %s7224_s15, %s10262_s1 }
  0x18   : > { %p7548_p13 = pneg %p7532_p11 }
  0x1a   : > { %p7227_p0 = pnand %p7548_p13, %p7225_p12 }
  0x1c   : > { %p7228_p3 = pneg %p7227_p0 }
  0x1e   : > { %p7233_p7 = pnand %p7231_p5, %p7228_p3 }
  0x20   : > { %7236 = shalt.err (!%p7233_p7)
}
  0x21   : > { %s7237_s8 = scalar_lea.vmem %s192_s7, 320  ;;  %p7245_p1 = scmp.lt.s32.totalorder %s192_s7, %s192_s7 }
  0x22   : > { %p7238_p10 = scmp.ne.s32.totalorder %s192_s7, %s7237_s8  ;;  %p7246_p4 = scmp.lt.s32.totalorder %s7237_s8, %s7237_s8 }
  0x24   : > { %p7240_p9 = pnand %p7238_p10, %p7548_p13  ;;  %p7247_p8 = por %p7246_p4, %p7245_p1 }
  0x26   : > { %p7241_p6 = pneg %p7240_p9 }
  0x28   : > { %p7248_p2 = pnand %p7247_p8, %p7241_p6 }
  0x2a   : > { %7251 = shalt.err (!%p7248_p2)
}
  0x2b   : > { %5779 = dma.hbm_to_vmem [thread:$0]  (!%p7532_p11), %s10262_s1, 320, %s192_s7, [#allocation7]  }
  0x2c   : > { %s7252_s16 = scalar_lea.hbm %s10263_s2, 160 }
  0x2d   : > { %p7253_p9 = scmp.ne.s32.totalorder %s10263_s2, %s7252_s16  ;;  %p7259_p2 = scmp.lt.u32.totalorder %s7252_s16, %s10263_s2 }
  0x2f   : > { %p7255_p12 = pnand %p7253_p9, %p7548_p13 }
  0x31   : > { %p7256_p1 = pneg %p7255_p12 }
  0x33   : > { %p7261_p4 = pnand %p7259_p2, %p7256_p1 }
  0x35   : > { %7264 = shalt.err (!%p7261_p4)
}
  0x36   : > { %s7265_s7 = scalar_lea.vmem %s7536_s9, 160  ;;  %p7273_p3 = scmp.lt.s32.totalorder %s7536_s9, %s7536_s9 }
  0x37   : > { %p7266_p6 = scmp.ne.s32.totalorder %s7536_s9, %s7265_s7  ;;  %p7274_p5 = scmp.lt.s32.totalorder %s7265_s7, %s7265_s7 }
  0x39   : > { %p7268_p8 = pnand %p7266_p6, %p7548_p13  ;;  %p7275_p7 = por %p7274_p5, %p7273_p3 }
  0x3b   : > { %p7269_p0 = pneg %p7268_p8 }
  0x3d   : > { %p7276_p10 = pnand %p7275_p7, %p7269_p0 }
  0x3f   : > { %7279 = shalt.err (!%p7276_p10)
}
  0x40   : > { %5782 = dma.hbm_to_vmem [thread:$0]  (!%p7532_p11), %s10263_s2, 160, %s7536_s9, [#allocation7]  }
  0x41   : > { %s7280_s16 = scalar_lea.hbm %s10264_s3, 10240 }
  0x42   : > { %p7281_p9 = scmp.ne.s32.totalorder %s10264_s3, %s7280_s16  ;;  %p7287_p2 = scmp.lt.u32.totalorder %s7280_s16, %s10264_s3 }
  0x44   : > { %p7283_p12 = pnand %p7281_p9, %p7548_p13 }
  0x46   : > { %p7284_p1 = pneg %p7283_p12 }
  0x48   : > { %p7289_p4 = pnand %p7287_p2, %p7284_p1 }
  0x4a   : > { %7292 = shalt.err (!%p7289_p4)
}
  0x4b   : > { %s7293_s9 = scalar_lea.vmem %s7538_s12, 10240  ;;  %p7301_p3 = scmp.lt.s32.totalorder %s7538_s12, %s7538_s12 }
  0x4c   : > { %p7294_p6 = scmp.ne.s32.totalorder %s7538_s12, %s7293_s9  ;;  %p7302_p5 = scmp.lt.s32.totalorder %s7293_s9, %s7293_s9 }
  0x4e   : > { %p7296_p8 = pnand %p7294_p6, %p7548_p13  ;;  %p7303_p7 = por %p7302_p5, %p7301_p3 }
  0x50   : > { %p7297_p0 = pneg %p7296_p8 }
  0x52   : > { %p7304_p10 = pnand %p7303_p7, %p7297_p0 }
  0x54   : > { %7307 = shalt.err (!%p7304_p10)
}
  0x55   : > { %s7433_s7 = smov 64   ;;  %s7434_s24 = smov 4  }
  0x56   : > { %5785 = dma.hbm_to_vmem [thread:$0]  (!%p7532_p11), %s10264_s3, 10240, %s7538_s12, [#allocation10], %s7433_s7, %s7433_s7, %s7434_s24  }
  0x57   : > { %s44_s14 = sadd.s32 1, %s7416_s20  ;;  %s35_s15 = sadd.s32 1, %s7424_s22 }
  0x58   : > { %p51_p13 = scmp.ne.s32.totalorder %s7416_s20, %s7412_s19  ;;  %p37_p9 = scmp.ge.s32.totalorder %s35_s15, 2 }
  0x59   : > { %p52_p12 = scmp.eq.s32.totalorder %s7428_s23, 0  ;;  %p10495_p1 = scmp.ne.s32.totalorder %s10489_s27, 0 }
  0x5a   : > { %p5797_p4 = scmp.lt.s32.totalorder %s7428_s23, 2  ;;  %s10995_s15 = smov (%p37_p9, %s35_s15), 0 }
  0x5b   : > { %p7617_p2 = por %p10495_p1, %p51_p13  ;;  %p53_p6 = por %p52_p12, %p51_p13 }
  0x5c   : > { %s229_s10 = sand.u32 1, %s7416_s20   ;;  %s39_s17 = ssub.s32 %s7424_s22, %s10995_s15 }
  0x5d   : > { %p42_p8 = scmp.eq.s32.totalorder %s39_s17, 0  ;;  %s5150_s12 = sshll.u32 %s229_s10, 3 }
  0x5e   : > { %s5647_s25 = sshll.u32 %s7424_s22, 7  ;;  %s233_s7 = scalar_lea.vmem [#allocation3], %s5150_s12 }
  0x5f   : > { %s7629_s6 = scalar_select %p42_p8, %s7416_s20, %s44_s14  }
  0x60   : > { %s7634_s27 = scalar_lea.hbm %s10261_s0, %s5647_s25  ;;  %s243_s24 = sshll.u32 %s233_s7, 4  ;;  %s7636_s24 = int_to_ptr.vmem [resolvable:$true] %s243_s24 }
  0x61   : > { %p7640_p11 = pnand %p5797_p4, %p53_p6  ;;  %s230_s13 = scalar_lea.sflag [#allocation4], %s229_s10 }
  0x62   : > { %s7308_s14 = scalar_lea.hbm %s7634_s27, 128  ;;  %s7313_s25 = scalar_lea.hbm %s10261_s0, 256 }
  0x63   : > { %p7309_p0 = scmp.ne.s32.totalorder %s7634_s27, %s7308_s14  ;;  %p7310_p3 = pneg %p7640_p11 }
  0x64   : > { %p7314_p10 = scmp.lt.u32.totalorder %s7634_s27, %s10261_s0  ;;  %p7315_p13 = scmp.lt.u32.totalorder %s7313_s25, %s7308_s14 }
  0x65   : > { %p7311_p5 = pnand %p7310_p3, %p7309_p0  ;;  %p7317_p12 = scmp.lt.u32.totalorder %s7308_s14, %s7634_s27 }
  0x66   : > { %p7316_p9 = por %p7315_p13, %p7314_p10 }
  0x67   : > { %p7312_p7 = pneg %p7311_p5 }
  0x68   : > { %p7318_p1 = por %p7317_p12, %p7316_p9 }
  0x6a   : > { %p7319_p4 = pnand %p7318_p1, %p7312_p7 }
  0x6c   : > { %7322 = shalt.err (!%p7319_p4)
}
  0x6d   : > { %s7323_s10 = scalar_lea.vmem %s7636_s24, 128  ;;  %s7435_s7 = smov [#allocation3]  }
  0x6e   : > { %p7324_p6 = scmp.ne.s32.totalorder %s7636_s24, %s7323_s10  ;;  %s7328_s17 = sshll.u32 %s7435_s7, 4  ;;  %s7329_s17 = int_to_ptr.vmem [resolvable:$false] %s7328_s17 }
  0x6f   : > { %s7330_s12 = scalar_lea.vmem %s7329_s17, 256  ;;  %p7331_p5 = scmp.lt.s32.totalorder %s7636_s24, %s7329_s17 }
  0x70   : > { %p7326_p8 = pnand %p7324_p6, %p7310_p3  ;;  %p7332_p10 = scmp.lt.s32.totalorder %s7330_s12, %s7323_s10 }
  0x72   : > { %p7327_p0 = pneg %p7326_p8  ;;  %p7333_p13 = por %p7332_p10, %p7331_p5 }
  0x74   : > { %p7334_p9 = pnand %p7333_p13, %p7327_p0 }
  0x76   : > { %7337 = shalt.err (!%p7334_p9)
}
  0x77   : > { %5789 = dma.hbm_to_vmem [thread:$0]  (!%p7640_p11), %s7634_s27, 128, %s7636_s24, %s230_s13  }
  0x78   : > { %p10498_p7 = scmp.ne.s32.totalorder %s10492_s30, 0 }
  0x7a   : > { %252 = sbr.rel (%p10498_p7) target bundleno = 1700 (0x6a4), region = 40 }
  0x81   : > { %s7672_s14 = sand.u32 1, %s7412_s19   ;;  %p10499_p3 = scmp.ne.s32.totalorder %s10490_s28, 0 }
  0x82   : > { %s5154_s25 = sshll.u32 %s7672_s14, 3  ;;  %s255_s8 = scalar_lea.sflag [#allocation4], %s7672_s14 }
  0x83   : > { %s258_s9 = scalar_lea.vmem [#allocation3], %s5154_s25 }
  0x84   : > { %7391 = dma.done.wait (%p10499_p3), %s255_s8, 128  }
  0x85   : > { %7393 = vsyncadd (%p10499_p3), %s255_s8, 4294967168  ;;  %p10500_p12 = scmp.ne.s32.totalorder %s10488_s26, 0 }
  0x87   : > { %7395 = dma.done.wait (%p10500_p12), [#allocation7], 480  }
  0x88   : > { %7397 = vsyncadd (%p10500_p12), [#allocation7], 4294966816 }
  0x89   : > { %7399 = dma.done.wait (%p10500_p12), [#allocation10], 10240  }
  0x8a   : > { %7401 = vsyncadd (%p10500_p12), [#allocation10], 4294957056  ;;  %v325_v0 = vlaneseq  ;;  %v7436_v1 = vmov 1983009808   ;;  %v10273_v3 = vmov 0   ;;  %v312_v12 = vld [vmem:[%s258_s9] sm:$0xff] }
  0x8b   : > { %v412_v2 = vunpack.c.l.s4 %v7436_v1  ;;  %564 = vmatprep.mubr.bf16.mxu0 %v10273_v3  ;;  %704 = vmatprep.mubr.bf16.mxu1 %v10273_v3  ;;  %v318_v13 = vld [vmem:[#allocation6] sm:$0xff]  ;;  %v316_v15 = vpack.c.bf16 %v312_v12, %v312_v12  ;;  %v7701_v16 = vld [vmem:[#allocation8] sm:$0xff]  ;;  %vm501_vm0 = vcmask 1041408   ;;  %v319_v17 = vld [vmem:[#allocation6 + $0x8] sm:$0xff]  ;;  %v314_v29 = vcombine.high %v312_v12, %v312_v12  ;;  %s5644_s30 = sshll.u32 %s7420_s21, 4  ;;  %s295_s27 = scalar_lea.vmem [#allocation11], %s7672_s14 }
  0x8c   : > { %v7690_v4 = vshrl.u32 %v325_v0, 7  ;;  %v410_v31 = vcombine.high %v318_v13, %v318_v13  ;;  %v7729_v34 = vld.sshfl [vmem:[#allocation6 + $0x10] sm:$0x33 pattern:$0x76325410]  ;;  %vm452_vm1 = vcmask 31744   ;;  %v427_v50 = vcombine.high %v319_v17, %v319_v17  ;;  %s10212_s10 = scalar_lea.hbm %s10266_s5, %s5644_s30 }
  0x8d   : > { %v413_v5 = vunpack.c.0.s8 %v412_v2  ;;  %375 = vxpose.xlu0.c.b16.start.end [1/1] (short) %v316_v15, 128  ;;  %v317_v30 = vpack.c.bf16 %v314_v29, %v314_v29  ;;  %v451_v36 = vcombine.high %v7729_v34, %v7729_v34  ;;  %v527_v58 = vsel %vm501_vm0, %v7729_v34, 0  ;;  %s5037_s24 = sshll.u32 %s295_s27, 4  ;;  %s5025_s7 = scalar_lea.sflag [#allocation5], %s7672_s14  ;;  %s10214_s24 = int_to_ptr.vmem [resolvable:$true] %s5037_s24 }
  0x8e   : > { %10501 = vst [vmem:[#allocation16_spill] sm:$0xff] %v7690_v4  ;;  %v335_v6 = vsub.s32 2, %v7690_v4  ;;  %v339_v7 = vsub.s32 3, %v7690_v4  ;;  %v343_v8 = vsub.s32 4, %v7690_v4  ;;  %v347_v9 = vsub.s32 5, %v7690_v4  ;;  %s7338_s17 = scalar_lea.vmem %s10214_s24, 16 }
  0x8f   : > { %v351_v10 = vsub.s32 6, %v7690_v4  ;;  %v355_v11 = vsub.s32 7, %v7690_v4  ;;  %v7699_v14 = vsub.s32 %v413_v5, %v7690_v4  ;;  %v10272_v59 = vsub.s32 0, %v7690_v4  ;;  %p7339_p11 = scmp.ne.s32.totalorder %s10214_s24, %s7338_s17  ;;  %s7438_s21 = smov [#allocation11]  }
  0x90   : > { %v7704_v18 = vrot.slane %v7701_v16, %v335_v6  ;;  %v7707_v19 = vrot.slane %v7701_v16, %v339_v7  ;;  %v7710_v20 = vrot.slane %v7701_v16, %v343_v8  ;;  %v7713_v21 = vrot.slane %v7701_v16, %v347_v9  ;;  %s7342_s12 = sshll.u32 %s7438_s21, 4  ;;  %s7343_s12 = int_to_ptr.vmem [resolvable:$false] %s7342_s12 }
  0x91   : > { %v7716_v22 = vrot.slane %v7701_v16, %v351_v10  ;;  %v7719_v23 = vrot.slane %v7701_v16, %v355_v11  ;;  %v417_v24 = vrot.slane %v318_v13, %v7699_v14  ;;  %v434_v25 = vrot.slane %v319_v17, %v7699_v14  ;;  %p7340_p1 = pnand %p7339_p11, %p7617_p2  ;;  %s7344_s25 = scalar_lea.vmem %s7343_s12, 32 }
  0x92   : > { %v424_v32 = vrot.slane %v410_v31, %v7699_v14  ;;  %v441_v52 = vrot.slane %v427_v50, %v7699_v14  ;;  %v10271_v60 = vsub.s32 1, %v7690_v4  ;;  %v7913_v61 = vrot.slane %v7701_v16, %v10272_v59  ;;  %p7345_p6 = scmp.lt.s32.totalorder %s10214_s24, %s7343_s12  ;;  %p7346_p8 = scmp.lt.s32.totalorder %s7344_s25, %s7338_s17 }
  0x93   : > { %10502 = vst [vmem:[#allocation17_spill] sm:$0xff] %v7716_v22  ;;  %10503 = vst [vmem:[#allocation18_spill] sm:$0xff] %v7719_v23  ;;  %v425_v26 = vcombine.high %v417_v24, %v417_v24  ;;  %v503_v27 = vsel %vm501_vm0, %v417_v24, 0  ;;  %v442_v28 = vcombine.high %v434_v25, %v434_v25  ;;  %v515_v35 = vsel %vm501_vm0, %v434_v25, 0  ;;  %p7341_p4 = pneg %p7340_p1 }
  0x94   : > { %v426_v33 = vcombine.high %v424_v32, %v424_v32  ;;  %v509_v54 = vsel %vm501_vm0, %v424_v32, 0  ;;  %v443_v55 = vcombine.high %v441_v52, %v441_v52  ;;  %v521_v57 = vsel %vm501_vm0, %v441_v52, 0  ;;  %p7347_p0 = por %p7346_p8, %p7345_p6 }
  0x95   : > { %5159 = vmatprep.subr.msk.bf16.mxu0 %vm501_vm0, %v425_v26  ;;  %5758 = vmatprep.subr.msk.bf16.mxu1 %vm501_vm0, %v425_v26  ;;  %v7922_v62 = vrot.slane %v7701_v16, %v10271_v60  ;;  %vm5011_vm2 = vcmask 1040384  }
  0x96   : > { %533 = vmatpush1.bf16.msra.mxu0 %v503_v27  ;;  %5759 = vmatpush1.bf16.msra.mxu1 %v503_v27  ;;  %p7348_p5 = pnand %p7347_p0, %p7341_p4 }
  0x97   : > { %5193 = vmatprep.subr.msk.bf16.mxu0 %vm501_vm0, %v442_v28  ;;  %5176 = vmatprep.subr.msk.bf16.mxu1 %vm501_vm0, %v426_v33 }
  0xaa   : > { %391 = vxpose.xlu0.c.b16.start.end [1/1] (short) %v317_v30, 128 }
  0xf3   : > { %v7734_v37 = vpop.trf.xlu0 }
  0xf4   : > { %5160 = vmatmul.mubr.msk.bf16.vlgmr.msra.gmra.mrb[0].mxu0 %vm452_vm1, %v7734_v37 }
  0xf5   : > { %919 = vmatpush1.bf16.msra.mxu0 %v515_v35  ;;  %574 = vmatprep.mubr.bf16.mxu0 %v10273_v3 }
  0xf6   : > { %5227 = vmatprep.subr.msk.bf16.mxu0 %vm501_vm0, %v451_v36 }
  0xf7   : > { %v7740_v38 = vpop.trf.xlu0 }
  0xfb   : > { %v7742_v39 = vpop.trf.xlu0 }
  0xfc   : > { %5161 = vmatmul.mubr.msk.bf16.gmra.mrb[4].mxu0 %vm452_vm1, %v7740_v38 }
  0xfd   : > { %584 = vmatprep.mubr.bf16.mxu0 %v10273_v3 }
  0xff   : > { %v7747_v40 = vpop.trf.xlu0 }
 0x103   : > { %v7749_v41 = vpop.trf.xlu0 }
 0x104   : > { %5162 = vmatmul.mubr.msk.bf16.gmra.mrb[8].mxu0 %vm452_vm1, %v7742_v39 }
 0x105   : > { %594 = vmatprep.mubr.bf16.mxu0 %v10273_v3 }
 0x107   : > { %v7754_v42 = vpop.trf.xlu0 }
 0x10b   : > { %v7756_v43 = vpop.trf.xlu0 }
 0x10c   : > { %5163 = vmatmul.mubr.msk.bf16.gmra.mrb[12].mxu0 %vm452_vm1, %v7747_v40 }
 0x10d   : > { %604 = vmatprep.mubr.bf16.mxu0 %v10273_v3 }
 0x10f   : > { %v7761_v44 = vpop.trf.xlu0 }
 0x113   : > { %v7763_v45 = vpop.trf.xlu0 }
 0x114   : > { %5164 = vmatmul.mubr.msk.bf16.gmra.mrb[16].mxu0 %vm452_vm1, %v7749_v41 }
 0x115   : > { %614 = vmatprep.mubr.bf16.mxu0 %v10273_v3 }
 0x117   : > { %v7768_v46 = vpop.trf.xlu0 }
 0x11b   : > { %v7770_v47 = vpop.trf.xlu0 }
 0x11c   : > { %5165 = vmatmul.mubr.msk.bf16.gmra.mrb[20].mxu0 %vm452_vm1, %v7754_v42 }
 0x11d   : > { %624 = vmatprep.mubr.bf16.mxu0 %v10273_v3 }
 0x11f   : > { %v7775_v48 = vpop.trf.xlu0 }
 0x123   : > { %v7777_v49 = vpop.trf.xlu0 }
 0x124   : > { %5166 = vmatmul.mubr.msk.bf16.gmra.mrb[24].mxu0 %vm452_vm1, %v7756_v43 }
 0x125   : > { %634 = vmatprep.mubr.bf16.mxu0 %v10273_v3 }
 0x127   : > { %v7782_v51 = vpop.trf.xlu0 }
 0x128   : > { %10504 = vst [vmem:[#allocation19_spill] sm:$0xff] %v7782_v51 }
 0x12b   : > { %v7785_v53 = vpop.trf.xlu0 }
 0x12c   : > { %10505 = vst [vmem:[#allocation20_spill] sm:$0xff] %v7785_v53  ;;  %5167 = vmatmul.mubr.msk.bf16.gmra.mrb[28].mxu0 %vm452_vm1, %v7761_v44  ;;  %5174 = vmatmul.mubr.msk.bf16.vlgmr.msra.gmra.mrb[0].mxu1 %vm452_vm1, %v7785_v53 }
 0x12d   : > { %644 = vmatprep.mubr.bf16.mxu0 %v10273_v3  ;;  %714 = vmatprep.mubr.bf16.mxu1 %v10273_v3 }
 0x12e   : > { %726 = vmatpush1.bf16.msra.mxu1 %v509_v54 }
 0x12f   : > { %5210 = vmatprep.subr.msk.bf16.mxu1 %vm501_vm0, %v443_v55  ;;  %v7795_v56 = vpop.trf.xlu0 }
 0x130   : > { %10506 = vst [vmem:[#allocation21_spill] sm:$0xff] %v7795_v56 }
 0x134   : > { %5168 = vmatmul.mubr.msk.bf16.gmra.mrb[32].mxu0 %vm452_vm1, %v7763_v45  ;;  %5175 = vmatmul.mubr.msk.bf16.gmra.mrb[4].mxu1 %vm452_vm1, %v7795_v56 }
 0x135   : > { %654 = vmatprep.mubr.bf16.mxu0 %v10273_v3  ;;  %757 = vmatprep.mubr.bf16.mxu1 %v10273_v3 }
 0x13c   : > { %5169 = vmatmul.mubr.msk.bf16.gmra.mrb[36].mxu0 %vm452_vm1, %v7768_v46  ;;  %5177 = vmatmul.mubr.msk.bf16.vlgmr.msra.gmra.mrb[8].mxu1 %vm452_vm1, %v7734_v37 }
 0x13d   : > { %664 = vmatprep.mubr.bf16.mxu0 %v10273_v3  ;;  %767 = vmatprep.mubr.bf16.mxu1 %v10273_v3 }
 0x13e   : > { %1112 = vmatpush1.bf16.msra.mxu1 %v521_v57 }
 0x144   : > { %5170 = vmatmul.mubr.msk.bf16.gmra.mrb[40].mxu0 %vm452_vm1, %v7770_v47  ;;  %5178 = vmatmul.mubr.msk.bf16.gmra.mrb[12].mxu1 %vm452_vm1, %v7740_v38 }
 0x145   : > { %674 = vmatprep.mubr.bf16.mxu0 %v10273_v3  ;;  %777 = vmatprep.mubr.bf16.mxu1 %v10273_v3 }
 0x14c   : > { %5171 = vmatmul.mubr.msk.bf16.gmra.mrb[44].mxu0 %vm452_vm1, %v7775_v48  ;;  %5179 = vmatmul.mubr.msk.bf16.gmra.mrb[16].mxu1 %vm452_vm1, %v7742_v39 }
 0x14d   : > { %684 = vmatprep.mubr.bf16.mxu0 %v10273_v3  ;;  %787 = vmatprep.mubr.bf16.mxu1 %v10273_v3 }
 0x154   : > { %5172 = vmatmul.mubr.msk.bf16.gmra.mrb[48].mxu0 %vm452_vm1, %v7777_v49  ;;  %5180 = vmatmul.mubr.msk.bf16.gmra.mrb[20].mxu1 %vm452_vm1, %v7747_v40 }
 0x155   : > { %694 = vmatprep.mubr.bf16.mxu0 %v10273_v3  ;;  %797 = vmatprep.mubr.bf16.mxu1 %v10273_v3 }
 0x15c   : > { %5173 = vmatmul.mubr.msk.bf16.gmra.mrb[52].mxu0 %vm452_vm1, %v7782_v51  ;;  %5181 = vmatmul.mubr.msk.bf16.gmra.mrb[24].mxu1 %vm452_vm1, %v7749_v41 }
 0x15d   : > { %807 = vmatprep.mubr.bf16.mxu1 %v10273_v3  ;;  %950 = vmatprep.mubr.bf16.mxu0 %v10273_v3 }
 0x164   : > { %5182 = vmatmul.mubr.msk.bf16.gmra.mrb[28].mxu1 %vm452_vm1, %v7754_v42  ;;  %5194 = vmatmul.mubr.msk.bf16.vlgmr.msra.gmra.mrb[56].mxu0 %vm452_vm1, %v7734_v37 }
 0x165   : > { %1305 = vmatpush1.bf16.msra.mxu0 %v527_v58  ;;  %817 = vmatprep.mubr.bf16.mxu1 %v10273_v3 }
 0x166   : > { %960 = vmatprep.mubr.bf16.mxu0 %v10273_v3 }
 0x16c   : > { %5183 = vmatmul.mubr.msk.bf16.gmra.mrb[32].mxu1 %vm452_vm1, %v7756_v43  ;;  %5195 = vmatmul.mubr.msk.bf16.gmra.mrb[60].mxu0 %vm452_vm1, %v7740_v38 }
 0x16d   : > { %827 = vmatprep.mubr.bf16.mxu1 %v10273_v3  ;;  %970 = vmatprep.mubr.bf16.mxu0 %v10273_v3 }
 0x174   : > { %5184 = vmatmul.mubr.msk.bf16.gmra.mrb[36].mxu1 %vm452_vm1, %v7761_v44  ;;  %5196 = vmatmul.mubr.msk.bf16.gmra.mrb[64].mxu0 %vm452_vm1, %v7742_v39 }
 0x175   : > { %837 = vmatprep.mubr.bf16.mxu1 %v10273_v3  ;;  %980 = vmatprep.mubr.bf16.mxu0 %v10273_v3 }
 0x17c   : > { %5185 = vmatmul.mubr.msk.bf16.gmra.mrb[40].mxu1 %vm452_vm1, %v7763_v45  ;;  %5197 = vmatmul.mubr.msk.bf16.gmra.mrb[68].mxu0 %vm452_vm1, %v7747_v40 }
 0x17d   : > { %847 = vmatprep.mubr.bf16.mxu1 %v10273_v3  ;;  %990 = vmatprep.mubr.bf16.mxu0 %v10273_v3 }
 0x184   : > { %5186 = vmatmul.mubr.msk.bf16.gmra.mrb[44].mxu1 %vm452_vm1, %v7768_v46  ;;  %5198 = vmatmul.mubr.msk.bf16.gmra.mrb[72].mxu0 %vm452_vm1, %v7749_v41 }
 0x185   : > { %857 = vmatprep.mubr.bf16.mxu1 %v10273_v3  ;;  %1000 = vmatprep.mubr.bf16.mxu0 %v10273_v3 }
 0x18c   : > { %5187 = vmatmul.mubr.msk.bf16.gmra.mrb[48].mxu1 %vm452_vm1, %v7770_v47  ;;  %5199 = vmatmul.mubr.msk.bf16.gmra.mrb[76].mxu0 %vm452_vm1, %v7754_v42 }
 0x18d   : > { %867 = vmatprep.mubr.bf16.mxu1 %v10273_v3  ;;  %1010 = vmatprep.mubr.bf16.mxu0 %v10273_v3 }
 0x194   : > { %5188 = vmatmul.mubr.msk.bf16.gmra.mrb[52].mxu1 %vm452_vm1, %v7775_v48  ;;  %5200 = vmatmul.mubr.msk.bf16.gmra.mrb[80].mxu0 %vm452_vm1, %v7756_v43 }
 0x195   : > { %877 = vmatprep.mubr.bf16.mxu1 %v10273_v3  ;;  %1020 = vmatprep.mubr.bf16.mxu0 %v10273_v3 }
 0x19c   : > { %5189 = vmatmul.mubr.msk.bf16.gmra.mrb[56].mxu1 %vm452_vm1, %v7777_v49  ;;  %5201 = vmatmul.mubr.msk.bf16.gmra.mrb[84].mxu0 %vm452_vm1, %v7761_v44 }
 0x19d   : > { %887 = vmatprep.mubr.bf16.mxu1 %v10273_v3  ;;  %1030 = vmatprep.mubr.bf16.mxu0 %v10273_v3 }
 0x1a4   : > { %5190 = vmatmul.mubr.msk.bf16.gmra.mrb[60].mxu1 %vm452_vm1, %v7782_v51  ;;  %5202 = vmatmul.mubr.msk.bf16.gmra.mrb[88].mxu0 %vm452_vm1, %v7763_v45 }
 0x1a5   : > { %897 = vmatprep.mubr.bf16.mxu1 %v10273_v3  ;;  %1040 = vmatprep.mubr.bf16.mxu0 %v10273_v3 }
 0x1ac   : > { %5191 = vmatmul.mubr.msk.bf16.gmra.mrb[64].mxu1 %vm452_vm1, %v7785_v53  ;;  %5203 = vmatmul.mubr.msk.bf16.gmra.mrb[92].mxu0 %vm452_vm1, %v7768_v46 }
 0x1ad   : > { %907 = vmatprep.mubr.bf16.mxu1 %v10273_v3  ;;  %1050 = vmatprep.mubr.bf16.mxu0 %v10273_v3 }
 0x1b4   : > { %5192 = vmatmul.mubr.msk.bf16.gmra.mrb[68].mxu1 %vm452_vm1, %v7795_v56  ;;  %5204 = vmatmul.mubr.msk.bf16.gmra.mrb[96].mxu0 %vm452_vm1, %v7770_v47 }
 0x1b5   : > { %1060 = vmatprep.mubr.bf16.mxu0 %v10273_v3  ;;  %1143 = vmatprep.mubr.bf16.mxu1 %v10273_v3 }
 0x1bc   : > { %5205 = vmatmul.mubr.msk.bf16.gmra.mrb[100].mxu0 %vm452_vm1, %v7775_v48  ;;  %5211 = vmatmul.mubr.msk.bf16.vlgmr.msra.gmra.mrb[72].mxu1 %vm452_vm1, %v7734_v37 }
 0x1bd   : > { %1070 = vmatprep.mubr.bf16.mxu0 %v10273_v3  ;;  %1153 = vmatprep.mubr.bf16.mxu1 %v10273_v3 }
 0x1c4   : > { %5206 = vmatmul.mubr.msk.bf16.gmra.mrb[104].mxu0 %vm452_vm1, %v7777_v49  ;;  %5212 = vmatmul.mubr.msk.bf16.gmra.mrb[76].mxu1 %vm452_vm1, %v7740_v38 }
 0x1c5   : > { %1080 = vmatprep.mubr.bf16.mxu0 %v10273_v3  ;;  %1163 = vmatprep.mubr.bf16.mxu1 %v10273_v3 }
 0x1c7   : > { %v566_v63 = vpop.f32.mrb[0].mxu0 }
 0x1c8   : > { %v7927_v0 = vadd.f32 %v566_v63, %v7913_v61  ;;  %v568_v1 = vpop.f32.mrb[1].mxu0 }
 0x1c9   : > { %v7930_v2 = vadd.f32 %v568_v1, %v7922_v62  ;;  %v570_v5 = vpop.f32.mrb[2].mxu0 }
 0x1ca   : > { %v5244_v6 = vmul.f32 -1.442695, %v7927_v0  ;;  %v7934_v7 = vadd.f32 %v570_v5, %v7913_v61  ;;  %v572_v8 = vpop.f32.mrb[3].mxu0 }
 0x1cb   : > { %v5245_v9 = vmul.f32 -1.442695, %v7930_v2  ;;  %v7938_v10 = vadd.f32 %v572_v8, %v7922_v62 }
 0x1cc   : > { %5940 = vpow2.f32 %v5244_v6  ;;  %v5254_v11 = vmul.f32 -1.442695, %v7934_v7  ;;  %5207 = vmatmul.mubr.msk.bf16.gmra.mrb[108].mxu0 %vm452_vm1, %v7782_v51  ;;  %5213 = vmatmul.mubr.msk.bf16.gmra.mrb[80].mxu1 %vm452_vm1, %v7742_v39 }
 0x1cd   : > { %5942 = vpow2.f32 %v5245_v9  ;;  %v5255_v12 = vmul.f32 -1.442695, %v7938_v10  ;;  %1090 = vmatprep.mubr.bf16.mxu0 %v10273_v3  ;;  %1173 = vmatprep.mubr.bf16.mxu1 %v10273_v3 }
 0x1ce   : > { %5944 = vpow2.f32 %v5254_v11 }
 0x1cf   : > { %5946 = vpow2.f32 %v5255_v12  ;;  %v576_v13 = vpop.f32.mrb[4].mxu0 }
 0x1d0   : > { %v7949_v14 = vadd.f32 %v576_v13, %v7913_v61  ;;  %v578_v15 = vpop.f32.mrb[5].mxu0 }
 0x1d1   : > { %v7952_v16 = vadd.f32 %v578_v15, %v7922_v62  ;;  %v580_v17 = vpop.f32.mrb[6].mxu0 }
 0x1d2   : > { %v5264_v24 = vmul.f32 -1.442695, %v7949_v14  ;;  %v7956_v25 = vadd.f32 %v580_v17, %v7913_v61  ;;  %v582_v26 = vpop.f32.mrb[7].mxu0 }
 0x1d3   : > { %v5265_v27 = vmul.f32 -1.442695, %v7952_v16  ;;  %v7960_v28 = vadd.f32 %v582_v26, %v7922_v62 }
 0x1d4   : > { %5948 = vpow2.f32 %v5264_v24  ;;  %v5274_v29 = vmul.f32 -1.442695, %v7956_v25  ;;  %5208 = vmatmul.mubr.msk.bf16.gmra.mrb[112].mxu0 %vm452_vm1, %v7785_v53  ;;  %5214 = vmatmul.mubr.msk.bf16.gmra.mrb[84].mxu1 %vm452_vm1, %v7747_v40 }
 0x1d5   : > { %5950 = vpow2.f32 %v5265_v27  ;;  %v5275_v30 = vmul.f32 -1.442695, %v7960_v28  ;;  %1100 = vmatprep.mubr.bf16.mxu0 %v10273_v3  ;;  %1183 = vmatprep.mubr.bf16.mxu1 %v10273_v3 }
 0x1d6   : > { %v5941_v31 = vpop.eup %5940  ;;  %5952 = vpow2.f32 %v5274_v29 }
 0x1d7   : > { %v5943_v32 = vpop.eup %5942  ;;  %v2457_v33 = vadd.f32 1.0, %v5941_v31  ;;  %5954 = vpow2.f32 %v5275_v30  ;;  %v586_v34 = vpop.f32.mrb[8].mxu0 }
 0x1d8   : > { %v5945_v35 = vpop.eup %5944  ;;  %v2458_v36 = vadd.f32 1.0, %v5943_v32  ;;  %v7971_v50 = vadd.f32 %v586_v34, %v7913_v61  ;;  %v588_v52 = vpop.f32.mrb[9].mxu0 }
 0x1d9   : > { %v5947_v54 = vpop.eup %5946  ;;  %5956 = vrcp.f32 %v2457_v33  ;;  %v2467_v55 = vadd.f32 1.0, %v5945_v35  ;;  %v7974_v57 = vadd.f32 %v588_v52, %v7922_v62  ;;  %v590_v58 = vpop.f32.mrb[10].mxu0 }
 0x1da   : > { %5958 = vrcp.f32 %v2458_v36  ;;  %v2468_v63 = vadd.f32 1.0, %v5947_v54  ;;  %v5284_v1 = vmul.f32 -1.442695, %v7971_v50  ;;  %v7978_v5 = vadd.f32 %v590_v58, %v7913_v61  ;;  %v592_v6 = vpop.f32.mrb[11].mxu0 }
 0x1db   : > { %5960 = vrcp.f32 %v2467_v55  ;;  %v5285_v8 = vmul.f32 -1.442695, %v7974_v57  ;;  %v7982_v9 = vadd.f32 %v592_v6, %v7922_v62 }
 0x1dc   : > { %5962 = vrcp.f32 %v2468_v63  ;;  %v5294_v11 = vmul.f32 -1.442695, %v7978_v5  ;;  %5209 = vmatmul.mubr.msk.bf16.gmra.mrb[116].mxu0 %vm452_vm1, %v7795_v56  ;;  %5215 = vmatmul.mubr.msk.bf16.gmra.mrb[88].mxu1 %vm452_vm1, %v7749_v41 }
 0x1dd   : > { %5964 = vpow2.f32 %v5284_v1  ;;  %v5295_v12 = vmul.f32 -1.442695, %v7982_v9  ;;  %1193 = vmatprep.mubr.bf16.mxu1 %v10273_v3  ;;  %1336 = vmatprep.mubr.bf16.mxu0 %v10273_v3 }
 0x1de   : > { %v5949_v13 = vpop.eup %5948  ;;  %5966 = vpow2.f32 %v5285_v8 }
 0x1df   : > { %v5951_v15 = vpop.eup %5950  ;;  %v2477_v17 = vadd.f32 1.0, %v5949_v13  ;;  %5968 = vpow2.f32 %v5294_v11  ;;  %v596_v24 = vpop.f32.mrb[12].mxu0 }
 0x1e0   : > { %v5953_v26 = vpop.eup %5952  ;;  %v2478_v27 = vadd.f32 1.0, %v5951_v15  ;;  %5970 = vpow2.f32 %v5295_v12  ;;  %v7993_v29 = vadd.f32 %v596_v24, %v7913_v61  ;;  %v598_v30 = vpop.f32.mrb[13].mxu0 }
 0x1e1   : > { %v5955_v31 = vpop.eup %5954  ;;  %5972 = vrcp.f32 %v2477_v17  ;;  %v2487_v32 = vadd.f32 1.0, %v5953_v26  ;;  %v7996_v33 = vadd.f32 %v598_v30, %v7922_v62  ;;  %v600_v34 = vpop.f32.mrb[14].mxu0 }
 0x1e2   : > { %5974 = vrcp.f32 %v2478_v27  ;;  %v2488_v35 = vadd.f32 1.0, %v5955_v31  ;;  %v5304_v36 = vmul.f32 -1.442695, %v7993_v29  ;;  %v8000_v52 = vadd.f32 %v600_v34, %v7913_v61  ;;  %v602_v54 = vpop.f32.mrb[15].mxu0 }
 0x1e3   : > { %v5957_v55 = vpop.eup %5956  ;;  %5976 = vrcp.f32 %v2487_v32  ;;  %v5305_v58 = vmul.f32 -1.442695, %v7996_v33  ;;  %v8004_v63 = vadd.f32 %v602_v54, %v7922_v62 }
 0x1e4   : > { %v5959_v1 = vpop.eup %5958  ;;  %5978 = vrcp.f32 %v2488_v35  ;;  %v5314_v6 = vmul.f32 -1.442695, %v8000_v52  ;;  %5216 = vmatmul.mubr.msk.bf16.gmra.mrb[92].mxu1 %vm452_vm1, %v7754_v42  ;;  %5228 = vmatmul.mubr.msk.bf16.vlgmr.msra.gmra.mrb[120].mxu0 %vm452_vm1, %v7734_v37  ;;  %v3417_v13 = vmul.f32 %v5957_v55, %v7927_v0 }
 0x1e5   : > { %v5961_v8 = vpop.eup %5960  ;;  %5980 = vpow2.f32 %v5304_v36  ;;  %v5315_v11 = vmul.f32 -1.442695, %v8004_v63  ;;  %1203 = vmatprep.mubr.bf16.mxu1 %v10273_v3  ;;  %1346 = vmatprep.mubr.bf16.mxu0 %v10273_v3  ;;  %v3418_v24 = vmul.f32 %v5959_v1, %v7930_v2 }
 0x1e6   : > { %v5963_v12 = vpop.eup %5962  ;;  %v3427_v15 = vmul.f32 %v5961_v8, %v7934_v7  ;;  %5982 = vpow2.f32 %v5305_v58 }
 0x1e7   : > { %v5965_v17 = vpop.eup %5964  ;;  %v3428_v26 = vmul.f32 %v5963_v12, %v7938_v10  ;;  %5984 = vpow2.f32 %v5314_v6  ;;  %v606_v37 = vpop.f32.mrb[16].mxu0 }
 0x1e8   : > { %v5967_v27 = vpop.eup %5966  ;;  %v3747_v30 = vadd.f32 %v3427_v15, %v3417_v13  ;;  %v2497_v31 = vadd.f32 1.0, %v5965_v17  ;;  %5986 = vpow2.f32 %v5315_v11  ;;  %v8019_v32 = vadd.f32 %v606_v37, %v7913_v61  ;;  %v608_v34 = vpop.f32.mrb[17].mxu0 }
 0x1e9   : > { %v5969_v35 = vpop.eup %5968  ;;  %v3778_v0 = vadd.f32 %v3428_v26, %v3418_v24  ;;  %v2498_v36 = vadd.f32 1.0, %v5967_v27  ;;  %v8022_v7 = vadd.f32 %v608_v34, %v7922_v62  ;;  %v610_v54 = vpop.f32.mrb[18].mxu0 }
 0x1ea   : > { %v5971_v2 = vpop.eup %5970  ;;  %5988 = vrcp.f32 %v2497_v31  ;;  %v2507_v10 = vadd.f32 1.0, %v5969_v35  ;;  %v5324_v55 = vmul.f32 -1.442695, %v8019_v32  ;;  %v8026_v58 = vadd.f32 %v610_v54, %v7913_v61  ;;  %v612_v1 = vpop.f32.mrb[19].mxu0 }
 0x1eb   : > { %v5973_v6 = vpop.eup %5972  ;;  %5990 = vrcp.f32 %v2498_v36  ;;  %v2508_v8 = vadd.f32 1.0, %v5971_v2  ;;  %v5325_v11 = vmul.f32 -1.442695, %v8022_v7  ;;  %v8030_v12 = vadd.f32 %v612_v1, %v7922_v62 }
 0x1ec   : > { %v5975_v13 = vpop.eup %5974  ;;  %v3437_v15 = vmul.f32 %v5973_v6, %v7949_v14  ;;  %5992 = vrcp.f32 %v2507_v10  ;;  %v5334_v17 = vmul.f32 -1.442695, %v8026_v58  ;;  %5217 = vmatmul.mubr.msk.bf16.gmra.mrb[96].mxu1 %vm452_vm1, %v7756_v43  ;;  %5229 = vmatmul.mubr.msk.bf16.gmra.mrb[124].mxu0 %vm452_vm1, %v7740_v38 }
 0x1ed   : > { %v5977_v24 = vpop.eup %5976  ;;  %v3438_v26 = vmul.f32 %v5975_v13, %v7952_v16  ;;  %5994 = vrcp.f32 %v2508_v8  ;;  %v5335_v37 = vmul.f32 -1.442695, %v8030_v12  ;;  %1213 = vmatprep.mubr.bf16.mxu1 %v10273_v3  ;;  %1356 = vmatprep.mubr.bf16.mxu0 %v10273_v3 }
 0x1ee   : > { %v5979_v14 = vpop.eup %5978  ;;  %v3748_v27 = vadd.f32 %v3747_v30, %v3437_v15  ;;  %v3447_v31 = vmul.f32 %v5977_v24, %v7956_v25  ;;  %5996 = vpow2.f32 %v5324_v55 }
 0x1ef   : > { %v5981_v34 = vpop.eup %5980  ;;  %v3779_v35 = vadd.f32 %v3778_v0, %v3438_v26  ;;  %v3448_v36 = vmul.f32 %v5979_v14, %v7960_v28  ;;  %5998 = vpow2.f32 %v5325_v11  ;;  %v616_v38 = vpop.f32.mrb[20].mxu0 }
 0x1f0   : > { %v5983_v54 = vpop.eup %5982  ;;  %v3749_v16 = vadd.f32 %v3748_v27, %v3447_v31  ;;  %v2517_v2 = vadd.f32 1.0, %v5981_v34  ;;  %6000 = vpow2.f32 %v5334_v17  ;;  %v8045_v10 = vadd.f32 %v616_v38, %v7913_v61  ;;  %v618_v1 = vpop.f32.mrb[21].mxu0 }
 0x1f1   : > { %v5985_v6 = vpop.eup %5984  ;;  %v3780_v8 = vadd.f32 %v3779_v35, %v3448_v36  ;;  %v2518_v30 = vadd.f32 1.0, %v5983_v54  ;;  %6002 = vpow2.f32 %v5335_v37  ;;  %v8048_v25 = vadd.f32 %v618_v1, %v7922_v62  ;;  %v620_v0 = vpop.f32.mrb[22].mxu0 }
 0x1f2   : > { %v5987_v55 = vpop.eup %5986  ;;  %6004 = vrcp.f32 %v2517_v2  ;;  %v2527_v28 = vadd.f32 1.0, %v5985_v6  ;;  %v5344_v11 = vmul.f32 -1.442695, %v8045_v10  ;;  %v8052_v13 = vadd.f32 %v620_v0, %v7913_v61  ;;  %v622_v15 = vpop.f32.mrb[23].mxu0 }
 0x1f3   : > { %6006 = vrcp.f32 %v2518_v30  ;;  %v2528_v17 = vadd.f32 1.0, %v5987_v55  ;;  %v5345_v24 = vmul.f32 -1.442695, %v8048_v25  ;;  %v8056_v26 = vadd.f32 %v622_v15, %v7922_v62 }
 0x1f4   : > { %v5989_v37 = vpop.eup %5988  ;;  %6008 = vrcp.f32 %v2527_v28  ;;  %v5354_v14 = vmul.f32 -1.442695, %v8052_v13  ;;  %5218 = vmatmul.mubr.msk.bf16.gmra.mrb[100].mxu1 %vm452_vm1, %v7761_v44  ;;  %5230 = vmatmul.mubr.msk.bf16.gmra.mrb[128].mxu0 %vm452_vm1, %v7742_v39 }
 0x1f5   : > { %v5991_v27 = vpop.eup %5990  ;;  %v3457_v31 = vmul.f32 %v5989_v37, %v7971_v50  ;;  %6010 = vrcp.f32 %v2528_v17  ;;  %v5355_v34 = vmul.f32 -1.442695, %v8056_v26  ;;  %1223 = vmatprep.mubr.bf16.mxu1 %v10273_v3  ;;  %1366 = vmatprep.mubr.bf16.mxu0 %v10273_v3 }
 0x1f6   : > { %v5993_v35 = vpop.eup %5992  ;;  %v3458_v36 = vmul.f32 %v5991_v27, %v7974_v57  ;;  %6012 = vpow2.f32 %v5344_v11 }
 0x1f7   : > { %v5995_v38 = vpop.eup %5994  ;;  %v3750_v54 = vadd.f32 %v3749_v16, %v3457_v31  ;;  %v3467_v2 = vmul.f32 %v5993_v35, %v7978_v5  ;;  %6014 = vpow2.f32 %v5345_v24  ;;  %v626_v39 = vpop.f32.mrb[24].mxu0 }
 0x1f8   : > { %v5997_v1 = vpop.eup %5996  ;;  %v3781_v6 = vadd.f32 %v3780_v8, %v3458_v36  ;;  %v3468_v50 = vmul.f32 %v5995_v38, %v7982_v9  ;;  %6016 = vpow2.f32 %v5354_v14  ;;  %v8071_v30 = vadd.f32 %v626_v39, %v7913_v61  ;;  %v628_v0 = vpop.f32.mrb[25].mxu0 }
 0x1f9   : > { %v5999_v55 = vpop.eup %5998  ;;  %v3751_v28 = vadd.f32 %v3750_v54, %v3467_v2  ;;  %v2537_v15 = vadd.f32 1.0, %v5997_v1  ;;  %6018 = vpow2.f32 %v5355_v34  ;;  %v8074_v57 = vadd.f32 %v628_v0, %v7922_v62  ;;  %v630_v16 = vpop.f32.mrb[26].mxu0 }
 0x1fa   : > { %v6001_v5 = vpop.eup %6000  ;;  %v3782_v11 = vadd.f32 %v3781_v6, %v3468_v50  ;;  %v2538_v17 = vadd.f32 1.0, %v5999_v55  ;;  %v8077_v8 = vadd.f32 %v630_v16, %v7913_v61  ;;  %v632_v9 = vpop.f32.mrb[27].mxu0  ;;  %v5364_v14 = vmul.f32 -1.442695, %v8071_v30 }
 0x1fb   : > { %v6003_v24 = vpop.eup %6002  ;;  %6020 = vrcp.f32 %v2537_v15  ;;  %v2547_v37 = vadd.f32 1.0, %v6001_v5  ;;  %v8081_v27 = vadd.f32 %v632_v9, %v7922_v62  ;;  %v5365_v35 = vmul.f32 -1.442695, %v8074_v57 }
 0x1fc   : > { %v6005_v31 = vpop.eup %6004  ;;  %6022 = vrcp.f32 %v2538_v17  ;;  %v2548_v34 = vadd.f32 1.0, %v6003_v24  ;;  %5219 = vmatmul.mubr.msk.bf16.gmra.mrb[104].mxu1 %vm452_vm1, %v7763_v45  ;;  %5231 = vmatmul.mubr.msk.bf16.gmra.mrb[132].mxu0 %vm452_vm1, %v7747_v40  ;;  %v5374_v54 = vmul.f32 -1.442695, %v8077_v8 }
 0x1fd   : > { %v6007_v36 = vpop.eup %6006  ;;  %v3477_v38 = vmul.f32 %v6005_v31, %v7993_v29  ;;  %6024 = vrcp.f32 %v2547_v37  ;;  %1233 = vmatprep.mubr.bf16.mxu1 %v10273_v3  ;;  %1376 = vmatprep.mubr.bf16.mxu0 %v10273_v3  ;;  %v5375_v1 = vmul.f32 -1.442695, %v8081_v27 }
 0x1fe   : > { %v6009_v2 = vpop.eup %6008  ;;  %v3478_v39 = vmul.f32 %v6007_v36, %v7996_v33  ;;  %6026 = vrcp.f32 %v2548_v34 }
 0x1ff   : > { %v6011_v6 = vpop.eup %6010  ;;  %v3752_v50 = vadd.f32 %v3751_v28, %v3477_v38  ;;  %v3487_v40 = vmul.f32 %v6009_v2, %v8000_v52  ;;  %6028 = vpow2.f32 %v5364_v14  ;;  %v636_v0 = vpop.f32.mrb[28].mxu0 }
 0x200   : > { %v706_v29 = vpop.f32.mrb[0].mxu1  ;;  %v6013_v55 = vpop.eup %6012  ;;  %v3783_v15 = vadd.f32 %v3782_v11, %v3478_v39  ;;  %v3488_v16 = vmul.f32 %v6011_v6, %v8004_v63  ;;  %6030 = vpow2.f32 %v5365_v35  ;;  %v8097_v5 = vadd.f32 %v636_v0, %v7913_v61 }
 0x201   : > { %v638_v17 = vpop.f32.mrb[29].mxu0  ;;  %v708_v33 = vpop.f32.mrb[1].mxu1  ;;  %v3753_v24 = vadd.f32 %v3752_v50, %v3487_v40  ;;  %v2557_v37 = vadd.f32 1.0, %v6013_v55  ;;  %6032 = vpow2.f32 %v5374_v54 }
 0x202   : > { %v6015_v9 = vpop.eup %6014  ;;  %v8100_v28 = vadd.f32 %v638_v17, %v7922_v62  ;;  %v640_v52 = vpop.f32.mrb[30].mxu0  ;;  %v3784_v34 = vadd.f32 %v3783_v15, %v3488_v16  ;;  %6034 = vpow2.f32 %v5375_v1  ;;  %v5384_v63 = vmul.f32 -1.442695, %v8097_v5 }
 0x203   : > { %v710_v14 = vpop.f32.mrb[2].mxu1  ;;  %v6017_v31 = vpop.eup %6016  ;;  %v2558_v11 = vadd.f32 1.0, %v6015_v9  ;;  %6036 = vrcp.f32 %v2557_v37  ;;  %v8107_v54 = vadd.f32 %v640_v52, %v7913_v61  ;;  %v8117_v1 = vadd.f32 %v706_v29, %v7913_v61 }
 0x204   : > { %v642_v35 = vpop.f32.mrb[31].mxu0  ;;  %v8103_v36 = vpop.f32.mrb[3].mxu1  ;;  %v2567_v2 = vadd.f32 1.0, %v6017_v31  ;;  %v5385_v39 = vmul.f32 -1.442695, %v8100_v28  ;;  %5220 = vmatmul.mubr.msk.bf16.gmra.mrb[108].mxu1 %vm452_vm1, %v7768_v46  ;;  %5232 = vmatmul.mubr.msk.bf16.gmra.mrb[136].mxu0 %vm452_vm1, %v7749_v41  ;;  %v8121_v55 = vadd.f32 %v708_v33, %v7922_v62  ;;  %v8124_v15 = vadd.f32 %v710_v14, %v7913_v61 }
 0x205   : > { %v6019_v38 = vpop.eup %6018  ;;  %6038 = vrcp.f32 %v2558_v11  ;;  %v8110_v50 = vadd.f32 %v642_v35, %v7922_v62  ;;  %10507 = vst [vmem:[#allocation22_spill] sm:$0xff] %v8117_v1  ;;  %v5394_v0 = vmul.f32 -1.442695, %v8107_v54  ;;  %1243 = vmatprep.mubr.bf16.mxu1 %v10273_v3  ;;  %1386 = vmatprep.mubr.bf16.mxu0 %v10273_v3  ;;  %v5524_v33 = vmul.f32 -1.442695, %v8117_v1 }
 0x206   : > { %v2568_v6 = vadd.f32 1.0, %v6019_v38  ;;  %v6021_v40 = vpop.eup %6020  ;;  %6040 = vrcp.f32 %v2567_v2  ;;  %10508 = vst [vmem:[#allocation23_spill] sm:$0xff] %v8121_v55  ;;  %10509 = vst [vmem:[#allocation24_spill] sm:$0xff] %v8124_v15 }
 0x207   : > { %v6023_v16 = vpop.eup %6022  ;;  %v3497_v41 = vmul.f32 %v6021_v40, %v8019_v32  ;;  %v5395_v29 = vmul.f32 -1.442695, %v8110_v50  ;;  %v646_v37 = vpop.f32.mrb[32].mxu0 }
 0x208   : > { %6042 = vrcp.f32 %v2568_v6  ;;  %v6025_v17 = vpop.eup %6024  ;;  %v3498_v9 = vmul.f32 %v6023_v16, %v8022_v7  ;;  %v716_v52 = vpop.f32.mrb[4].mxu1  ;;  %v8134_v35 = vadd.f32 %v646_v37, %v7913_v61 }
 0x209   : > { %6044 = vpow2.f32 %v5384_v63  ;;  %v6027_v14 = vpop.eup %6026  ;;  %v3754_v31 = vadd.f32 %v3753_v24, %v3497_v41  ;;  %v3507_v11 = vmul.f32 %v6025_v17, %v8026_v58  ;;  %v648_v32 = vpop.f32.mrb[33].mxu0 }
 0x20a   : > { %6046 = vpow2.f32 %v5385_v39  ;;  %v718_v38 = vpop.f32.mrb[5].mxu1  ;;  %v6029_v2 = vpop.eup %6028  ;;  %v3785_v6 = vadd.f32 %v3784_v34, %v3498_v9  ;;  %v3508_v40 = vmul.f32 %v6027_v14, %v8030_v12  ;;  %v8138_v7 = vadd.f32 %v648_v32, %v7922_v62 }
 0x20b   : > { %6048 = vpow2.f32 %v5394_v0  ;;  %v650_v63 = vpop.f32.mrb[34].mxu0  ;;  %v720_v16 = vpop.f32.mrb[6].mxu1  ;;  %v3755_v24 = vadd.f32 %v3754_v31, %v3507_v11  ;;  %v2577_v41 = vadd.f32 1.0, %v6029_v2  ;;  %v5404_v58 = vmul.f32 -1.442695, %v8134_v35 }
 0x20c   : > { %v6031_v60 = vpop.eup %6030  ;;  %6050 = vpow2.f32 %v5395_v29  ;;  %v652_v39 = vpop.f32.mrb[35].mxu0  ;;  %v3786_v59 = vadd.f32 %v3785_v6, %v3508_v40  ;;  %v5405_v12 = vmul.f32 -1.442695, %v8138_v7  ;;  %v8143_v9 = vadd.f32 %v650_v63, %v7913_v61  ;;  %5221 = vmatmul.mubr.msk.bf16.gmra.mrb[112].mxu1 %vm452_vm1, %v7770_v47  ;;  %5233 = vmatmul.mubr.msk.bf16.gmra.mrb[140].mxu0 %vm452_vm1, %v7754_v42 }
 0x20d   : > { %v722_v17 = vpop.f32.mrb[7].mxu1  ;;  %v6033_v37 = vpop.eup %6032  ;;  %v2578_v3 = vadd.f32 1.0, %v6031_v60  ;;  %6052 = vpow2.f32 %v5524_v33  ;;  %v8146_v14 = vadd.f32 %v652_v39, %v7922_v62  ;;  %v8154_v33 = vadd.f32 %v8103_v36, %v7922_v62 }
 0x20e   : > { %v6035_v34 = vpop.eup %6034  ;;  %6054 = vrcp.f32 %v2577_v41  ;;  %v2587_v0 = vadd.f32 1.0, %v6033_v37  ;;  %v8157_v31 = vadd.f32 %v716_v52, %v7913_v61  ;;  %v10512_v11 = vmov 0  }
 0x20f   : > { %v6037_v29 = vpop.eup %6036  ;;  %6056 = vrcp.f32 %v2578_v3  ;;  %v2588_v60 = vadd.f32 1.0, %v6035_v34  ;;  %10510 = vst [vmem:[#allocation25_spill] sm:$0xff] %v8154_v33  ;;  %1253 = vmatprep.mubr.bf16.mxu1 %v10512_v11  ;;  %1396 = vmatprep.mubr.bf16.mxu0 %v10512_v11  ;;  %v5525_v42 = vmul.f32 -1.442695, %v8121_v55  ;;  %v5414_v36 = vmul.f32 -1.442695, %v8143_v9 }
 0x210   : > { %10511 = vst [vmem:[#allocation26_spill] sm:$0xff] %v8157_v31  ;;  %v6039_v32 = vpop.eup %6038  ;;  %v3517_v2 = vmul.f32 %v6037_v29, %v8045_v10  ;;  %6058 = vrcp.f32 %v2587_v0  ;;  %v656_v40 = vpop.f32.mrb[36].mxu0  ;;  %v8167_v37 = vadd.f32 %v718_v38, %v7922_v62 }
 0x211   : > { %v6041_v6 = vpop.eup %6040  ;;  %v3518_v3 = vmul.f32 %v6039_v32, %v8048_v25  ;;  %6060 = vrcp.f32 %v2588_v60  ;;  %v759_v63 = vpop.f32.mrb[8].mxu1  ;;  %v8171_v25 = vadd.f32 %v720_v16, %v7913_v61 }
 0x212   : > { %v6043_v52 = vpop.eup %6042  ;;  %v3756_v41 = vadd.f32 %v3755_v24, %v3517_v2  ;;  %v3527_v39 = vmul.f32 %v6041_v6, %v8052_v13  ;;  %6062 = vpow2.f32 %v5404_v58  ;;  %10513 = vst [vmem:[#allocation27_spill] sm:$0xff] %v8167_v37  ;;  %v658_v10 = vpop.f32.mrb[37].mxu0 }
 0x213   : > { %v761_v34 = vpop.f32.mrb[9].mxu1  ;;  %v6045_v0 = vpop.eup %6044  ;;  %v3787_v29 = vadd.f32 %v3786_v59, %v3518_v3  ;;  %v3528_v4 = vmul.f32 %v6043_v52, %v8056_v26  ;;  %6064 = vpow2.f32 %v5405_v12  ;;  %10514 = vst [vmem:[#allocation28_spill] sm:$0xff] %v8171_v25  ;;  %v5534_v59 = vmul.f32 -1.442695, %v8124_v15 }
 0x214   : > { %v660_v60 = vpop.f32.mrb[38].mxu0  ;;  %v763_v32 = vpop.f32.mrb[10].mxu1  ;;  %v3757_v24 = vadd.f32 %v3756_v41, %v3527_v39  ;;  %v2597_v2 = vadd.f32 1.0, %v6045_v0  ;;  %6066 = vpow2.f32 %v5525_v42  ;;  %v8179_v12 = vadd.f32 %v722_v17, %v7922_v62  ;;  %5222 = vmatmul.mubr.msk.bf16.gmra.mrb[116].mxu1 %vm452_vm1, %v7775_v48  ;;  %5234 = vmatmul.mubr.msk.bf16.gmra.mrb[144].mxu0 %vm452_vm1, %v7756_v43 }
 0x215   : > { %v6047_v23 = vpop.eup %6046  ;;  %v8173_v13 = vpop.f32.mrb[39].mxu0  ;;  %v3788_v6 = vadd.f32 %v3787_v29, %v3528_v4  ;;  %6068 = vpow2.f32 %v5414_v36  ;;  %v8182_v3 = vadd.f32 %v656_v40, %v7913_v61  ;;  %v8189_v42 = vadd.f32 %v759_v63, %v7704_v18  ;;  %1263 = vmatprep.mubr.bf16.mxu1 %v10512_v11  ;;  %1406 = vmatprep.mubr.bf16.mxu0 %v10512_v11 }
 0x216   : > { %v8175_v38 = vpop.f32.mrb[11].mxu1  ;;  %v6049_v58 = vpop.eup %6048  ;;  %v2598_v22 = vadd.f32 1.0, %v6047_v23  ;;  %6070 = vrcp.f32 %v2597_v2  ;;  %10515 = vst [vmem:[#allocation29_spill] sm:$0xff] %v8179_v12  ;;  %v8192_v36 = vadd.f32 %v658_v10, %v7922_v62  ;;  %v5415_v52 = vmul.f32 -1.442695, %v8146_v14 }
 0x217   : > { %v6051_v26 = vpop.eup %6050  ;;  %v2607_v16 = vadd.f32 1.0, %v6049_v58  ;;  %v5544_v63 = vmul.f32 -1.442695, %v8157_v31  ;;  %v666_v39 = vpop.f32.mrb[40].mxu0  ;;  %v8202_v2 = vadd.f32 %v761_v34, %v7707_v19  ;;  %v8205_v58 = vadd.f32 %v660_v60, %v7913_v61 }
 0x218   : > { %v6053_v4 = vpop.eup %6052  ;;  %6072 = vrcp.f32 %v2598_v22  ;;  %v2608_v23 = vadd.f32 1.0, %v6051_v26  ;;  %v5535_v22 = vmul.f32 -1.442695, %v8154_v33  ;;  %v769_v10 = vpop.f32.mrb[12].mxu1  ;;  %v5554_v55 = vmul.f32 -1.442695, %v8171_v25 }
 0x219   : > { %v6055_v17 = vpop.eup %6054  ;;  %6074 = vrcp.f32 %v2607_v16  ;;  %v2737_v40 = vadd.f32 1.0, %v6053_v4  ;;  %v668_v26 = vpop.f32.mrb[41].mxu0 }
 0x21a   : > { %v6057_v41 = vpop.eup %6056  ;;  %v3537_v43 = vmul.f32 %v6055_v17, %v8071_v30  ;;  %6076 = vrcp.f32 %v2608_v23  ;;  %v8207_v16 = vpop.f32.mrb[13].mxu1  ;;  %v8211_v17 = vadd.f32 %v763_v32, %v7704_v18  ;;  %v5545_v32 = vmul.f32 -1.442695, %v8167_v37 }
 0x21b   : > { %v6059_v0 = vpop.eup %6058  ;;  %v3538_v29 = vmul.f32 %v6057_v41, %v8074_v57  ;;  %6078 = vrcp.f32 %v2737_v40  ;;  %v8213_v31 = vpop.f32.mrb[42].mxu0 }
 0x21c   : > { %v6061_v30 = vpop.eup %6060  ;;  %v3758_v4 = vadd.f32 %v3757_v24, %v3537_v43  ;;  %v3547_v23 = vmul.f32 %v6059_v0, %v8077_v8  ;;  %6080 = vpow2.f32 %v5534_v59  ;;  %v8215_v57 = vpop.f32.mrb[14].mxu1  ;;  %5223 = vmatmul.mubr.msk.bf16.gmra.mrb[120].mxu1 %vm452_vm1, %v7777_v49  ;;  %5235 = vmatmul.mubr.msk.bf16.gmra.mrb[148].mxu0 %vm452_vm1, %v7761_v44  ;;  %v8239_v44 = vadd.f32 %v666_v39, %v7913_v61 }
 0x21d   : > { %v6063_v34 = vpop.eup %6062  ;;  %v3789_v40 = vadd.f32 %v3788_v6, %v3538_v29  ;;  %v3548_v60 = vmul.f32 %v6061_v30, %v8081_v27  ;;  %6082 = vpow2.f32 %v5415_v52  ;;  %v8218_v41 = vpop.f32.mrb[43].mxu0  ;;  %v8230_v52 = vadd.f32 %v8173_v13, %v7922_v62  ;;  %1273 = vmatprep.mubr.bf16.mxu1 %v10512_v11  ;;  %1416 = vmatprep.mubr.bf16.mxu0 %v10512_v11 }
 0x21e   : > { %v8220_v33 = vpop.f32.mrb[15].mxu1  ;;  %v6065_v24 = vpop.eup %6064  ;;  %v3759_v43 = vadd.f32 %v3758_v4, %v3547_v23  ;;  %v2617_v8 = vadd.f32 1.0, %v6063_v34  ;;  %6084 = vpow2.f32 %v5535_v22  ;;  %v8234_v22 = vadd.f32 %v8175_v38, %v7707_v19 }
 0x21f   : > { %v6067_v59 = vpop.eup %6066  ;;  %v3790_v0 = vadd.f32 %v3789_v40, %v3548_v60  ;;  %v2618_v15 = vadd.f32 1.0, %v6065_v24  ;;  %6086 = vpow2.f32 %v5544_v63  ;;  %v8242_v30 = vadd.f32 %v769_v10, %v7704_v18  ;;  %v8246_v23 = vpop.f32.mrb[44].mxu0 }
 0x220   : > { %v6069_v27 = vpop.eup %6068  ;;  %6088 = vrcp.f32 %v2617_v8  ;;  %v2738_v6 = vadd.f32 1.0, %v6067_v59  ;;  %v5555_v38 = vmul.f32 -1.442695, %v8179_v12  ;;  %v8248_v34 = vpop.f32.mrb[16].mxu1  ;;  %v5424_v39 = vmul.f32 -1.442695, %v8182_v3 }
 0x221   : > { %v6071_v63 = vpop.eup %6070  ;;  %6090 = vrcp.f32 %v2618_v15  ;;  %v2627_v29 = vadd.f32 1.0, %v6069_v27  ;;  %10516 = vst [vmem:[#allocation30_spill] sm:$0xff] %v8242_v30  ;;  %v5246_v60 = vmul.f32 -1.442695, %v8189_v42  ;;  %v8253_v10 = vpop.f32.mrb[45].mxu0  ;;  %v8259_v27 = vadd.f32 %v668_v26, %v7922_v62  ;;  %v5861_v26 = vld [vmem:[#allocation9] sm:$0xff]  }
 0x222   : > { %v6073_v4 = vpop.eup %6072  ;;  %v3557_v13 = vmul.f32 %v6071_v63, %v8097_v5  ;;  %6092 = vrcp.f32 %v2738_v6  ;;  %v8255_v24 = vpop.f32.mrb[17].mxu1  ;;  %v5860_v63 = vld [vmem:[#allocation9 + $0x40] sm:$0xff]  }
 0x223   : > { %v6075_v40 = vpop.eup %6074  ;;  %v3558_v15 = vmul.f32 %v6073_v4, %v8100_v28  ;;  %6094 = vrcp.f32 %v2627_v29  ;;  %v8261_v6 = vpop.f32.mrb[46].mxu0  ;;  %5648 = vmatprep.subr.bf16.mxu1 %v5860_v63  ;;  %v5256_v63 = vmul.f32 -1.442695, %v8211_v17 }
 0x224   : > { %v6077_v5 = vpop.eup %6076  ;;  %v3760_v8 = vadd.f32 %v3759_v43, %v3557_v13  ;;  %v3567_v59 = vmul.f32 %v6075_v40, %v8107_v54  ;;  %6096 = vpow2.f32 %v5545_v32  ;;  %v8263_v28 = vpop.f32.mrb[18].mxu1  ;;  %v8270_v43 = vadd.f32 %v8207_v16, %v7707_v19  ;;  %5224 = vmatmul.mubr.msk.bf16.gmra.mrb[124].mxu1 %vm452_vm1, %v7782_v51  ;;  %5236 = vmatmul.mubr.msk.bf16.gmra.mrb[152].mxu0 %vm452_vm1, %v7763_v45 }
 0x225   : > { %v8265_v29 = vpop.eup %6078  ;;  %v3791_v4 = vadd.f32 %v3790_v0, %v3558_v15  ;;  %v3568_v12 = vmul.f32 %v6077_v5, %v8110_v50  ;;  %6098 = vpow2.f32 %v5554_v55  ;;  %v8272_v54 = vpop.f32.mrb[47].mxu0  ;;  %v5425_v50 = vmul.f32 -1.442695, %v8192_v36  ;;  %1283 = vmatprep.mubr.bf16.mxu1 %v10512_v11  ;;  %1426 = vmatprep.mubr.bf16.mxu0 %v10512_v11 }
 0x226   : > { %10517 = vst [vmem:[#allocation31_spill] sm:$0xff] %v8265_v29  ;;  %v8274_v32 = vpop.f32.mrb[19].mxu1  ;;  %v6081_v13 = vpop.eup %6080  ;;  %v3761_v40 = vadd.f32 %v3760_v8, %v3567_v59  ;;  %6100 = vpow2.f32 %v5555_v38  ;;  %v8283_v0 = vadd.f32 %v8213_v31, %v7913_v61  ;;  %v8293_v45 = vadd.f32 %v8218_v41, %v7922_v62  ;;  %5649 = vmatpush3.bf16.msra.mxu1 %v5861_v26  ;;  %v5862_v31 = vld [vmem:[#allocation9 + $0x48] sm:$0xff]  }
 0x227   : > { %v6083_v25 = vpop.eup %6082  ;;  %v3792_v37 = vadd.f32 %v3791_v4, %v3568_v12  ;;  %v2747_v29 = vadd.f32 1.0, %v6081_v13  ;;  %6102 = vpow2.f32 %v5424_v39  ;;  %v8287_v12 = vadd.f32 %v8215_v57, %v7704_v18  ;;  %v8300_v5 = vpop.f32.mrb[48].mxu0  ;;  %5650 = vmatprep.subr.bf16.mxu1 %v5862_v31 }
 0x228   : > { %v6085_v55 = vpop.eup %6084  ;;  %v2628_v16 = vadd.f32 1.0, %v6083_v25  ;;  %6104 = vpow2.f32 %v5246_v60  ;;  %v8297_v25 = vadd.f32 %v8220_v33, %v7707_v19  ;;  %v5247_v60 = vmul.f32 -1.442695, %v8202_v2  ;;  %v8307_v33 = vpop.f32.mrb[49].mxu0 }
 0x229   : > { %v6087_v38 = vpop.eup %6086  ;;  %6106 = vrcp.f32 %v2747_v29  ;;  %v2748_v15 = vadd.f32 1.0, %v6085_v55  ;;  %v5434_v41 = vmul.f32 -1.442695, %v8205_v58  ;;  %v8305_v29 = vpop.f32.mrb[20].mxu1  ;;  %v8314_v13 = vadd.f32 %v8246_v23, %v7913_v61 }
 0x22a   : > { %v6089_v39 = vpop.eup %6088  ;;  %6108 = vrcp.f32 %v2628_v16  ;;  %v2757_v57 = vadd.f32 1.0, %v6087_v38  ;;  %v8320_v55 = vpop.f32.mrb[21].mxu1  ;;  %v5863_v38 = vld [vmem:[#allocation9 + $0x8] sm:$0xff]  }
 0x22b   : > { %v6091_v8 = vpop.eup %6090  ;;  %v3577_v59 = vmul.f32 %v6089_v39, %v8134_v35  ;;  %6110 = vrcp.f32 %v2748_v15  ;;  %v8318_v35 = vadd.f32 %v8248_v34, %v7704_v18  ;;  %v8322_v16 = vpop.f32.mrb[50].mxu0  ;;  %5651 = vmatpush3.bf16.msra.mxu1 %v5863_v38 }
 0x22c   : > { %v8309_v4 = vpop.eup %6092  ;;  %v3578_v26 = vmul.f32 %v6091_v8, %v8138_v7  ;;  %6112 = vrcp.f32 %v2757_v57  ;;  %v8326_v7 = vadd.f32 %v8253_v10, %v7922_v62  ;;  %v8328_v39 = vpop.f32.mrb[22].mxu1  ;;  %5225 = vmatmul.mubr.msk.bf16.gmra.mrb[128].mxu1 %vm452_vm1, %v7785_v53  ;;  %5237 = vmatmul.mubr.msk.bf16.gmra.mrb[156].mxu0 %vm452_vm1, %v7768_v46  ;;  %v8353_v46 = vadd.f32 %v8263_v28, %v7704_v18 }
 0x22d   : > { %10518 = vst [vmem:[#allocation32_spill] sm:$0xff] %v8309_v4  ;;  %v6095_v15 = vpop.eup %6094  ;;  %v3762_v31 = vadd.f32 %v3761_v40, %v3577_v59  ;;  %6114 = vpow2.f32 %v5425_v50  ;;  %v8330_v23 = vpop.f32.mrb[51].mxu0  ;;  %1293 = vmatprep.mubr.bf16.mxu1 %v10512_v11  ;;  %1436 = vmatprep.mubr.bf16.mxu0 %v10512_v11  ;;  %v8349_v59 = vadd.f32 %v8261_v6, %v7913_v61  ;;  %v5257_v28 = vmul.f32 -1.442695, %v8234_v22 }
 0x22e   : > { %10519 = vst [vmem:[#allocation33_spill] sm:$0xff] %v8326_v7  ;;  %v6097_v57 = vpop.eup %6096  ;;  %v3793_v8 = vadd.f32 %v3792_v37, %v3578_v26  ;;  %v3587_v34 = vmul.f32 %v6095_v15, %v8143_v9  ;;  %6116 = vpow2.f32 %v5247_v60  ;;  %v8333_v4 = vpop.f32.mrb[23].mxu1  ;;  %v8343_v9 = vadd.f32 %v8255_v24, %v7707_v19 }
 0x22f   : > { %v6099_v1 = vpop.eup %6098  ;;  %v2758_v51 = vadd.f32 1.0, %v6097_v57  ;;  %6118 = vpow2.f32 %v5434_v41  ;;  %v5435_v24 = vmul.f32 -1.442695, %v8230_v52  ;;  %v8360_v26 = vpop.f32.mrb[52].mxu0  ;;  %v5444_v15 = vmul.f32 -1.442695, %v8239_v44 }
 0x230   : > { %v6101_v10 = vpop.eup %6100  ;;  %v8339_v40 = vadd.f32 %v3762_v31, %v3587_v34  ;;  %v2767_v50 = vadd.f32 1.0, %v6099_v1  ;;  %6120 = vpow2.f32 %v5256_v63  ;;  %v8358_v63 = vadd.f32 %v8272_v54, %v7922_v62  ;;  %v8368_v31 = vpop.f32.mrb[53].mxu0 }
 0x231   : > { %v6103_v37 = vpop.eup %6102  ;;  %6122 = vrcp.f32 %v2758_v51  ;;  %v2768_v60 = vadd.f32 1.0, %v6101_v10  ;;  %v8362_v51 = vpop.f32.mrb[24].mxu1  ;;  %v5266_v34 = vmul.f32 -1.442695, %v8242_v30  ;;  %v8373_v54 = vadd.f32 %v8274_v32, %v7707_v19 }
 0x232   : > { %v6105_v1 = vpop.eup %6104  ;;  %6124 = vrcp.f32 %v2767_v50  ;;  %v2637_v41 = vadd.f32 1.0, %v6103_v37  ;;  %v8375_v10 = vpop.f32.mrb[25].mxu1  ;;  %v5864_v37 = vld [vmem:[#allocation9 + $0x50] sm:$0xff]   ;;  %v8388_v53 = vadd.f32 %v8305_v29, %v7704_v18 }
 0x233   : > { %v8364_v38 = vpop.eup %6106  ;;  %6126 = vrcp.f32 %v2768_v60  ;;  %v2459_v6 = vadd.f32 1.0, %v6105_v1  ;;  %10521 = vst [vmem:[#allocation35_spill] sm:$0xff] %v8373_v54  ;;  %v8377_v50 = vpop.f32.mrb[54].mxu0  ;;  %v5865_v60 = vld [vmem:[#allocation9 + $0x10] sm:$0xff]   ;;  %5652 = vmatprep.subr.bf16.mxu1 %v5864_v37 }
 0x234   : > { %10520 = vst [vmem:[#allocation34_spill] sm:$0xff] %v8364_v38  ;;  %v6109_v57 = vpop.eup %6108  ;;  %6128 = vrcp.f32 %v2637_v41  ;;  %v8384_v41 = vadd.f32 %v8300_v5, %v7913_v61  ;;  %v8390_v32 = vpop.f32.mrb[26].mxu1  ;;  %5226 = vmatmul.mubr.msk.bf16.gmra.mrb[132].mxu1 %vm452_vm1, %v7795_v56  ;;  %5238 = vmatmul.mubr.msk.bf16.gmra.mrb[160].mxu0 %vm452_vm1, %v7770_v47  ;;  %v5866_v47 = vld [vmem:[#allocation9 + $0x58] sm:$0xff]  }
 0x235   : > { %v8379_v1 = vpop.eup %6110  ;;  %v3588_v38 = vmul.f32 %v6109_v57, %v8146_v14  ;;  %6130 = vrcp.f32 %v2459_v6  ;;  %v8392_v54 = vpop.f32.mrb[55].mxu0  ;;  %1446 = vmatprep.mubr.bf16.mxu0 %v10512_v11  ;;  %5653 = vmatpush3.bf16.msra.mxu1 %v5865_v60  ;;  %v8424_v60 = vadd.f32 %v8330_v23, %v7922_v62 }
 0x236   : > { %10522 = vst [vmem:[#allocation36_spill] sm:$0xff] %v8379_v1  ;;  %v8394_v30 = vpop.eup %6112  ;;  %6132 = vpow2.f32 %v5435_v24  ;;  %v8398_v1 = vadd.f32 %v8307_v33, %v7922_v62  ;;  %v8400_v14 = vpop.f32.mrb[27].mxu1  ;;  %v5445_v24 = vmul.f32 -1.442695, %v8259_v27  ;;  %5654 = vmatprep.subr.bf16.mxu1 %v5866_v47  ;;  %v8451_v47 = vadd.f32 %v8360_v26, %v7913_v61 }
 0x237   : > { %10523 = vst [vmem:[#allocation37_spill] sm:$0xff] %v8394_v30  ;;  %v6115_v5 = vpop.eup %6114  ;;  %v8402_v6 = vadd.f32 %v3793_v8, %v3588_v38  ;;  %6134 = vpow2.f32 %v5257_v28  ;;  %v8412_v8 = vadd.f32 %v8320_v55, %v7707_v19  ;;  %v8416_v38 = vadd.f32 %v8322_v16, %v7913_v61  ;;  %10526 = vst [vmem:[#allocation40_spill] sm:$0xff] %v8424_v60  ;;  %v8428_v55 = vpop.f32.mrb[56].mxu0 }
 0x238   : > { %v6117_v29 = vpop.eup %6116  ;;  %v2638_v57 = vadd.f32 1.0, %v6115_v5  ;;  %6136 = vpow2.f32 %v5444_v15  ;;  %v8420_v5 = vadd.f32 %v8328_v39, %v7704_v18  ;;  %v5267_v30 = vmul.f32 -1.442695, %v8270_v43  ;;  %v8438_v23 = vpop.f32.mrb[57].mxu0  ;;  %10531 = vst [vmem:[#allocation45_spill] sm:$0xff] %v8451_v47 }
 0x239   : > { %v6119_v33 = vpop.eup %6118  ;;  %v2460_v37 = vadd.f32 1.0, %v6117_v29  ;;  %6138 = vpow2.f32 %v5266_v34  ;;  %10524 = vst [vmem:[#allocation38_spill] sm:$0xff] %v8416_v38  ;;  %v8426_v34 = vpop.f32.mrb[28].mxu1  ;;  %v5454_v39 = vmul.f32 -1.442695, %v8283_v0 }
 0x23a   : > { %v6121_v28 = vpop.eup %6120  ;;  %6140 = vrcp.f32 %v2638_v57  ;;  %v2647_v15 = vadd.f32 1.0, %v6119_v33  ;;  %10525 = vst [vmem:[#allocation39_spill] sm:$0xff] %v8420_v5  ;;  %v8433_v57 = vpop.f32.mrb[29].mxu1 }
 0x23b   : > { %v8430_v29 = vpop.eup %6122  ;;  %6142 = vrcp.f32 %v2460_v37  ;;  %v2469_v16 = vadd.f32 1.0, %v6121_v28  ;;  %v8440_v56 = vpop.f32.mrb[30].mxu1  ;;  %v5276_v37 = vmul.f32 -1.442695, %v8287_v12  ;;  %v8447_v28 = vadd.f32 %v8333_v4, %v7707_v19 }
 0x23c   : > { %10527 = vst [vmem:[#allocation41_spill] sm:$0xff] %v8430_v29  ;;  %v8435_v33 = vpop.eup %6124  ;;  %6144 = vrcp.f32 %v2647_v15  ;;  %v8453_v15 = vpop.f32.mrb[58].mxu0  ;;  %v5867_v29 = vld [vmem:[#allocation9 + $0x18] sm:$0xff]   ;;  %v8464_v4 = vadd.f32 %v8368_v31, %v7922_v62  ;;  %5239 = vmatmul.mubr.msk.bf16.gmra.mrb[164].mxu0 %vm452_vm1, %v7775_v48  ;;  %v8475_v31 = vadd.f32 %v8375_v10, %v7707_v19  ;;  %v8479_v48 = vadd.f32 %v8377_v50, %v7913_v61 }
 0x23d   : > { %10528 = vst [vmem:[#allocation42_spill] sm:$0xff] %v8435_v33  ;;  %v8442_v60 = vpop.eup %6126  ;;  %6146 = vrcp.f32 %v2469_v16  ;;  %10530 = vst [vmem:[#allocation44_spill] sm:$0xff] %v8447_v28  ;;  %v8455_v33 = vpop.f32.mrb[31].mxu1  ;;  %v8460_v16 = vadd.f32 %v8362_v51, %v7704_v18  ;;  %5655 = vmatpush3.bf16.msra.mxu1 %v5867_v29  ;;  %1456 = vmatprep.mubr.bf16.mxu0 %v10512_v11  ;;  %v5277_v10 = vmul.f32 -1.442695, %v8297_v25 }
 0x23e   : > { %10529 = vst [vmem:[#allocation43_spill] sm:$0xff] %v8442_v60  ;;  %v6129_v5 = vpop.eup %6128  ;;  %6148 = vpow2.f32 %v5445_v24  ;;  %v5455_v60 = vmul.f32 -1.442695, %v8293_v45  ;;  %10533 = vst [vmem:[#allocation47_spill] sm:$0xff] %v8464_v4  ;;  %v8466_v28 = vpop.f32.mrb[59].mxu0 }
 0x23f   : > { %10532 = vst [vmem:[#allocation46_spill] sm:$0xff] %v8460_v16  ;;  %v6131_v26 = vpop.eup %6130  ;;  %v3597_v47 = vmul.f32 %v6129_v5, %v8182_v3  ;;  %6150 = vpow2.f32 %v5267_v30  ;;  %10534 = vst [vmem:[#allocation48_spill] sm:$0xff] %v8475_v31  ;;  %v8483_v30 = vadd.f32 %v8390_v32, %v7704_v18  ;;  %v8485_v5 = vpop.f32.mrb[32].mxu1 }
 0x240   : > { %v6133_v24 = vpop.eup %6132  ;;  %6152 = vpow2.f32 %v5454_v39  ;;  %10535 = vst [vmem:[#allocation49_spill] sm:$0xff] %v8479_v48  ;;  %v5465_v48 = vmul.f32 -1.442695, %v8326_v7 }
 0x241   : > { %v6135_v51 = vpop.eup %6134  ;;  %v3764_v16 = vadd.f32 %v8339_v40, %v3597_v47  ;;  %v2648_v38 = vadd.f32 1.0, %v6133_v24  ;;  %6154 = vpow2.f32 %v5276_v37  ;;  %10536 = vst [vmem:[#allocation50_spill] sm:$0xff] %v8483_v30  ;;  %v8487_v40 = vpop.f32.mrb[60].mxu0  ;;  %v5464_v47 = vmul.f32 -1.442695, %v8314_v13 }
 0x242   : > { %v6137_v4 = vpop.eup %6136  ;;  %v2470_v3 = vadd.f32 1.0, %v6135_v51  ;;  %6156 = vpow2.f32 %v5455_v60  ;;  %v8492_v60 = vadd.f32 %v8392_v54, %v7922_v62  ;;  %v8494_v37 = vpop.f32.mrb[33].mxu1  ;;  %v8507_v62 = vadd.f32 %v8400_v14, %v7707_v19 }
 0x243   : > { %v6139_v29 = vpop.eup %6138  ;;  %6158 = vrcp.f32 %v2648_v38  ;;  %v2657_v39 = vadd.f32 1.0, %v6137_v4  ;;  %v8496_v61 = vpop.f32.mrb[61].mxu0  ;;  %v5286_v4 = vmul.f32 -1.442695, %v8318_v35 }
 0x244   : > { %10537 = vst [vmem:[#allocation51_spill] sm:$0xff] %v8492_v60  ;;  %v6141_v50 = vpop.eup %6140  ;;  %6160 = vrcp.f32 %v2470_v3  ;;  %v2479_v32 = vadd.f32 1.0, %v6139_v29  ;;  %v8499_v24 = vpop.f32.mrb[34].mxu1  ;;  %10538 = vst [vmem:[#allocation52_spill] sm:$0xff] %v8507_v62  ;;  %v5868_v3 = vld [vmem:[#allocation9 + $0x60] sm:$0xff]   ;;  %5240 = vmatmul.mubr.msk.bf16.gmra.mrb[168].mxu0 %vm452_vm1, %v7777_v49 }
 0x245   : > { %v8501_v51 = vpop.eup %6142  ;;  %v3598_v38 = vmul.f32 %v6141_v50, %v8192_v36  ;;  %6162 = vrcp.f32 %v2657_v39  ;;  %v8509_v54 = vpop.f32.mrb[62].mxu0  ;;  %v5869_v29 = vld [vmem:[#allocation9 + $0x20] sm:$0xff]   ;;  %v8516_v36 = vadd.f32 %v8426_v34, %v7704_v18  ;;  %v8520_v39 = vadd.f32 %v8428_v55, %v7710_v20  ;;  %5656 = vmatprep.subr.bf16.mxu1 %v5868_v3  ;;  %1466 = vmatprep.mubr.bf16.mxu0 %v10512_v11 }
 0x246   : > { %v8511_v60 = vpop.f32.mrb[35].mxu1  ;;  %v6145_v30 = vpop.eup %6144  ;;  %6164 = vrcp.f32 %v2479_v32  ;;  %v3419_v34 = vmul.f32 %v6131_v26, %v8189_v42  ;;  %5657 = vmatpush3.bf16.msra.mxu1 %v5869_v29  ;;  %v8537_v42 = vadd.f32 %v8438_v23, %v7713_v21  ;;  %v5474_v3 = vmul.f32 -1.442695, %v8349_v59 }
 0x247   : > { %10539 = vst [vmem:[#allocation53_spill] sm:$0xff] %v8516_v36  ;;  %10540 = vst [vmem:[#allocation54_spill] sm:$0xff] %v8520_v39  ;;  %v8522_v14 = vpop.f32.mrb[63].mxu0  ;;  %v6147_v50 = vpop.eup %6146  ;;  %v3795_v62 = vadd.f32 %v8402_v6, %v3598_v38  ;;  %v3607_v31 = vmul.f32 %v6145_v30, %v8205_v58  ;;  %6166 = vpow2.f32 %v5277_v10  ;;  %v8533_v58 = vadd.f32 %v8433_v57, %v7707_v19  ;;  %v5870_v10 = vld [vmem:[#allocation9 + $0x68] sm:$0xff]  }
 0x248   : > { %v6149_v32 = vpop.eup %6148  ;;  %v3429_v36 = vmul.f32 %v6147_v50, %v8211_v17  ;;  %6168 = vpow2.f32 %v5464_v47  ;;  %v8539_v17 = vpop.f32.mrb[36].mxu1  ;;  %v5287_v47 = vmul.f32 -1.442695, %v8343_v9  ;;  %v8546_v57 = vadd.f32 %v8440_v56, %v7704_v18  ;;  %5658 = vmatprep.subr.bf16.mxu1 %v5870_v10  ;;  %v5871_v56 = vld [vmem:[#allocation9 + $0x28] sm:$0xff]  }
 0x249   : > { %v6151_v55 = vpop.eup %6150  ;;  %v3765_v39 = vadd.f32 %v3764_v16, %v3607_v31  ;;  %v2658_v7 = vadd.f32 1.0, %v6149_v32  ;;  %6170 = vpow2.f32 %v5286_v4  ;;  %v8541_v26 = vpop.f32.mrb[64].mxu0  ;;  %v8555_v29 = vadd.f32 %v8453_v15, %v7710_v20 }
 0x24a   : > { %v6153_v6 = vpop.eup %6152  ;;  %v3809_v49 = vadd.f32 %v3429_v36, %v3419_v34  ;;  %v2480_v30 = vadd.f32 1.0, %v6151_v55  ;;  %6172 = vpow2.f32 %v5465_v48  ;;  %v8548_v38 = vpop.f32.mrb[37].mxu1  ;;  %v5296_v34 = vmul.f32 -1.442695, %v8353_v46  ;;  %5659 = vmatpush3.bf16.msra.mxu1 %v5871_v56  ;;  %v5872_v56 = vld [vmem:[#allocation9 + $0x70] sm:$0xff]  }
 0x24b   : > { %v6155_v16 = vpop.eup %6154  ;;  %6174 = vrcp.f32 %v2658_v7  ;;  %v2667_v31 = vadd.f32 1.0, %v6153_v6  ;;  %v8550_v48 = vpop.f32.mrb[65].mxu0  ;;  %10541 = vst [vmem:[#allocation55_spill] sm:$0xff] %v8555_v29  ;;  %v8564_v55 = vadd.f32 %v8455_v33, %v7707_v19  ;;  %v5475_v10 = vmul.f32 -1.442695, %v8358_v63  ;;  %5660 = vmatprep.subr.bf16.mxu1 %v5872_v56 }
 0x24c   : > { %v6157_v23 = vpop.eup %6156  ;;  %6176 = vrcp.f32 %v2480_v30  ;;  %v2489_v4 = vadd.f32 1.0, %v6155_v16  ;;  %v8557_v7 = vpop.f32.mrb[38].mxu1  ;;  %v3420_v33 = vmul.f32 %v8501_v51, %v8202_v2  ;;  %v8581_v29 = vadd.f32 %v8485_v5, %v7704_v18  ;;  %v10546_v51 = vld [vmem:[#allocation30_spill] sm:$0xff] }
 0x24d   : > { %v8559_v36 = vpop.f32.mrb[66].mxu0  ;;  %v6159_v50 = vpop.eup %6158  ;;  %6178 = vrcp.f32 %v2667_v31  ;;  %v2668_v32 = vadd.f32 1.0, %v6157_v23  ;;  %10542 = vst [vmem:[#allocation56_spill] sm:$0xff] %v8564_v55  ;;  %v8574_v31 = vadd.f32 %v8466_v28, %v7713_v21  ;;  %v5484_v56 = vmul.f32 -1.442695, %v8384_v41 }
 0x24e   : > { %v8566_v6 = vpop.f32.mrb[39].mxu1  ;;  %v8568_v30 = vpop.f32.mrb[67].mxu0  ;;  %v3608_v16 = vmul.f32 %v6159_v50, %v8230_v52  ;;  %6180 = vrcp.f32 %v2489_v4  ;;  %10544 = vst [vmem:[#allocation58_spill] sm:$0xff] %v8581_v29  ;;  %v10545_v52 = vld [vmem:[#allocation19_spill] sm:$0xff] }
 0x24f   : > { %v6161_v15 = vpop.eup %6160  ;;  %10543 = vst [vmem:[#allocation57_spill] sm:$0xff] %v8574_v31  ;;  %6182 = vrcp.f32 %v2668_v32  ;;  %5241 = vmatmul.mubr.msk.bf16.gmra.mrb[172].mxu0 %vm452_vm1, %v10545_v52  ;;  %v5873_v32 = vld [vmem:[#allocation9 + $0x30] sm:$0xff]   ;;  %v8590_v52 = vadd.f32 %v8487_v40, %v7710_v20 }
 0x250   : > { %v6163_v23 = vpop.eup %6162  ;;  %v3430_v55 = vmul.f32 %v6161_v15, %v8234_v22  ;;  %v3796_v50 = vadd.f32 %v3795_v62, %v3608_v16  ;;  %6184 = vpow2.f32 %v5287_v47  ;;  %1476 = vmatprep.mubr.bf16.mxu0 %v10512_v11  ;;  %v8592_v62 = vpop.f32.mrb[40].mxu1  ;;  %5661 = vmatpush3.bf16.msra.mxu1 %v5873_v32 }
 0x251   : > { %v6165_v4 = vpop.eup %6164  ;;  %v3617_v28 = vmul.f32 %v6163_v23, %v8239_v44  ;;  %6186 = vpow2.f32 %v5474_v3  ;;  %10547 = vst [vmem:[#allocation19_spill] sm:$0xff] %v8590_v52  ;;  %v8594_v44 = vpop.f32.mrb[68].mxu0  ;;  %v8598_v3 = vadd.f32 %v8494_v37, %v7707_v19  ;;  %v10549_v23 = vld [vmem:[#allocation35_spill] sm:$0xff]  ;;  %v10566_v52 = vld [vmem:[#allocation33_spill] sm:$0xff] }
 0x252   : > { %v6167_v31 = vpop.eup %6166  ;;  %v3840_v2 = vadd.f32 %v3430_v55, %v3420_v33  ;;  %v3439_v22 = vmul.f32 %v6165_v4, %v10546_v51  ;;  %6188 = vpow2.f32 %v5296_v34  ;;  %v8602_v34 = vpop.f32.mrb[69].mxu0  ;;  %v5297_v33 = vmul.f32 -1.442695, %v10549_v23 }
 0x253   : > { %v6169_v15 = vpop.eup %6168  ;;  %v3766_v5 = vadd.f32 %v3765_v39, %v3617_v28  ;;  %v2490_v29 = vadd.f32 1.0, %v6167_v31  ;;  %6190 = vpow2.f32 %v5475_v10  ;;  %10548 = vst [vmem:[#allocation30_spill] sm:$0xff] %v8598_v3  ;;  %v8600_v39 = vpop.f32.mrb[41].mxu1  ;;  %v8607_v4 = vadd.f32 %v8496_v61, %v7713_v21  ;;  %v10554_v3 = vld [vmem:[#allocation20_spill] sm:$0xff] }
 0x254   : > { %v6171_v47 = vpop.eup %6170  ;;  %v3810_v16 = vadd.f32 %v3809_v49, %v3439_v22  ;;  %v2677_v55 = vadd.f32 1.0, %v6169_v15  ;;  %v8609_v49 = vpop.f32.mrb[42].mxu1  ;;  %v8616_v51 = vadd.f32 %v8499_v24, %v7704_v18  ;;  %v5306_v15 = vmul.f32 -1.442695, %v8388_v53 }
 0x255   : > { %v6173_v40 = vpop.eup %6172  ;;  %6192 = vrcp.f32 %v2490_v29  ;;  %v2499_v31 = vadd.f32 1.0, %v6171_v47  ;;  %10550 = vst [vmem:[#allocation35_spill] sm:$0xff] %v8607_v4  ;;  %v8611_v10 = vpop.f32.mrb[70].mxu0  ;;  %v8626_v47 = vadd.f32 %v8509_v54, %v7710_v20  ;;  %v5485_v24 = vmul.f32 -1.442695, %v8398_v1 }
 0x256   : > { %v6175_v37 = vpop.eup %6174  ;;  %6194 = vrcp.f32 %v2677_v55  ;;  %v2678_v28 = vadd.f32 1.0, %v6173_v40  ;;  %10551 = vst [vmem:[#allocation59_spill] sm:$0xff] %v8616_v51  ;;  %v8618_v29 = vpop.f32.mrb[43].mxu1  ;;  %v5874_v55 = vld [vmem:[#allocation9 + $0x78] sm:$0xff]   ;;  %v8632_v51 = vadd.f32 %v8511_v60, %v7707_v19  ;;  %v5307_v54 = vmul.f32 -1.442695, %v8412_v8 }
 0x257   : > { %v8620_v22 = vpop.f32.mrb[71].mxu0  ;;  %v6177_v32 = vpop.eup %6176  ;;  %v3618_v61 = vmul.f32 %v6175_v37, %v8259_v27  ;;  %6196 = vrcp.f32 %v2499_v31  ;;  %10552 = vst [vmem:[#allocation60_spill] sm:$0xff] %v8626_v47  ;;  %5242 = vmatmul.mubr.msk.bf16.gmra.mrb[176].mxu0 %vm452_vm1, %v10554_v3  ;;  %5662 = vmatprep.subr.bf16.mxu1 %v5874_v55 }
 0x258   : > { %v6179_v40 = vpop.eup %6178  ;;  %v3440_v4 = vmul.f32 %v6177_v32, %v8270_v43  ;;  %6198 = vrcp.f32 %v2678_v28  ;;  %10553 = vst [vmem:[#allocation61_spill] sm:$0xff] %v8632_v51  ;;  %1486 = vmatprep.mubr.bf16.mxu0 %v10512_v11  ;;  %v8647_v3 = vpop.f32.mrb[72].mxu0 }
 0x259   : > { %v6181_v27 = vpop.eup %6180  ;;  %v3797_v31 = vadd.f32 %v3796_v50, %v3618_v61  ;;  %v3627_v37 = vmul.f32 %v6179_v40, %v8283_v0  ;;  %6200 = vpow2.f32 %v5297_v33  ;;  %v8643_v50 = vadd.f32 %v8522_v14, %v7713_v21  ;;  %v8645_v0 = vpop.f32.mrb[44].mxu1 }
 0x25a   : > { %v6183_v43 = vpop.eup %6182  ;;  %v3841_v28 = vadd.f32 %v3840_v2, %v3440_v4  ;;  %v3449_v32 = vmul.f32 %v6181_v27, %v8287_v12  ;;  %6202 = vpow2.f32 %v5484_v56  ;;  %v8651_v12 = vadd.f32 %v8539_v17, %v7704_v18  ;;  %v8653_v2 = vpop.f32.mrb[45].mxu1  ;;  %v10557_v56 = vld [vmem:[#allocation38_spill] sm:$0xff]  ;;  %v10558_v27 = vld [vmem:[#allocation39_spill] sm:$0xff] }
 0x25b   : > { %v6185_v60 = vpop.eup %6184  ;;  %v3767_v51 = vadd.f32 %v3766_v5, %v3627_v37  ;;  %v3628_v47 = vmul.f32 %v6183_v43, %v8293_v45  ;;  %6204 = vpow2.f32 %v5306_v15  ;;  %10555 = vst [vmem:[#allocation20_spill] sm:$0xff] %v8643_v50  ;;  %v8655_v45 = vpop.f32.mrb[73].mxu0  ;;  %v5494_v15 = vmul.f32 -1.442695, %v10557_v56 }
 0x25c   : > { %v6187_v11 = vpop.eup %6186  ;;  %v3811_v33 = vadd.f32 %v3810_v16, %v3449_v32  ;;  %v2500_v61 = vadd.f32 1.0, %v6185_v60  ;;  %6206 = vpow2.f32 %v5485_v24  ;;  %10556 = vst [vmem:[#allocation62_spill] sm:$0xff] %v8651_v12  ;;  %v8658_v55 = vpop.f32.mrb[46].mxu1  ;;  %v5316_v17 = vmul.f32 -1.442695, %v10558_v27 }
 0x25d   : > { %v6189_v5 = vpop.eup %6188  ;;  %v3798_v4 = vadd.f32 %v3797_v31, %v3628_v47  ;;  %v2687_v14 = vadd.f32 1.0, %v6187_v11  ;;  %6208 = vpow2.f32 %v5307_v54  ;;  %v8660_v40 = vpop.f32.mrb[74].mxu0  ;;  %v8665_v37 = vadd.f32 %v8541_v26, %v7710_v20  ;;  %v5875_v31 = vld [vmem:[#allocation9 + $0x38] sm:$0xff]  }
 0x25e   : > { %v6191_v16 = vpop.eup %6190  ;;  %6210 = vrcp.f32 %v2500_v61  ;;  %v2509_v24 = vadd.f32 1.0, %v6189_v5  ;;  %v8667_v43 = vpop.f32.mrb[47].mxu1  ;;  %v8673_v60 = vadd.f32 %v8548_v38, %v7707_v19  ;;  %v8677_v11 = vadd.f32 %v8550_v48, %v7713_v21  ;;  %v10562_v5 = vld [vmem:[#allocation40_spill] sm:$0xff]  ;;  %5663 = vmatpush3.bf16.msra.mxu1 %v5875_v31 }
 0x25f   : > { %10559 = vst [vmem:[#allocation38_spill] sm:$0xff] %v8665_v37  ;;  %v8669_v47 = vpop.f32.mrb[75].mxu0  ;;  %v6193_v54 = vpop.eup %6192  ;;  %6212 = vrcp.f32 %v2687_v14  ;;  %v2688_v32 = vadd.f32 1.0, %v6191_v16  ;;  %v5495_v37 = vmul.f32 -1.442695, %v10562_v5  ;;  %v8683_v12 = vadd.f32 %v8557_v7, %v7704_v18  ;;  %v10564_v14 = vld [vmem:[#allocation21_spill] sm:$0xff] }
 0x260   : > { %10560 = vst [vmem:[#allocation39_spill] sm:$0xff] %v8673_v60  ;;  %10561 = vst [vmem:[#allocation63_spill] sm:$0xff] %v8677_v11  ;;  %v6195_v61 = vpop.eup %6194  ;;  %v3450_v26 = vmul.f32 %v6193_v54, %v8297_v25  ;;  %6214 = vrcp.f32 %v2509_v24  ;;  %5243 = vmatmul.mubr.msk.bf16.gmra.mrb[180].mxu0 %vm452_vm1, %v10564_v14  ;;  %v10565_v48 = vld [vmem:[#allocation44_spill] sm:$0xff]  ;;  %v8693_v14 = vadd.f32 %v8559_v36, %v7710_v20  ;;  %v8695_v31 = vpop.f32.mrb[48].mxu1 }
 0x261   : > { %10563 = vst [vmem:[#allocation40_spill] sm:$0xff] %v8683_v12  ;;  %v6197_v38 = vpop.eup %6196  ;;  %v3637_v16 = vmul.f32 %v6195_v61, %v8314_v13  ;;  %6216 = vrcp.f32 %v2688_v32  ;;  %v5317_v11 = vmul.f32 -1.442695, %v10565_v48  ;;  %v8697_v13 = vpop.f32.mrb[76].mxu0 }
 0x262   : > { %v6199_v60 = vpop.eup %6198  ;;  %v3842_v50 = vadd.f32 %v3841_v28, %v3450_v26  ;;  %v3459_v25 = vmul.f32 %v6197_v38, %v8318_v35  ;;  %6218 = vpow2.f32 %v5494_v15  ;;  %10567 = vst [vmem:[#allocation21_spill] sm:$0xff] %v8693_v14  ;;  %v8701_v35 = vadd.f32 %v8566_v6, %v7707_v19 }
 0x263   : > { %v6201_v24 = vpop.eup %6200  ;;  %v3768_v54 = vadd.f32 %v3767_v51, %v3637_v16  ;;  %v3638_v7 = vmul.f32 %v6199_v60, %v10566_v52  ;;  %6220 = vpow2.f32 %v5316_v17  ;;  %v8703_v51 = vpop.f32.mrb[49].mxu1  ;;  %v8714_v6 = vadd.f32 %v8568_v30, %v7713_v21  ;;  %v10574_v30 = vld [vmem:[#allocation46_spill] sm:$0xff] }
 0x264   : > { %v6203_v32 = vpop.eup %6202  ;;  %v3812_v61 = vadd.f32 %v3811_v33, %v3459_v25  ;;  %v2510_v12 = vadd.f32 1.0, %v6201_v24  ;;  %6222 = vpow2.f32 %v5495_v37  ;;  %10568 = vst [vmem:[#allocation44_spill] sm:$0xff] %v8701_v35  ;;  %v8705_v52 = vpop.f32.mrb[77].mxu0  ;;  %v10569_v37 = vld [vmem:[#allocation45_spill] sm:$0xff]  ;;  %v8722_v24 = vadd.f32 %v8592_v62, %v7704_v18 }
 0x265   : > { %v6205_v28 = vpop.eup %6204  ;;  %v3799_v15 = vadd.f32 %v3798_v4, %v3638_v7  ;;  %v2697_v36 = vadd.f32 1.0, %v6203_v32  ;;  %6224 = vpow2.f32 %v5317_v11  ;;  %v8707_v17 = vpop.f32.mrb[50].mxu1  ;;  %v5504_v38 = vmul.f32 -1.442695, %v10569_v37  ;;  %10570 = vst [vmem:[#allocation33_spill] sm:$0xff] %v8714_v6 }
 0x266   : > { %v8709_v60 = vpop.f32.mrb[78].mxu0  ;;  %v6207_v26 = vpop.eup %6206  ;;  %6226 = vrcp.f32 %v2510_v12  ;;  %v2519_v33 = vadd.f32 1.0, %v6205_v28  ;;  %10572 = vst [vmem:[#allocation64_spill] sm:$0xff] %v8722_v24  ;;  %v8726_v12 = vadd.f32 %v8594_v44, %v7710_v20  ;;  %v5326_v28 = vmul.f32 -1.442695, %v10574_v30  ;;  %v10579_v24 = vld [vmem:[#allocation47_spill] sm:$0xff] }
 0x267   : > { %v8716_v16 = vpop.f32.mrb[51].mxu1  ;;  %v8718_v25 = vpop.f32.mrb[79].mxu0  ;;  %6228 = vrcp.f32 %v2697_v36  ;;  %v2698_v11 = vadd.f32 1.0, %v6207_v26  ;;  %v8731_v6 = vadd.f32 %v8600_v39, %v7707_v19  ;;  %v10576_v36 = vld [vmem:[#allocation22_spill] sm:$0xff]  ;;  %v10577_v26 = vld [vmem:[#allocation31_spill] sm:$0xff]  ;;  %v8743_v39 = vadd.f32 %v8602_v34, %v7713_v21 }
 0x268   : > { %10571 = vst [vmem:[#allocation45_spill] sm:$0xff] %v8718_v25  ;;  %v6209_v4 = vpop.eup %6208  ;;  %10573 = vst [vmem:[#allocation65_spill] sm:$0xff] %v8726_v12  ;;  %6230 = vrcp.f32 %v2519_v33  ;;  %v8735_v14 = vmul.f32 %v10577_v26, %v10576_v36  ;;  %v5505_v44 = vmul.f32 -1.442695, %v10579_v24 }
 0x269   : > { %v6211_v7 = vpop.eup %6210  ;;  %v2520_v32 = vadd.f32 1.0, %v6209_v4  ;;  %10575 = vst [vmem:[#allocation66_spill] sm:$0xff] %v8731_v6  ;;  %6232 = vrcp.f32 %v2698_v11  ;;  %v10580_v4 = vld [vmem:[#allocation48_spill] sm:$0xff]  ;;  %10581 = vst [vmem:[#allocation31_spill] sm:$0xff] %v8743_v39  ;;  %v8750_v11 = vpop.f32.mrb[52].mxu1 }
 0x26a   : > { %v6213_v35 = vpop.eup %6212  ;;  %10578 = vst [vmem:[#allocation22_spill] sm:$0xff] %v8735_v14  ;;  %v3460_v62 = vmul.f32 %v6211_v7, %v8343_v9  ;;  %v5327_v25 = vmul.f32 -1.442695, %v10580_v4  ;;  %v8748_v9 = vadd.f32 %v8609_v49, %v7704_v18  ;;  %v8752_v7 = vpop.f32.mrb[80].mxu0 }
 0x26b   : > { %v6215_v12 = vpop.eup %6214  ;;  %v3647_v33 = vmul.f32 %v6213_v35, %v8349_v59  ;;  %6234 = vrcp.f32 %v2520_v32  ;;  %10583 = vst [vmem:[#allocation48_spill] sm:$0xff] %v8752_v7  ;;  %v10584_v35 = vld [vmem:[#allocation23_spill] sm:$0xff]  ;;  %v10585_v32 = vld [vmem:[#allocation32_spill] sm:$0xff] }
 0x26c   : > { %v6217_v6 = vpop.eup %6216  ;;  %v3843_v30 = vadd.f32 %v3842_v50, %v3460_v62  ;;  %v3469_v36 = vmul.f32 %v6215_v12, %v8353_v46  ;;  %6236 = vpow2.f32 %v5504_v38  ;;  %10582 = vst [vmem:[#allocation47_spill] sm:$0xff] %v8748_v9  ;;  %v8756_v26 = vmul.f32 %v10585_v32, %v10584_v35  ;;  %v8759_v50 = vpop.f32.mrb[53].mxu1  ;;  %v10587_v62 = vld [vmem:[#allocation49_spill] sm:$0xff] }
 0x26d   : > { %v6219_v59 = vpop.eup %6218  ;;  %v3769_v34 = vadd.f32 %v3768_v54, %v3647_v33  ;;  %v3648_v39 = vmul.f32 %v6217_v6, %v8358_v63  ;;  %6238 = vpow2.f32 %v5326_v28  ;;  %v8761_v46 = vpop.f32.mrb[81].mxu0  ;;  %v5514_v9 = vmul.f32 -1.442695, %v10587_v62 }
 0x26e   : > { %10586 = vst [vmem:[#allocation23_spill] sm:$0xff] %v8756_v26  ;;  %v6221_v38 = vpop.eup %6220  ;;  %v3813_v49 = vadd.f32 %v3812_v61, %v3469_v36  ;;  %v2707_v12 = vadd.f32 1.0, %v6219_v59  ;;  %6240 = vpow2.f32 %v5505_v44  ;;  %v8764_v14 = vpop.f32.mrb[54].mxu1  ;;  %v8770_v63 = vadd.f32 %v8611_v10, %v7710_v20  ;;  %v10593_v10 = vld [vmem:[#allocation50_spill] sm:$0xff] }
 0x26f   : > { %v8766_v7 = vpop.f32.mrb[82].mxu0  ;;  %v6223_v35 = vpop.eup %6222  ;;  %v3800_v32 = vadd.f32 %v3799_v15, %v3648_v39  ;;  %v2529_v54 = vadd.f32 1.0, %v6221_v38  ;;  %6242 = vpow2.f32 %v5327_v25  ;;  %v8778_v33 = vadd.f32 %v8618_v29, %v7707_v19 }
 0x270   : > { %10588 = vst [vmem:[#allocation32_spill] sm:$0xff] %v8770_v63  ;;  %v8772_v6 = vpop.f32.mrb[55].mxu1  ;;  %v8774_v28 = vpop.f32.mrb[83].mxu0  ;;  %6244 = vrcp.f32 %v2707_v12  ;;  %v2708_v44 = vadd.f32 1.0, %v6223_v35  ;;  %v8782_v15 = vadd.f32 %v8620_v22, %v7713_v21  ;;  %v5336_v36 = vmul.f32 -1.442695, %v10593_v10 }
 0x271   : > { %10589 = vst [vmem:[#allocation49_spill] sm:$0xff] %v8772_v6  ;;  %10590 = vst [vmem:[#allocation67_spill] sm:$0xff] %v8774_v28  ;;  %v6225_v61 = vpop.eup %6224  ;;  %6246 = vrcp.f32 %v2529_v54  ;;  %v8787_v59 = vadd.f32 %v8645_v0, %v7704_v18  ;;  %v10595_v35 = vld [vmem:[#allocation51_spill] sm:$0xff]  ;;  %v10597_v54 = vld [vmem:[#allocation53_spill] sm:$0xff] }
 0x272   : > { %10591 = vst [vmem:[#allocation68_spill] sm:$0xff] %v8778_v33  ;;  %10592 = vst [vmem:[#allocation69_spill] sm:$0xff] %v8782_v15  ;;  %v6227_v25 = vpop.eup %6226  ;;  %v2530_v39 = vadd.f32 1.0, %v6225_v61  ;;  %6248 = vrcp.f32 %v2708_v44  ;;  %v5515_v29 = vmul.f32 -1.442695, %v10595_v35  ;;  %v10596_v33 = vld [vmem:[#allocation52_spill] sm:$0xff]  ;;  %v8796_v15 = vadd.f32 %v8647_v3, %v7710_v20 }
 0x273   : > { %10594 = vst [vmem:[#allocation50_spill] sm:$0xff] %v8787_v59  ;;  %v6229_v38 = vpop.eup %6228  ;;  %v3470_v12 = vmul.f32 %v6227_v25, %v10549_v23  ;;  %v5337_v63 = vmul.f32 -1.442695, %v10596_v33  ;;  %v5346_v61 = vmul.f32 -1.442695, %v10597_v54  ;;  %v8801_v23 = vadd.f32 %v8653_v2, %v7707_v19  ;;  %v8803_v44 = vpop.f32.mrb[56].mxu1 }
 0x274   : > { %v6231_v28 = vpop.eup %6230  ;;  %v3657_v22 = vmul.f32 %v6229_v38, %v8384_v41  ;;  %6250 = vrcp.f32 %v2530_v39  ;;  %10598 = vst [vmem:[#allocation51_spill] sm:$0xff] %v8796_v15  ;;  %10600 = vst [vmem:[#allocation53_spill] sm:$0xff] %v8803_v44  ;;  %v8805_v25 = vpop.f32.mrb[84].mxu0  ;;  %v10602_v39 = vld [vmem:[#allocation24_spill] sm:$0xff]  ;;  %v10603_v38 = vld [vmem:[#allocation34_spill] sm:$0xff] }
 0x275   : > { %v6233_v0 = vpop.eup %6232  ;;  %v3844_v59 = vadd.f32 %v3843_v30, %v3470_v12  ;;  %v3479_v26 = vmul.f32 %v6231_v28, %v8388_v53  ;;  %6252 = vpow2.f32 %v5514_v9  ;;  %10599 = vst [vmem:[#allocation52_spill] sm:$0xff] %v8801_v23  ;;  %10601 = vst [vmem:[#allocation70_spill] sm:$0xff] %v8805_v25  ;;  %v8809_v6 = vmul.f32 %v10603_v38, %v10602_v39  ;;  %v8812_v30 = vpop.f32.mrb[57].mxu1  ;;  %v10604_v2 = vld [vmem:[#allocation25_spill] sm:$0xff]  ;;  %v10605_v28 = vld [vmem:[#allocation36_spill] sm:$0xff] }
 0x276   : > { %v6235_v41 = vpop.eup %6234  ;;  %v3770_v3 = vadd.f32 %v3769_v34, %v3657_v22  ;;  %v3658_v15 = vmul.f32 %v6233_v0, %v8398_v1  ;;  %6254 = vpow2.f32 %v5336_v36  ;;  %v8814_v53 = vpop.f32.mrb[85].mxu0  ;;  %v8818_v12 = vmul.f32 %v10605_v28, %v10604_v2 }
 0x277   : > { %v6237_v9 = vpop.eup %6236  ;;  %v3814_v23 = vadd.f32 %v3813_v49, %v3479_v26  ;;  %v3480_v25 = vmul.f32 %v6235_v41, %v8412_v8  ;;  %6256 = vpow2.f32 %v5515_v29  ;;  %v8821_v44 = vpop.f32.mrb[58].mxu1  ;;  %v8827_v22 = vadd.f32 %v8655_v45, %v7713_v21 }
 0x278   : > { %v8823_v39 = vpop.f32.mrb[86].mxu0  ;;  %v6239_v34 = vpop.eup %6238  ;;  %v3801_v1 = vadd.f32 %v3800_v32, %v3658_v15  ;;  %v2717_v36 = vadd.f32 1.0, %v6237_v9  ;;  %6258 = vpow2.f32 %v5337_v63  ;;  %v8835_v29 = vadd.f32 %v8658_v55, %v7704_v18  ;;  %v10608_v63 = vld [vmem:[#allocation54_spill] sm:$0xff] }
 0x279   : > { %10606 = vst [vmem:[#allocation24_spill] sm:$0xff] %v8827_v22  ;;  %v8829_v0 = vpop.f32.mrb[59].mxu1  ;;  %v8831_v38 = vpop.f32.mrb[87].mxu0  ;;  %v3845_v49 = vadd.f32 %v3844_v59, %v3480_v25  ;;  %v2539_v8 = vadd.f32 1.0, %v6239_v34  ;;  %6260 = vpow2.f32 %v5346_v61  ;;  %v5248_v15 = vmul.f32 -1.442695, %v10608_v63 }
 0x27a   : > { %v6241_v26 = vpop.eup %6240  ;;  %10607 = vst [vmem:[#allocation34_spill] sm:$0xff] %v8835_v29  ;;  %6262 = vrcp.f32 %v2717_v36  ;;  %v8840_v45 = vadd.f32 %v8660_v40, %v7710_v20  ;;  %v5347_v59 = vmul.f32 -1.442695, %v8533_v58  ;;  %v8845_v61 = vadd.f32 %v8667_v43, %v7707_v19 }
 0x27b   : > { %v6243_v41 = vpop.eup %6242  ;;  %v2718_v32 = vadd.f32 1.0, %v6241_v26  ;;  %6264 = vrcp.f32 %v2539_v8  ;;  %v5249_v28 = vmul.f32 -1.442695, %v8537_v42  ;;  %v8851_v34 = vadd.f32 %v8669_v47, %v7713_v21  ;;  %v8859_v8 = vpop.f32.mrb[60].mxu1 }
 0x27c   : > { %10609 = vst [vmem:[#allocation25_spill] sm:$0xff] %v8840_v45  ;;  %v6245_v9 = vpop.eup %6244  ;;  %v2540_v2 = vadd.f32 1.0, %v6243_v41  ;;  %10610 = vst [vmem:[#allocation36_spill] sm:$0xff] %v8845_v61  ;;  %v5356_v26 = vmul.f32 -1.442695, %v8546_v57  ;;  %v8857_v43 = vadd.f32 %v8695_v31, %v7704_v18  ;;  %v10616_v31 = vld [vmem:[#allocation27_spill] sm:$0xff] }
 0x27d   : > { %v6247_v55 = vpop.eup %6246  ;;  %v3667_v25 = vmul.f32 %v6245_v9, %v10557_v56  ;;  %6266 = vrcp.f32 %v2718_v32  ;;  %10611 = vst [vmem:[#allocation54_spill] sm:$0xff] %v8851_v34  ;;  %v8861_v56 = vpop.f32.mrb[88].mxu0  ;;  %v10614_v32 = vld [vmem:[#allocation26_spill] sm:$0xff]  ;;  %v10615_v9 = vld [vmem:[#allocation37_spill] sm:$0xff] }
 0x27e   : > { %v6249_v40 = vpop.eup %6248  ;;  %v3489_v36 = vmul.f32 %v6247_v55, %v10558_v27  ;;  %6268 = vrcp.f32 %v2540_v2  ;;  %10612 = vst [vmem:[#allocation71_spill] sm:$0xff] %v8857_v43  ;;  %10613 = vst [vmem:[#allocation72_spill] sm:$0xff] %v8861_v56  ;;  %v8865_v61 = vmul.f32 %v10615_v9, %v10614_v32  ;;  %v8868_v27 = vpop.f32.mrb[61].mxu1  ;;  %v10617_v43 = vld [vmem:[#allocation41_spill] sm:$0xff] }
 0x27f   : > { %v6251_v41 = vpop.eup %6250  ;;  %v3771_v47 = vadd.f32 %v3770_v3, %v3667_v25  ;;  %v3668_v34 = vmul.f32 %v6249_v40, %v10562_v5  ;;  %6270 = vpow2.f32 %v5248_v15  ;;  %v8870_v2 = vpop.f32.mrb[89].mxu0  ;;  %v8874_v45 = vmul.f32 %v10617_v43, %v10616_v31  ;;  %v10627_v31 = vld [vmem:[#allocation56_spill] sm:$0xff] }
 0x280   : > { %v6253_v55 = vpop.eup %6252  ;;  %v3815_v29 = vadd.f32 %v3814_v23, %v3489_v36  ;;  %v3490_v22 = vmul.f32 %v6251_v41, %v10565_v48  ;;  %6272 = vpow2.f32 %v5347_v59  ;;  %v8877_v56 = vpop.f32.mrb[62].mxu1  ;;  %v8883_v25 = vadd.f32 %v8697_v13, %v7710_v20  ;;  %v10622_v59 = vld [vmem:[#allocation28_spill] sm:$0xff]  ;;  %v10623_v36 = vld [vmem:[#allocation42_spill] sm:$0xff] }
 0x281   : > { %10618 = vst [vmem:[#allocation26_spill] sm:$0xff] %v8877_v56  ;;  %v8879_v32 = vpop.f32.mrb[90].mxu0  ;;  %v6255_v3 = vpop.eup %6254  ;;  %v3802_v5 = vadd.f32 %v3801_v1, %v3668_v34  ;;  %v2727_v15 = vadd.f32 1.0, %v6253_v55  ;;  %6274 = vpow2.f32 %v5249_v28  ;;  %v8887_v48 = vadd.f32 %v8703_v51, %v7707_v19 }
 0x282   : > { %10619 = vst [vmem:[#allocation37_spill] sm:$0xff] %v8879_v32  ;;  %10620 = vst [vmem:[#allocation27_spill] sm:$0xff] %v8883_v25  ;;  %v6257_v40 = vpop.eup %6256  ;;  %v3846_v9 = vadd.f32 %v3845_v49, %v3490_v22  ;;  %v2549_v43 = vadd.f32 1.0, %v6255_v3  ;;  %6276 = vpow2.f32 %v5356_v26  ;;  %v8891_v41 = vmul.f32 %v10623_v36, %v10622_v59  ;;  %v10625_v49 = vld [vmem:[#allocation55_spill] sm:$0xff]  ;;  %v10631_v59 = vld [vmem:[#allocation57_spill] sm:$0xff] }
 0x283   : > { %10621 = vst [vmem:[#allocation41_spill] sm:$0xff] %v8887_v48  ;;  %v6259_v23 = vpop.eup %6258  ;;  %6278 = vrcp.f32 %v2727_v15  ;;  %v2728_v1 = vadd.f32 1.0, %v6257_v40  ;;  %v8895_v28 = vadd.f32 %v8705_v52, %v7713_v21  ;;  %v5258_v34 = vmul.f32 -1.442695, %v10625_v49  ;;  %v8907_v52 = vpop.f32.mrb[63].mxu1 }
 0x284   : > { %v6261_v13 = vpop.eup %6260  ;;  %6280 = vrcp.f32 %v2549_v43  ;;  %v2550_v22 = vadd.f32 1.0, %v6259_v23  ;;  %v8900_v51 = vadd.f32 %v8707_v17, %v7704_v18  ;;  %v5357_v3 = vmul.f32 -1.442695, %v10627_v31  ;;  %10629 = vst [vmem:[#allocation56_spill] sm:$0xff] %v8907_v52  ;;  %v8909_v40 = vpop.f32.mrb[91].mxu0 }
 0x285   : > { %10624 = vst [vmem:[#allocation28_spill] sm:$0xff] %v8895_v28  ;;  %v6263_v26 = vpop.eup %6262  ;;  %6282 = vrcp.f32 %v2728_v1  ;;  %v2559_v55 = vadd.f32 1.0, %v6261_v13  ;;  %v8905_v15 = vadd.f32 %v8709_v60, %v7710_v20  ;;  %10630 = vst [vmem:[#allocation73_spill] sm:$0xff] %v8909_v40  ;;  %v5259_v17 = vmul.f32 -1.442695, %v10631_v59  ;;  %v10633_v13 = vld [vmem:[#allocation46_spill] sm:$0xff] }
 0x286   : > { %10626 = vst [vmem:[#allocation42_spill] sm:$0xff] %v8900_v51  ;;  %v6265_v43 = vpop.eup %6264  ;;  %v3677_v23 = vmul.f32 %v6263_v26, %v10569_v37  ;;  %6284 = vrcp.f32 %v2550_v22  ;;  %v8915_v36 = vadd.f32 %v8716_v16, %v7707_v19  ;;  %v10634_v60 = vld [vmem:[#allocation58_spill] sm:$0xff]  ;;  %v10635_v28 = vld [vmem:[#allocation45_spill] sm:$0xff]  ;;  %v10638_v37 = vld [vmem:[#allocation43_spill] sm:$0xff] }
 0x287   : > { %10628 = vst [vmem:[#allocation55_spill] sm:$0xff] %v8905_v15  ;;  %v6267_v1 = vpop.eup %6266  ;;  %v3499_v51 = vmul.f32 %v6265_v43, %v10633_v13  ;;  %6286 = vrcp.f32 %v2559_v55  ;;  %v5366_v15 = vmul.f32 -1.442695, %v10634_v60  ;;  %v8921_v48 = vadd.f32 %v10635_v28, %v7713_v21  ;;  %v10637_v40 = vld [vmem:[#allocation29_spill] sm:$0xff]  ;;  %v10639_v55 = vld [vmem:[#allocation19_spill] sm:$0xff] }
 0x288   : > { %10632 = vst [vmem:[#allocation57_spill] sm:$0xff] %v8915_v36  ;;  %v6269_v25 = vpop.eup %6268  ;;  %v8925_v22 = vmul.f32 %v10638_v37, %v10637_v40  ;;  %v3772_v26 = vadd.f32 %v3771_v47, %v3677_v23  ;;  %v3678_v52 = vmul.f32 %v6267_v1, %v10579_v24  ;;  %6288 = vpow2.f32 %v5258_v34  ;;  %v10641_v24 = vld [vmem:[#allocation48_spill] sm:$0xff] }
 0x289   : > { %10636 = vst [vmem:[#allocation46_spill] sm:$0xff] %v8921_v48  ;;  %v6271_v16 = vpop.eup %6270  ;;  %v3816_v36 = vadd.f32 %v3815_v29, %v3499_v51  ;;  %v3500_v43 = vmul.f32 %v6269_v25, %v10580_v4  ;;  %6290 = vpow2.f32 %v5357_v3  ;;  %v5268_v13 = vmul.f32 -1.442695, %v10639_v55  ;;  %v8938_v4 = vpop.f32.mrb[64].mxu1  ;;  %v10644_v51 = vld [vmem:[#allocation30_spill] sm:$0xff] }
 0x28a   : > { %v6273_v32 = vpop.eup %6272  ;;  %v3803_v56 = vadd.f32 %v3802_v5, %v3678_v52  ;;  %v2461_v28 = vadd.f32 1.0, %v6271_v16  ;;  %6292 = vpow2.f32 %v5259_v17  ;;  %v8932_v48 = vadd.f32 %v8750_v11, %v7704_v18  ;;  %v8940_v25 = vpop.f32.mrb[92].mxu0  ;;  %v10647_v52 = vld [vmem:[#allocation35_spill] sm:$0xff] }
 0x28b   : > { %v6275_v40 = vpop.eup %6274  ;;  %v3847_v47 = vadd.f32 %v3846_v9, %v3500_v43  ;;  %v2560_v23 = vadd.f32 1.0, %v6273_v32  ;;  %6294 = vpow2.f32 %v5366_v15  ;;  %v8936_v29 = vadd.f32 %v10641_v24, %v7710_v20  ;;  %10643 = vst [vmem:[#allocation29_spill] sm:$0xff] %v8940_v25  ;;  %v8947_v9 = vpop.f32.mrb[65].mxu1 }
 0x28c   : > { %10640 = vst [vmem:[#allocation58_spill] sm:$0xff] %v8932_v48  ;;  %v6277_v34 = vpop.eup %6276  ;;  %6296 = vrcp.f32 %v2461_v28  ;;  %v2462_v5 = vadd.f32 1.0, %v6275_v40  ;;  %v5367_v3 = vmul.f32 -1.442695, %v10644_v51  ;;  %v8945_v11 = vadd.f32 %v8759_v50, %v7707_v19  ;;  %10646 = vst [vmem:[#allocation19_spill] sm:$0xff] %v8947_v9  ;;  %v8954_v37 = vpop.f32.mrb[93].mxu0 }
 0x28d   : > { %10642 = vst [vmem:[#allocation45_spill] sm:$0xff] %v8936_v29  ;;  %v6279_v32 = vpop.eup %6278  ;;  %6298 = vrcp.f32 %v2560_v23  ;;  %v2569_v15 = vadd.f32 1.0, %v6277_v34  ;;  %v5269_v17 = vmul.f32 -1.442695, %v10647_v52  ;;  %v8952_v1 = vadd.f32 %v8761_v46, %v7713_v21  ;;  %10649 = vst [vmem:[#allocation30_spill] sm:$0xff] %v8954_v37  ;;  %v10650_v28 = vld [vmem:[#allocation59_spill] sm:$0xff] }
 0x28e   : > { %10645 = vst [vmem:[#allocation43_spill] sm:$0xff] %v8945_v11  ;;  %v6281_v16 = vpop.eup %6280  ;;  %v3687_v43 = vmul.f32 %v6279_v32, %v10587_v62  ;;  %6300 = vrcp.f32 %v2462_v5  ;;  %v5376_v50 = vmul.f32 -1.442695, %v10650_v28  ;;  %v8960_v40 = vadd.f32 %v8764_v14, %v7704_v18  ;;  %v10652_v34 = vld [vmem:[#allocation60_spill] sm:$0xff]  ;;  %v8970_v62 = vpop.f32.mrb[94].mxu0  ;;  %v10656_v14 = vld [vmem:[#allocation61_spill] sm:$0xff] }
 0x28f   : > { %10648 = vst [vmem:[#allocation48_spill] sm:$0xff] %v8952_v1  ;;  %v6283_v23 = vpop.eup %6282  ;;  %v3509_v24 = vmul.f32 %v6281_v16, %v10593_v10  ;;  %6302 = vrcp.f32 %v2569_v15  ;;  %v5278_v11 = vmul.f32 -1.442695, %v10652_v34  ;;  %v8966_v46 = vadd.f32 %v8766_v7, %v7710_v20  ;;  %v8968_v1 = vpop.f32.mrb[66].mxu1  ;;  %10655 = vst [vmem:[#allocation74_spill] sm:$0xff] %v8970_v62  ;;  %v10657_v16 = vld [vmem:[#allocation20_spill] sm:$0xff] }
 0x290   : > { %10651 = vst [vmem:[#allocation35_spill] sm:$0xff] %v8960_v40  ;;  %10654 = vst [vmem:[#allocation60_spill] sm:$0xff] %v8968_v1  ;;  %v6285_v5 = vpop.eup %6284  ;;  %v3773_v32 = vadd.f32 %v3772_v26, %v3687_v43  ;;  %v3688_v29 = vmul.f32 %v6283_v23, %v10595_v35  ;;  %6304 = vpow2.f32 %v5268_v13  ;;  %v5377_v40 = vmul.f32 -1.442695, %v10656_v14  ;;  %v8976_v7 = vpop.f32.mrb[67].mxu1  ;;  %v10659_v1 = vld [vmem:[#allocation22_spill] sm:$0xff] }
 0x291   : > { %10653 = vst [vmem:[#allocation59_spill] sm:$0xff] %v8966_v46  ;;  %v6287_v48 = vpop.eup %6286  ;;  %v3817_v10 = vadd.f32 %v3816_v36, %v3509_v24  ;;  %v3510_v15 = vmul.f32 %v6285_v5, %v10596_v33  ;;  %6306 = vpow2.f32 %v5367_v3  ;;  %v5279_v37 = vmul.f32 -1.442695, %v10657_v16  ;;  %10658 = vst [vmem:[#allocation61_spill] sm:$0xff] %v8976_v7  ;;  %v10660_v36 = vld [vmem:[#allocation49_spill] sm:$0xff]  ;;  %v10662_v24 = vld [vmem:[#allocation23_spill] sm:$0xff] }
 0x292   : > { %v6289_v46 = vpop.eup %6288  ;;  %v3774_v9 = vadd.f32 %v3773_v32, %v10659_v1  ;;  %v3804_v62 = vadd.f32 %v3803_v56, %v3688_v29  ;;  %v3519_v26 = vmul.f32 %v6287_v48, %v10597_v54  ;;  %6308 = vpow2.f32 %v5269_v17  ;;  %v10663_v54 = vld [vmem:[#allocation62_spill] sm:$0xff] }
 0x293   : > { %v6291_v35 = vpop.eup %6290  ;;  %v3848_v13 = vadd.f32 %v3847_v47, %v3510_v15  ;;  %v2471_v43 = vadd.f32 1.0, %v6289_v46  ;;  %6310 = vpow2.f32 %v5376_v50  ;;  %v8982_v23 = vadd.f32 %v10660_v36, %v7707_v19  ;;  %v10664_v47 = vld [vmem:[#allocation67_spill] sm:$0xff]  ;;  %v10667_v32 = vld [vmem:[#allocation38_spill] sm:$0xff] }
 0x294   : > { %v6293_v33 = vpop.eup %6292  ;;  %v3775_v3 = vadd.f32 %v3774_v9, %v8809_v6  ;;  %v3805_v5 = vadd.f32 %v3804_v62, %v10662_v24  ;;  %v3818_v7 = vadd.f32 %v3817_v10, %v3519_v26  ;;  %v2570_v25 = vadd.f32 1.0, %v6291_v35  ;;  %v8993_v9 = vpop.f32.mrb[95].mxu0  ;;  %v10668_v15 = vld [vmem:[#allocation39_spill] sm:$0xff]  ;;  %v10669_v35 = vld [vmem:[#allocation53_spill] sm:$0xff] }
 0x295   : > { %10661 = vst [vmem:[#allocation20_spill] sm:$0xff] %v8982_v23  ;;  %v6295_v1 = vpop.eup %6294  ;;  %6312 = vrcp.f32 %v2471_v43  ;;  %v2472_v56 = vadd.f32 1.0, %v6293_v33  ;;  %v5386_v48 = vmul.f32 -1.442695, %v10663_v54  ;;  %v8989_v29 = vadd.f32 %v10664_v47, %v7713_v21  ;;  %10666 = vst [vmem:[#allocation49_spill] sm:$0xff] %v8993_v9 }
 0x296   : > { %v6297_v17 = vpop.eup %6296  ;;  %v3776_v50 = vadd.f32 %v3775_v3, %v8865_v61  ;;  %v3806_v46 = vadd.f32 %v3805_v5, %v8818_v12  ;;  %6314 = vrcp.f32 %v2570_v25  ;;  %v2579_v6 = vadd.f32 1.0, %v6295_v1  ;;  %v10671_v3 = vld [vmem:[#allocation63_spill] sm:$0xff]  ;;  %v10672_v5 = vld [vmem:[#allocation40_spill] sm:$0xff] }
 0x297   : > { %10665 = vst [vmem:[#allocation22_spill] sm:$0xff] %v8989_v29  ;;  %v6299_v62 = vpop.eup %6298  ;;  %6316 = vrcp.f32 %v2472_v56  ;;  %v5288_v10 = vmul.f32 -1.442695, %v10667_v32  ;;  %v5387_v26 = vmul.f32 -1.442695, %v10668_v15  ;;  %v8999_v43 = vadd.f32 %v10669_v35, %v7704_v18  ;;  %v10673_v56 = vld [vmem:[#allocation70_spill] sm:$0xff] }
 0x298   : > { %v6301_v36 = vpop.eup %6300  ;;  %v3777_v33 = vadd.f32 %v3776_v50, %v8891_v41  ;;  %v3807_v61 = vadd.f32 %v3806_v46, %v8874_v45  ;;  %v3520_v12 = vmul.f32 %v6299_v62, %v8533_v58  ;;  %6318 = vrcp.f32 %v2579_v6  ;;  %v10675_v58 = vld [vmem:[#allocation21_spill] sm:$0xff] }
 0x299   : > { %10670 = vst [vmem:[#allocation23_spill] sm:$0xff] %v8999_v43  ;;  %v6303_v25 = vpop.eup %6302  ;;  %6320 = vpow2.f32 %v5278_v11  ;;  %v5289_v24 = vmul.f32 -1.442695, %v10671_v3  ;;  %v5396_v1 = vmul.f32 -1.442695, %v10672_v5  ;;  %v9008_v47 = vadd.f32 %v10673_v56, %v7710_v20  ;;  %v9013_v56 = vpop.f32.mrb[68].mxu1 }
 0x29a   : > { %v6305_v35 = vpop.eup %6304  ;;  %v4090_v43 = vrot.slane %v3777_v33, 4  ;;  %v3849_v29 = vadd.f32 %v3848_v13, %v3520_v12  ;;  %v3529_v41 = vmul.f32 %v6303_v25, %v8546_v57  ;;  %6322 = vpow2.f32 %v5377_v40  ;;  %v9021_v12 = vpop.f32.mrb[69].mxu1 }
 0x29b   : > { %10674 = vst [vmem:[#allocation62_spill] sm:$0xff] %v9008_v47  ;;  %v6307_v45 = vpop.eup %6306  ;;  %v2481_v50 = vadd.f32 1.0, %v6305_v35  ;;  %6324 = vpow2.f32 %v5279_v37  ;;  %v5298_v46 = vmul.f32 -1.442695, %v10675_v58  ;;  %v3808_v11 = vadd.f32 %v3807_v61, %v8925_v22  ;;  %v9015_v47 = vpop.f32.mrb[96].mxu0  ;;  %v10678_v61 = vld [vmem:[#allocation44_spill] sm:$0xff] }
 0x29c   : > { %v6309_v6 = vpop.eup %6308  ;;  %v4091_v62 = vadd.f32 %v4090_v43, %v3777_v33  ;;  %v3819_v23 = vadd.f32 %v3818_v7, %v3529_v41  ;;  %v2580_v9 = vadd.f32 1.0, %v6307_v45  ;;  %6326 = vpow2.f32 %v5386_v48  ;;  %v9027_v48 = vpop.f32.mrb[97].mxu0 }
 0x29d   : > { %v6311_v13 = vpop.eup %6310  ;;  %6328 = vrcp.f32 %v2481_v50  ;;  %v2482_v57 = vadd.f32 1.0, %v6309_v6  ;;  %v4096_v40 = vrot.slane %v3808_v11, 4  ;;  %v9019_v37 = vadd.f32 %v8812_v30, %v7707_v19  ;;  %v9038_v6 = vpop.f32.mrb[98].mxu0 }
 0x29e   : > { %v4092_v22 = vrot.slane %v4091_v62, 2  ;;  %6330 = vrcp.f32 %v2580_v9  ;;  %v2589_v43 = vadd.f32 1.0, %v6311_v13  ;;  %v9025_v7 = vadd.f32 %v8814_v53, %v7713_v21  ;;  %v9036_v53 = vpop.f32.mrb[70].mxu1 }
 0x29f   : > { %10676 = vst [vmem:[#allocation67_spill] sm:$0xff] %v9019_v37  ;;  %v6313_v33 = vpop.eup %6312  ;;  %6332 = vrcp.f32 %v2482_v57  ;;  %v5397_v25 = vmul.f32 -1.442695, %v10678_v61  ;;  %v4097_v35 = vadd.f32 %v4096_v40, %v3808_v11  ;;  %v9032_v30 = vadd.f32 %v8821_v44, %v7704_v18  ;;  %v10681_v37 = vld [vmem:[#allocation33_spill] sm:$0xff] }
 0x2a0   : > { %10677 = vst [vmem:[#allocation38_spill] sm:$0xff] %v9025_v7  ;;  %v6315_v41 = vpop.eup %6314  ;;  %v3421_v45 = vmul.f32 %v6297_v17, %v10608_v63  ;;  %v3431_v9 = vmul.f32 %v6313_v33, %v10625_v49  ;;  %6334 = vrcp.f32 %v2589_v43  ;;  %v4093_v50 = vadd.f32 %v4092_v22, %v4091_v62  ;;  %v9043_v49 = vpop.f32.mrb[71].mxu1 }
 0x2a1   : > { %10679 = vst [vmem:[#allocation39_spill] sm:$0xff] %v9032_v30  ;;  %v6317_v13 = vpop.eup %6316  ;;  %v3422_v57 = vmul.f32 %v6301_v36, %v8537_v42  ;;  %v3530_v11 = vmul.f32 %v6315_v41, %v10627_v31  ;;  %6336 = vpow2.f32 %v5288_v10  ;;  %v4098_v40 = vrot.slane %v4097_v35, 2  ;;  %v9045_v17 = vpop.f32.mrb[99].mxu0 }
 0x2a2   : > { %v6319_v44 = vpop.eup %6318  ;;  %v3871_v30 = vadd.f32 %v3431_v9, %v3421_v45  ;;  %v3432_v7 = vmul.f32 %v6317_v13, %v10631_v59  ;;  %6338 = vpow2.f32 %v5387_v26  ;;  %v4094_v63 = vrot.slane %v4093_v50, 1  ;;  %10680 = vst [vmem:[#allocation53_spill] sm:$0xff] %v9045_v17 }
 0x2a3   : > { %v6321_v62 = vpop.eup %6320  ;;  %v3850_v22 = vadd.f32 %v3849_v29, %v3530_v11  ;;  %v3539_v43 = vmul.f32 %v6319_v44, %v10634_v60  ;;  %6340 = vpow2.f32 %v5289_v24  ;;  %v4099_v42 = vadd.f32 %v4098_v40, %v4097_v35  ;;  %v10682_v35 = vld [vmem:[#allocation64_spill] sm:$0xff] }
 0x2a4   : > { %v6323_v36 = vpop.eup %6322  ;;  %v3902_v31 = vadd.f32 %v3432_v7, %v3422_v57  ;;  %v2491_v10 = vadd.f32 1.0, %v6321_v62  ;;  %6342 = vpow2.f32 %v5396_v1  ;;  %v4095_v33 = vadd.f32 %v4094_v63, %v4093_v50 }
 0x2a5   : > { %v6325_v41 = vpop.eup %6324  ;;  %v3820_v45 = vadd.f32 %v3819_v23, %v3539_v43  ;;  %v2590_v59 = vadd.f32 1.0, %v6323_v36  ;;  %6344 = vpow2.f32 %v5298_v46  ;;  %v4100_v26 = vrot.slane %v4099_v42, 1 }
 0x2a6   : > { %v6327_v9 = vpop.eup %6326  ;;  %6346 = vrcp.f32 %v2491_v10  ;;  %v2492_v13 = vadd.f32 1.0, %v6325_v41  ;;  %v5299_v17 = vmul.f32 -1.442695, %v10681_v37  ;;  %v9051_v60 = vadd.f32 %v8823_v39, %v7710_v20  ;;  %v10683_v39 = vld [vmem:[#allocation65_spill] sm:$0xff] }
 0x2a7   : > { %v6329_v29 = vpop.eup %6328  ;;  %6348 = vrcp.f32 %v2590_v59  ;;  %v2599_v24 = vadd.f32 1.0, %v6327_v9  ;;  %v4101_v7 = vadd.f32 %v4100_v26, %v4099_v42  ;;  %v9055_v1 = vadd.f32 %v8829_v0, %v7707_v19  ;;  %v9067_v9 = vpop.f32.mrb[100].mxu0 }
 0x2a8   : > { %v6331_v23 = vpop.eup %6330  ;;  %v3441_v46 = vmul.f32 %v6329_v29, %v10639_v55  ;;  %6350 = vrcp.f32 %v2492_v13  ;;  %v5406_v50 = vmul.f32 -1.442695, %v10682_v35  ;;  %v4150_v57 = vmul.f32 0.00390625, %v4095_v33  ;;  %v10685_v29 = vld [vmem:[#allocation72_spill] sm:$0xff] }
 0x2a9   : > { %v6333_v11 = vpop.eup %6332  ;;  %v3540_v40 = vmul.f32 %v6331_v23, %v10644_v51  ;;  %6352 = vrcp.f32 %v2599_v24  ;;  %v5308_v44 = vmul.f32 -1.442695, %v10683_v39  ;;  %v4151_v63 = vmul.f32 0.00390625, %v4101_v7  ;;  %v10688_v23 = vld [vmem:[#allocation66_spill] sm:$0xff] }
 0x2aa   : > { %v6335_v62 = vpop.eup %6334  ;;  %v3872_v43 = vadd.f32 %v3871_v30, %v3441_v46  ;;  %v3442_v42 = vmul.f32 %v6333_v11, %v10647_v52  ;;  %6354 = vpow2.f32 %v5397_v25  ;;  %v9064_v0 = vadd.f32 %v8831_v38, %v7713_v21  ;;  %v9069_v30 = vpop.f32.mrb[72].mxu1 }
 0x2ab   : > { %v6337_v55 = vpop.eup %6336  ;;  %v3851_v36 = vadd.f32 %v3850_v22, %v3540_v40  ;;  %v3549_v10 = vmul.f32 %v6335_v62, %v10650_v28  ;;  %6356 = vpow2.f32 %v5299_v17  ;;  %v4161_v33 = vpack.c.bf16 %v4151_v63, %v4151_v63  ;;  %v9075_v28 = vpop.f32.mrb[101].mxu0  ;;  %v10690_v40 = vld [vmem:[#allocation31_spill] sm:$0xff] }
 0x2ac   : > { %v6339_v51 = vpop.eup %6338  ;;  %v3903_v41 = vadd.f32 %v3902_v31, %v3442_v42  ;;  %v2501_v59 = vadd.f32 1.0, %v6337_v55  ;;  %6358 = vpow2.f32 %v5406_v50  ;;  %v4160_v26 = vpack.c.bf16 %v4150_v57, %v4150_v57  ;;  %v9077_v17 = vpop.f32.mrb[73].mxu1  ;;  %v10691_v63 = vld [vmem:[#allocation47_spill] sm:$0xff]  ;;  %v10692_v55 = vld [vmem:[#allocation32_spill] sm:$0xff] }
 0x2ad   : > { %v6341_v52 = vpop.eup %6340  ;;  %v3821_v25 = vadd.f32 %v3820_v45, %v3549_v10  ;;  %v2600_v13 = vadd.f32 1.0, %v6339_v51  ;;  %6360 = vpow2.f32 %v5308_v44  ;;  %4843 = vmatprep.mubr.bf16.mxu1 %v4161_v33  ;;  %v9073_v38 = vadd.f32 %v8859_v8, %v7704_v18  ;;  %v10693_v33 = vld [vmem:[#allocation26_spill] sm:$0xff] }
 0x2ae   : > { %v6343_v22 = vpop.eup %6342  ;;  %6362 = vrcp.f32 %v2501_v59  ;;  %v2502_v31 = vadd.f32 1.0, %v6341_v52  ;;  %4844 = vmatmul.mubr.bf16.vlgmr.msra.gmra.mrb[136].mxu1 %v4160_v26  ;;  %v9081_v24 = vadd.f32 %v10685_v29, %v7710_v20  ;;  %v9085_v45 = vadd.f32 %v8868_v27, %v7707_v19  ;;  %v9100_v59 = vpop.f32.mrb[102].mxu0 }
 0x2af   : > { %10684 = vst [vmem:[#allocation63_spill] sm:$0xff] %v9073_v38  ;;  %v6345_v7 = vpop.eup %6344  ;;  %6364 = vrcp.f32 %v2600_v13  ;;  %v2609_v8 = vadd.f32 1.0, %v6343_v22  ;;  %v5407_v46 = vmul.f32 -1.442695, %v10688_v23  ;;  %v9090_v50 = vadd.f32 %v8870_v2, %v7713_v21  ;;  %v9102_v2 = vpop.f32.mrb[74].mxu1  ;;  %v10695_v13 = vld [vmem:[#allocation37_spill] sm:$0xff] }
 0x2b0   : > { %10686 = vst [vmem:[#allocation40_spill] sm:$0xff] %v9081_v24  ;;  %10687 = vst [vmem:[#allocation70_spill] sm:$0xff] %v9085_v45  ;;  %v6347_v57 = vpop.eup %6346  ;;  %6366 = vrcp.f32 %v2502_v31  ;;  %v2511_v11 = vadd.f32 1.0, %v6345_v7  ;;  %v5309_v44 = vmul.f32 -1.442695, %v10690_v40  ;;  %v9098_v51 = vadd.f32 %v10693_v33, %v7704_v18  ;;  %v9116_v33 = vpop.f32.mrb[75].mxu1 }
 0x2b1   : > { %10689 = vst [vmem:[#allocation21_spill] sm:$0xff] %v9090_v50  ;;  %v5416_v62 = vmul.f32 -1.442695, %v10691_v63  ;;  %v6349_v42 = vpop.eup %6348  ;;  %v3451_v27 = vmul.f32 %v6347_v57, %v10652_v34  ;;  %6368 = vrcp.f32 %v2609_v8  ;;  %v5318_v10 = vmul.f32 -1.442695, %v10692_v55  ;;  %v10697_v34 = vld [vmem:[#allocation56_spill] sm:$0xff] }
 0x2b2   : > { %10694 = vst [vmem:[#allocation44_spill] sm:$0xff] %v9098_v51  ;;  %v6351_v26 = vpop.eup %6350  ;;  %v3550_v52 = vmul.f32 %v6349_v42, %v10656_v14  ;;  %6370 = vrcp.f32 %v2511_v11  ;;  %v9107_v22 = vadd.f32 %v10695_v13, %v7710_v20  ;;  %v9111_v31 = vadd.f32 %v10697_v34, %v7707_v19  ;;  %v9114_v57 = vpop.f32.mrb[103].mxu0  ;;  %v10699_v34 = vld [vmem:[#allocation68_spill] sm:$0xff] }
 0x2b3   : > { %v6353_v29 = vpop.eup %6352  ;;  %v3873_v7 = vadd.f32 %v3872_v43, %v3451_v27  ;;  %v3452_v8 = vmul.f32 %v6351_v26, %v10657_v16  ;;  %6372 = vpow2.f32 %v5407_v46  ;;  %v10700_v16 = vld [vmem:[#allocation73_spill] sm:$0xff] }
 0x2b4   : > { %10696 = vst [vmem:[#allocation33_spill] sm:$0xff] %v9107_v22  ;;  %10698 = vst [vmem:[#allocation64_spill] sm:$0xff] %v9111_v31  ;;  %v6355_v51 = vpop.eup %6354  ;;  %v3852_v14 = vadd.f32 %v3851_v36, %v3550_v52  ;;  %v3559_v11 = vmul.f32 %v6353_v29, %v10663_v54  ;;  %6374 = vpow2.f32 %v5309_v44  ;;  %v5417_v31 = vmul.f32 -1.442695, %v10699_v34  ;;  %v10706_v52 = vld [vmem:[#allocation19_spill] sm:$0xff] }
 0x2b5   : > { %v6357_v42 = vpop.eup %6356  ;;  %v3904_v13 = vadd.f32 %v3903_v41, %v3452_v8  ;;  %v2610_v22 = vadd.f32 1.0, %v6355_v51  ;;  %6376 = vpow2.f32 %v5416_v62  ;;  %v9122_v46 = vadd.f32 %v10700_v16, %v7713_v21  ;;  %v10703_v41 = vld [vmem:[#allocation29_spill] sm:$0xff] }
 0x2b6   : > { %v6359_v50 = vpop.eup %6358  ;;  %v3822_v43 = vadd.f32 %v3821_v25, %v3559_v11  ;;  %v2512_v27 = vadd.f32 1.0, %v6357_v42  ;;  %6378 = vpow2.f32 %v5318_v10  ;;  %v9126_v54 = vadd.f32 %v8938_v4, %v7704_v18  ;;  %v10705_v51 = vld [vmem:[#allocation69_spill] sm:$0xff]  ;;  %v10709_v11 = vld [vmem:[#allocation51_spill] sm:$0xff] }
 0x2b7   : > { %10701 = vst [vmem:[#allocation65_spill] sm:$0xff] %v9122_v46  ;;  %v6361_v26 = vpop.eup %6360  ;;  %6380 = vrcp.f32 %v2610_v22  ;;  %v2619_v36 = vadd.f32 1.0, %v6359_v50  ;;  %v9130_v44 = vadd.f32 %v10703_v41, %v7710_v20  ;;  %v5319_v10 = vmul.f32 -1.442695, %v10705_v51  ;;  %v10708_v22 = vld [vmem:[#allocation50_spill] sm:$0xff] }
 0x2b8   : > { %10702 = vst [vmem:[#allocation72_spill] sm:$0xff] %v9126_v54  ;;  %v6363_v62 = vpop.eup %6362  ;;  %6382 = vrcp.f32 %v2512_v27  ;;  %v2521_v25 = vadd.f32 1.0, %v6361_v26  ;;  %v9135_v29 = vadd.f32 %v10706_v52, %v7707_v19  ;;  %v5426_v4 = vmul.f32 -1.442695, %v10708_v22  ;;  %v10710_v27 = vld [vmem:[#allocation52_spill] sm:$0xff] }
 0x2b9   : > { %10704 = vst [vmem:[#allocation66_spill] sm:$0xff] %v9130_v44  ;;  %v6365_v8 = vpop.eup %6364  ;;  %v3461_v50 = vmul.f32 %v6363_v62, %v10667_v32  ;;  %6384 = vrcp.f32 %v2619_v36  ;;  %v5328_v42 = vmul.f32 -1.442695, %v10709_v11  ;;  %v5427_v26 = vmul.f32 -1.442695, %v10710_v27  ;;  %v10711_v44 = vld [vmem:[#allocation30_spill] sm:$0xff] }
 0x2ba   : > { %10707 = vst [vmem:[#allocation31_spill] sm:$0xff] %v9135_v29  ;;  %v6367_v16 = vpop.eup %6366  ;;  %v3560_v41 = vmul.f32 %v6365_v8, %v10668_v15  ;;  %6386 = vrcp.f32 %v2521_v25  ;;  %v9144_v54 = vadd.f32 %v10711_v44, %v7713_v21  ;;  %v10713_v32 = vld [vmem:[#allocation60_spill] sm:$0xff]  ;;  %v9153_v44 = vpop.f32.mrb[104].mxu0 }
 0x2bb   : > { %v6369_v52 = vpop.eup %6368  ;;  %v3874_v29 = vadd.f32 %v3873_v7, %v3461_v50  ;;  %v3462_v46 = vmul.f32 %v6367_v16, %v10671_v3  ;;  %6388 = vpow2.f32 %v5417_v31  ;;  %v9149_v36 = vadd.f32 %v10713_v32, %v7704_v18  ;;  %v9155_v7 = vpop.f32.mrb[76].mxu1  ;;  %v10715_v16 = vld [vmem:[#allocation74_spill] sm:$0xff] }
 0x2bc   : > { %10712 = vst [vmem:[#allocation47_spill] sm:$0xff] %v9144_v54  ;;  %v6371_v62 = vpop.eup %6370  ;;  %v3853_v45 = vadd.f32 %v3852_v14, %v3560_v41  ;;  %v3569_v15 = vmul.f32 %v6369_v52, %v10672_v5  ;;  %6390 = vpow2.f32 %v5319_v10  ;;  %v9159_v32 = vadd.f32 %v10715_v16, %v7710_v20  ;;  %v9161_v14 = vpop.f32.mrb[105].mxu0  ;;  %v10717_v10 = vld [vmem:[#allocation61_spill] sm:$0xff]  ;;  %v10719_v52 = vld [vmem:[#allocation24_spill] sm:$0xff] }
 0x2bd   : > { %10714 = vst [vmem:[#allocation32_spill] sm:$0xff] %v9149_v36  ;;  %v6373_v25 = vpop.eup %6372  ;;  %v3905_v8 = vadd.f32 %v3904_v13, %v3462_v46  ;;  %v3471_v24 = vmul.f32 %v6371_v62, %v10675_v58  ;;  %6392 = vpow2.f32 %v5426_v4  ;;  %v9163_v5 = vpop.f32.mrb[77].mxu1  ;;  %v9167_v4 = vadd.f32 %v10717_v10, %v7707_v19 }
 0x2be   : > { %v6375_v3 = vpop.eup %6374  ;;  %v3823_v31 = vadd.f32 %v3822_v43, %v3569_v15  ;;  %v2620_v50 = vadd.f32 1.0, %v6373_v25  ;;  %6394 = vpow2.f32 %v5328_v42  ;;  %10716 = vst [vmem:[#allocation26_spill] sm:$0xff] %v9159_v32  ;;  %v9169_v41 = vpop.f32.mrb[106].mxu0  ;;  %v5329_v62 = vmul.f32 -1.442695, %v10719_v52  ;;  %v10720_v15 = vld [vmem:[#allocation49_spill] sm:$0xff] }
 0x2bf   : > { %v6377_v13 = vpop.eup %6376  ;;  %v3875_v46 = vadd.f32 %v3874_v29, %v3471_v24  ;;  %v2522_v58 = vadd.f32 1.0, %v6375_v3  ;;  %6396 = vpow2.f32 %v5427_v26  ;;  %10718 = vst [vmem:[#allocation37_spill] sm:$0xff] %v9167_v4  ;;  %v9174_v25 = vadd.f32 %v10720_v15, %v7713_v21  ;;  %v10722_v29 = vld [vmem:[#allocation34_spill] sm:$0xff]  ;;  %v9181_v10 = vpop.f32.mrb[78].mxu1 }
 0x2c0   : > { %v6379_v43 = vpop.eup %6378  ;;  %6398 = vrcp.f32 %v2620_v50  ;;  %v2629_v42 = vadd.f32 1.0, %v6377_v13  ;;  %v5436_v26 = vmul.f32 -1.442695, %v10722_v29  ;;  %v9179_v3 = vadd.f32 %v9013_v56, %v7704_v18  ;;  %v10724_v13 = vld [vmem:[#allocation25_spill] sm:$0xff] }
 0x2c1   : > { %10721 = vst [vmem:[#allocation56_spill] sm:$0xff] %v9174_v25  ;;  %v6381_v16 = vpop.eup %6380  ;;  %6400 = vrcp.f32 %v2522_v58  ;;  %v2531_v24 = vadd.f32 1.0, %v6379_v43  ;;  %v5338_v32 = vmul.f32 -1.442695, %v10724_v13  ;;  %v9187_v15 = vadd.f32 %v9015_v47, %v7710_v20  ;;  %v10726_v25 = vld [vmem:[#allocation36_spill] sm:$0xff] }
 0x2c2   : > { %10723 = vst [vmem:[#allocation68_spill] sm:$0xff] %v9179_v3  ;;  %v6383_v4 = vpop.eup %6382  ;;  %v3570_v50 = vmul.f32 %v6381_v16, %v10678_v61  ;;  %6402 = vrcp.f32 %v2629_v42  ;;  %v5437_v36 = vmul.f32 -1.442695, %v10726_v25  ;;  %v9193_v56 = vadd.f32 %v9021_v12, %v7707_v19  ;;  %v9196_v42 = vpop.f32.mrb[107].mxu0 }
 0x2c3   : > { %10725 = vst [vmem:[#allocation73_spill] sm:$0xff] %v9187_v15  ;;  %v6385_v58 = vpop.eup %6384  ;;  %v3472_v43 = vmul.f32 %v6383_v4, %v10681_v37  ;;  %6404 = vrcp.f32 %v2531_v24  ;;  %v9198_v16 = vpop.f32.mrb[79].mxu1  ;;  %v9203_v12 = vadd.f32 %v9027_v48, %v7713_v21  ;;  %v10729_v48 = vld [vmem:[#allocation54_spill] sm:$0xff] }
 0x2c4   : > { %v6387_v3 = vpop.eup %6386  ;;  %v3854_v54 = vadd.f32 %v3853_v45, %v3570_v50  ;;  %v3579_v61 = vmul.f32 %v6385_v58, %v10682_v35  ;;  %6406 = vpow2.f32 %v5329_v62  ;;  %v9207_v50 = vadd.f32 %v9036_v53, %v7704_v18  ;;  %v10731_v53 = vld [vmem:[#allocation71_spill] sm:$0xff] }
 0x2c5   : > { %v6389_v47 = vpop.eup %6388  ;;  %v3906_v15 = vadd.f32 %v3905_v8, %v3472_v43  ;;  %v3481_v37 = vmul.f32 %v6387_v3, %v10683_v39  ;;  %6408 = vpow2.f32 %v5436_v26  ;;  %v5339_v3 = vmul.f32 -1.442695, %v10729_v48 }
 0x2c6   : > { %v6391_v4 = vpop.eup %6390  ;;  %v3824_v24 = vadd.f32 %v3823_v31, %v3579_v61  ;;  %v2630_v38 = vadd.f32 1.0, %v6389_v47  ;;  %6410 = vpow2.f32 %v5338_v32  ;;  %10727 = vst [vmem:[#allocation29_spill] sm:$0xff] %v9207_v50  ;;  %v9211_v31 = vadd.f32 %v9038_v6, %v7710_v20  ;;  %v5876_v6 = vld [vmem:[#allocation9 + $0xc0] sm:$0xff]  }
 0x2c7   : > { %v6393_v45 = vpop.eup %6392  ;;  %v3876_v35 = vadd.f32 %v3875_v46, %v3481_v37  ;;  %v2532_v62 = vadd.f32 1.0, %v6391_v4  ;;  %6412 = vpow2.f32 %v5437_v36  ;;  %v9216_v46 = vadd.f32 %v9043_v49, %v7707_v19  ;;  %v10734_v37 = vld [vmem:[#allocation27_spill] sm:$0xff]  ;;  %5670 = vmatprep.subr.bf16.mxu1 %v5876_v6  ;;  %v9241_v6 = vpop.f32.mrb[108].mxu0 }
 0x2c8   : > { %v6395_v8 = vpop.eup %6394  ;;  %6414 = vrcp.f32 %v2630_v38  ;;  %v2639_v39 = vadd.f32 1.0, %v6393_v45  ;;  %10728 = vst [vmem:[#allocation69_spill] sm:$0xff] %v9211_v31  ;;  %v5446_v58 = vmul.f32 -1.442695, %v10731_v53  ;;  %v10732_v38 = vld [vmem:[#allocation53_spill] sm:$0xff]  ;;  %v9227_v19 = vadd.f32 %v9067_v9, %v7710_v20  ;;  %v5877_v49 = vld [vmem:[#allocation9 + $0x80] sm:$0xff]  }
 0x2c9   : > { %v6397_v32 = vpop.eup %6396  ;;  %6416 = vrcp.f32 %v2532_v62  ;;  %v2541_v26 = vadd.f32 1.0, %v6395_v8  ;;  %10730 = vst [vmem:[#allocation19_spill] sm:$0xff] %v9216_v46  ;;  %v9221_v43 = vadd.f32 %v10732_v38, %v7713_v21  ;;  %v5348_v4 = vmul.f32 -1.442695, %v10734_v37  ;;  %v10736_v8 = vld [vmem:[#allocation41_spill] sm:$0xff]  ;;  %5671 = vmatpush3.bf16.msra.mxu1 %v5877_v49  ;;  %v10742_v49 = vld [vmem:[#allocation28_spill] sm:$0xff] }
 0x2ca   : > { %v6399_v36 = vpop.eup %6398  ;;  %6418 = vrcp.f32 %v2639_v39  ;;  %v2640_v18 = vadd.f32 1.0, %v6397_v32  ;;  %10735 = vst [vmem:[#allocation51_spill] sm:$0xff] %v9227_v19  ;;  %v5447_v39 = vmul.f32 -1.442695, %v10736_v8  ;;  %v10737_v32 = vld [vmem:[#allocation17_spill] sm:$0xff] }
 0x2cb   : > { %10733 = vst [vmem:[#allocation50_spill] sm:$0xff] %v9221_v43  ;;  %v6401_v61 = vpop.eup %6400  ;;  %v3580_v47 = vmul.f32 %v6399_v36, %v10688_v23  ;;  %6420 = vrcp.f32 %v2541_v26  ;;  %v9233_v38 = vadd.f32 %v9069_v30, %v10737_v32  ;;  %v9239_v30 = vadd.f32 %v9075_v28, %v7713_v21  ;;  %v5881_v31 = vld [vmem:[#allocation9 + $0x90] sm:$0xff]  }
 0x2cc   : > { %v6403_v45 = vpop.eup %6402  ;;  %v3482_v62 = vmul.f32 %v6401_v61, %v10690_v40  ;;  %6422 = vrcp.f32 %v2640_v18  ;;  %v5878_v40 = vld [vmem:[#allocation9 + $0xc8] sm:$0xff]  }
 0x2cd   : > { %10738 = vst [vmem:[#allocation52_spill] sm:$0xff] %v9233_v38  ;;  %v6405_v23 = vpop.eup %6404  ;;  %v3855_v26 = vadd.f32 %v3854_v54, %v3580_v47  ;;  %v3589_v36 = vmul.f32 %v6403_v45, %v10691_v63  ;;  %6424 = vpow2.f32 %v5339_v3  ;;  %10739 = vst [vmem:[#allocation30_spill] sm:$0xff] %v9239_v30  ;;  %v9243_v54 = vpop.f32.mrb[80].mxu1  ;;  %5672 = vmatprep.subr.bf16.mxu1 %v5878_v40  ;;  %v5349_v45 = vmul.f32 -1.442695, %v10742_v49  ;;  %v5880_v38 = vld [vmem:[#allocation9 + $0xd0] sm:$0xff]  }
 0x2ce   : > { %v6407_v9 = vpop.eup %6406  ;;  %v3907_v19 = vadd.f32 %v3906_v15, %v3482_v62  ;;  %v3491_v43 = vmul.f32 %v6405_v23, %v10692_v55  ;;  %6426 = vpow2.f32 %v5446_v58  ;;  %v10740_v15 = vld [vmem:[#allocation18_spill] sm:$0xff]  ;;  %v9249_v58 = vpop.f32.mrb[109].mxu0  ;;  %v9256_v62 = vadd.f32 %v9100_v59, %v7710_v20  ;;  %v10746_v59 = vld [vmem:[#allocation55_spill] sm:$0xff] }
 0x2cf   : > { %v6409_v18 = vpop.eup %6408  ;;  %v3825_v61 = vadd.f32 %v3824_v24, %v3589_v36  ;;  %v2542_v46 = vadd.f32 1.0, %v6407_v9  ;;  %6428 = vpow2.f32 %v5348_v4  ;;  %v9247_v55 = vadd.f32 %v9077_v17, %v10740_v15  ;;  %v9251_v24 = vpop.f32.mrb[81].mxu1  ;;  %v10744_v23 = vld [vmem:[#allocation42_spill] sm:$0xff] }
 0x2d0   : > { %v6411_v63 = vpop.eup %6410  ;;  %v3877_v3 = vadd.f32 %v3876_v35, %v3491_v43  ;;  %v2649_v47 = vadd.f32 1.0, %v6409_v18  ;;  %6430 = vpow2.f32 %v5447_v39  ;;  %10743 = vst [vmem:[#allocation74_spill] sm:$0xff] %v9256_v62  ;;  %v9258_v35 = vpop.f32.mrb[110].mxu0  ;;  %v5879_v43 = vld [vmem:[#allocation9 + $0x88] sm:$0xff]   ;;  %v5456_v36 = vmul.f32 -1.442695, %v10744_v23 }
 0x2d1   : > { %10741 = vst [vmem:[#allocation60_spill] sm:$0xff] %v9247_v55  ;;  %v6413_v4 = vpop.eup %6412  ;;  %6432 = vrcp.f32 %v2542_v46  ;;  %v2551_v28 = vadd.f32 1.0, %v6411_v63  ;;  %v9263_v9 = vadd.f32 %v9102_v2, %v10737_v32  ;;  %v9265_v46 = vpop.f32.mrb[82].mxu1  ;;  %v5358_v63 = vmul.f32 -1.442695, %v10746_v59  ;;  %5673 = vmatpush3.bf16.msra.mxu1 %v5879_v43  ;;  %v10748_v55 = vld [vmem:[#allocation57_spill] sm:$0xff] }
 0x2d2   : > { %v6415_v39 = vpop.eup %6414  ;;  %6434 = vrcp.f32 %v2649_v47  ;;  %v2650_v17 = vadd.f32 1.0, %v6413_v4  ;;  %v9271_v62 = vadd.f32 %v9114_v57, %v7713_v21  ;;  %v5457_v2 = vmul.f32 -1.442695, %v10748_v55  ;;  %v9279_v30 = vpop.f32.mrb[111].mxu0  ;;  %v10750_v43 = vld [vmem:[#allocation46_spill] sm:$0xff]  ;;  %5674 = vmatprep.subr.bf16.mxu1 %v5880_v38 }
 0x2d3   : > { %10745 = vst [vmem:[#allocation61_spill] sm:$0xff] %v9263_v9  ;;  %v6417_v40 = vpop.eup %6416  ;;  %v3590_v18 = vmul.f32 %v6415_v39, %v10699_v34  ;;  %6436 = vrcp.f32 %v2551_v28  ;;  %v9277_v9 = vadd.f32 %v9116_v33, %v10740_v15  ;;  %v9281_v34 = vpop.f32.mrb[83].mxu1 }
 0x2d4   : > { %10747 = vst [vmem:[#allocation24_spill] sm:$0xff] %v9271_v62  ;;  %v6419_v47 = vpop.eup %6418  ;;  %v3492_v4 = vmul.f32 %v6417_v40, %v10705_v51  ;;  %6438 = vrcp.f32 %v2650_v17  ;;  %v5359_v62 = vmul.f32 -1.442695, %v10750_v43 }
 0x2d5   : > { %10749 = vst [vmem:[#allocation49_spill] sm:$0xff] %v9277_v9  ;;  %v6421_v28 = vpop.eup %6420  ;;  %v3856_v39 = vadd.f32 %v3855_v26, %v3590_v18  ;;  %v3599_v57 = vmul.f32 %v6419_v47, %v10708_v22  ;;  %6440 = vpow2.f32 %v5349_v45  ;;  %v9289_v26 = vadd.f32 %v9153_v44, %v7710_v20  ;;  %5675 = vmatpush3.bf16.msra.mxu1 %v5881_v31 }
 0x2d6   : > { %v6423_v51 = vpop.eup %6422  ;;  %v3908_v17 = vadd.f32 %v3907_v19, %v3492_v4  ;;  %v3501_v40 = vmul.f32 %v6421_v28, %v10709_v11  ;;  %6442 = vpow2.f32 %v5456_v36  ;;  %v9293_v19 = vadd.f32 %v9155_v7, %v10737_v32  ;;  %v10752_v4 = vld [vmem:[#allocation45_spill] sm:$0xff]  ;;  %v9303_v7 = vpop.f32.mrb[84].mxu1 }
 0x2d7   : > { %v6425_v33 = vpop.eup %6424  ;;  %v3826_v9 = vadd.f32 %v3825_v61, %v3599_v57  ;;  %v3600_v50 = vmul.f32 %v6423_v51, %v10710_v27  ;;  %6444 = vpow2.f32 %v5358_v63  ;;  %v10751_v27 = vld [vmem:[#allocation58_spill] sm:$0xff]  ;;  %v5368_v38 = vmul.f32 -1.442695, %v10752_v4 }
 0x2d8   : > { %v6427_v22 = vpop.eup %6426  ;;  %v3878_v45 = vadd.f32 %v3877_v3, %v3501_v40  ;;  %v2552_v18 = vadd.f32 1.0, %v6425_v33  ;;  %6446 = vpow2.f32 %v5457_v2  ;;  %v5466_v63 = vmul.f32 -1.442695, %v10751_v27  ;;  %v9301_v2 = vpop.f32.mrb[112].mxu0 }
 0x2d9   : > { %v6429_v11 = vpop.eup %6428  ;;  %v3857_v36 = vadd.f32 %v3856_v39, %v3600_v50  ;;  %v2659_v61 = vadd.f32 1.0, %v6427_v22  ;;  %6448 = vpow2.f32 %v5359_v62  ;;  %v9299_v3 = vadd.f32 %v9161_v14, %v7713_v21  ;;  %v10755_v14 = vld [vmem:[#allocation43_spill] sm:$0xff]  ;;  %v9319_v33 = vpop.f32.mrb[113].mxu0 }
 0x2da   : > { %v6431_v47 = vpop.eup %6430  ;;  %6450 = vrcp.f32 %v2552_v18  ;;  %v2561_v44 = vadd.f32 1.0, %v6429_v11  ;;  %v9307_v62 = vadd.f32 %v9163_v5, %v10740_v15  ;;  %v9311_v28 = vadd.f32 %v9169_v41, %v7710_v20  ;;  %v5882_v22 = vld [vmem:[#allocation9 + $0xd8] sm:$0xff]   ;;  %v10757_v11 = vld [vmem:[#allocation48_spill] sm:$0xff] }
 0x2db   : > { %v6433_v31 = vpop.eup %6432  ;;  %6452 = vrcp.f32 %v2659_v61  ;;  %v2660_v50 = vadd.f32 1.0, %v6431_v47  ;;  %v5467_v51 = vmul.f32 -1.442695, %v10755_v14  ;;  %v9317_v40 = vadd.f32 %v9181_v10, %v10737_v32  ;;  %v9323_v61 = vpop.f32.mrb[85].mxu1  ;;  %5676 = vmatprep.subr.bf16.mxu1 %v5882_v22 }
 0x2dc   : > { %10753 = vst [vmem:[#allocation34_spill] sm:$0xff] %v9307_v62  ;;  %10754 = vst [vmem:[#allocation25_spill] sm:$0xff] %v9311_v28  ;;  %v6435_v39 = vpop.eup %6434  ;;  %v3502_v57 = vmul.f32 %v6433_v31, %v10719_v52  ;;  %6454 = vrcp.f32 %v2561_v44  ;;  %v5369_v41 = vmul.f32 -1.442695, %v10757_v11  ;;  %v9329_v28 = vadd.f32 %v9196_v42, %v7713_v21 }
 0x2dd   : > { %10756 = vst [vmem:[#allocation36_spill] sm:$0xff] %v9317_v40  ;;  %v6437_v18 = vpop.eup %6436  ;;  %v3609_v5 = vmul.f32 %v6435_v39, %v10722_v29  ;;  %6456 = vrcp.f32 %v2660_v50  ;;  %v9331_v29 = vpop.f32.mrb[114].mxu0  ;;  %v9340_v22 = vadd.f32 %v9241_v6, %v7710_v20  ;;  %v9353_v6 = vadd.f32 %v9251_v24, %v10740_v15 }
 0x2de   : > { %v6439_v47 = vpop.eup %6438  ;;  %v3909_v52 = vadd.f32 %v3908_v17, %v3502_v57  ;;  %v3511_v44 = vmul.f32 %v6437_v18, %v10724_v13  ;;  %6458 = vpow2.f32 %v5466_v63  ;;  %v9335_v13 = vadd.f32 %v9198_v16, %v10740_v15  ;;  %v10758_v57 = vld [vmem:[#allocation35_spill] sm:$0xff]  ;;  %v9365_v24 = vpop.f32.mrb[115].mxu0 }
 0x2df   : > { %v6441_v31 = vpop.eup %6440  ;;  %v3827_v10 = vadd.f32 %v3826_v9, %v3609_v5  ;;  %v3610_v40 = vmul.f32 %v6439_v47, %v10726_v25  ;;  %6460 = vpow2.f32 %v5368_v38  ;;  %v5476_v42 = vmul.f32 -1.442695, %v10758_v57  ;;  %10759 = vst [vmem:[#allocation54_spill] sm:$0xff] %v9340_v22  ;;  %v10762_v5 = vld [vmem:[#allocation59_spill] sm:$0xff]  ;;  %10763 = vst [vmem:[#allocation27_spill] sm:$0xff] %v9353_v6  ;;  %v9355_v47 = vpop.f32.mrb[86].mxu1 }
 0x2e0   : > { %v6443_v50 = vpop.eup %6442  ;;  %v3879_v39 = vadd.f32 %v3878_v45, %v3511_v44  ;;  %v2562_v62 = vadd.f32 1.0, %v6441_v31  ;;  %6462 = vpow2.f32 %v5467_v51  ;;  %v9344_v16 = vadd.f32 %v9243_v54, %v10737_v32  ;;  %v10764_v31 = vld [vmem:[#allocation20_spill] sm:$0xff]  ;;  %v10767_v22 = vld [vmem:[#allocation23_spill] sm:$0xff] }
 0x2e1   : > { %v6445_v17 = vpop.eup %6444  ;;  %v3858_v63 = vadd.f32 %v3857_v36, %v3610_v40  ;;  %v2669_v9 = vadd.f32 1.0, %v6443_v50  ;;  %6464 = vpow2.f32 %v5369_v41  ;;  %v9348_v36 = vadd.f32 %v9249_v58, %v7713_v21  ;;  %v5883_v40 = vld [vmem:[#allocation9 + $0x98] sm:$0xff]  }
 0x2e2   : > { %v6447_v25 = vpop.eup %6446  ;;  %6466 = vrcp.f32 %v2562_v62  ;;  %v2571_v38 = vadd.f32 1.0, %v6445_v17  ;;  %10760 = vst [vmem:[#allocation71_spill] sm:$0xff] %v9344_v16  ;;  %v5378_v41 = vmul.f32 -1.442695, %v10762_v5  ;;  %v5477_v50 = vmul.f32 -1.442695, %v10764_v31  ;;  %5677 = vmatpush3.bf16.msra.mxu1 %v5883_v40 }
 0x2e3   : > { %v6449_v45 = vpop.eup %6448  ;;  %6468 = vrcp.f32 %v2669_v9  ;;  %v2670_v51 = vadd.f32 1.0, %v6447_v25  ;;  %10761 = vst [vmem:[#allocation53_spill] sm:$0xff] %v9348_v36  ;;  %v10765_v9 = vld [vmem:[#allocation22_spill] sm:$0xff]  ;;  %v9372_v40 = vadd.f32 %v9265_v46, %v10737_v32  ;;  %v9378_v46 = vadd.f32 %v9279_v30, %v7713_v21 }
 0x2e4   : > { %v6451_v62 = vpop.eup %6450  ;;  %6470 = vrcp.f32 %v2571_v38  ;;  %v2572_v18 = vadd.f32 1.0, %v6449_v45  ;;  %v5379_v25 = vmul.f32 -1.442695, %v10765_v9  ;;  %v9363_v38 = vadd.f32 %v9258_v35, %v7710_v20  ;;  %v9367_v45 = vpop.f32.mrb[87].mxu1  ;;  %v5885_v35 = vld [vmem:[#allocation9 + $0xa0] sm:$0xff]  }
 0x2e5   : > { %v6453_v44 = vpop.eup %6452  ;;  %v3512_v54 = vmul.f32 %v6451_v62, %v10729_v48  ;;  %6472 = vrcp.f32 %v2670_v51  ;;  %10768 = vst [vmem:[#allocation17_spill] sm:$0xff] %v9378_v46  ;;  %v9391_v30 = vadd.f32 %v9303_v7, %v10737_v32 }
 0x2e6   : > { %v6455_v58 = vpop.eup %6454  ;;  %v3619_v17 = vmul.f32 %v6453_v44, %v10731_v53  ;;  %6474 = vrcp.f32 %v2572_v18  ;;  %10766 = vst [vmem:[#allocation41_spill] sm:$0xff] %v9363_v38  ;;  %v5884_v53 = vld [vmem:[#allocation9 + $0xe0] sm:$0xff]  }
 0x2e7   : > { %v6457_v6 = vpop.eup %6456  ;;  %v3910_v48 = vadd.f32 %v3909_v52, %v3512_v54  ;;  %v3521_v51 = vmul.f32 %v6455_v58, %v10734_v37  ;;  %6476 = vpow2.f32 %v5476_v42  ;;  %v5486_v52 = vmul.f32 -1.442695, %v10767_v22  ;;  %5678 = vmatprep.subr.bf16.mxu1 %v5884_v53  ;;  %10772 = vst [vmem:[#allocation42_spill] sm:$0xff] %v9391_v30  ;;  %v10774_v53 = vld [vmem:[#allocation38_spill] sm:$0xff] }
 0x2e8   : > { %v6459_v62 = vpop.eup %6458  ;;  %v3828_v18 = vadd.f32 %v3827_v10, %v3619_v17  ;;  %v3620_v44 = vmul.f32 %v6457_v6, %v10736_v8  ;;  %6478 = vpow2.f32 %v5378_v41  ;;  %5679 = vmatpush3.bf16.msra.mxu1 %v5885_v35  ;;  %v9386_v41 = vadd.f32 %v9301_v2, %v7710_v20  ;;  %v1102_v17 = vpop.f32.mrb[116].mxu0 }
 0x2e9   : > { %v6461_v38 = vpop.eup %6460  ;;  %v3880_v36 = vadd.f32 %v3879_v39, %v3521_v51  ;;  %v2679_v16 = vadd.f32 1.0, %v6459_v62  ;;  %6480 = vpow2.f32 %v5477_v50  ;;  %v9382_v39 = vadd.f32 %v9281_v34, %v10740_v15  ;;  %v10771_v50 = vld [vmem:[#allocation62_spill] sm:$0xff]  ;;  %v10773_v51 = vld [vmem:[#allocation67_spill] sm:$0xff] }
 0x2ea   : > { %v6463_v37 = vpop.eup %6462  ;;  %v3859_v42 = vadd.f32 %v3858_v63, %v3620_v44  ;;  %v2581_v54 = vadd.f32 1.0, %v6461_v38  ;;  %6482 = vpow2.f32 %v5379_v25  ;;  %10770 = vst [vmem:[#allocation28_spill] sm:$0xff] %v9386_v41  ;;  %v5388_v58 = vmul.f32 -1.442695, %v10771_v50  ;;  %v5886_v25 = vld [vmem:[#allocation9 + $0xe8] sm:$0xff]   ;;  %v9398_v44 = vpop.f32.mrb[117].mxu0 }
 0x2eb   : > { %v6465_v10 = vpop.eup %6464  ;;  %6484 = vrcp.f32 %v2679_v16  ;;  %v2680_v8 = vadd.f32 1.0, %v6463_v37  ;;  %10769 = vst [vmem:[#allocation18_spill] sm:$0xff] %v9382_v39  ;;  %v9393_v16 = vpop.f32.mrb[88].mxu1  ;;  %v5487_v2 = vmul.f32 -1.442695, %v10773_v51  ;;  %v9406_v30 = vadd.f32 %v9319_v33, %v7713_v21  ;;  %5680 = vmatprep.subr.bf16.mxu1 %v5886_v25 }
 0x2ec   : > { %v6467_v6 = vpop.eup %6466  ;;  %6486 = vrcp.f32 %v2581_v54  ;;  %v2582_v63 = vadd.f32 1.0, %v6465_v10  ;;  %v5389_v62 = vmul.f32 -1.442695, %v10774_v53  ;;  %v9400_v35 = vpop.f32.mrb[89].mxu1  ;;  %v10775_v54 = vld [vmem:[#allocation39_spill] sm:$0xff]  ;;  %v9411_v39 = vadd.f32 %v9323_v61, %v10740_v15 }
 0x2ed   : > { %v6469_v38 = vpop.eup %6468  ;;  %v3522_v34 = vmul.f32 %v6467_v6, %v10742_v49  ;;  %6488 = vrcp.f32 %v2680_v8  ;;  %v5496_v10 = vmul.f32 -1.442695, %v10775_v54  ;;  %10776 = vst [vmem:[#allocation55_spill] sm:$0xff] %v9406_v30  ;;  %v5887_v49 = vld [vmem:[#allocation9 + $0xa8] sm:$0xff]   ;;  %v9413_v46 = vpop.f32.mrb[118].mxu0 }
 0x2ee   : > { %v6471_v37 = vpop.eup %6470  ;;  %v3629_v7 = vmul.f32 %v6469_v38, %v10744_v23  ;;  %6490 = vrcp.f32 %v2582_v63  ;;  %v9415_v23 = vpop.f32.mrb[90].mxu1  ;;  %5681 = vmatpush3.bf16.msra.mxu1 %v5887_v49 }
 0x2ef   : > { %v6473_v8 = vpop.eup %6472  ;;  %v3911_v6 = vadd.f32 %v3910_v48, %v3522_v34  ;;  %v3531_v41 = vmul.f32 %v6471_v37, %v10746_v59  ;;  %6492 = vpow2.f32 %v5486_v52  ;;  %v9419_v59 = vpop.f32.mrb[119].mxu0  ;;  %v9423_v37 = vadd.f32 %v9331_v29, %v7710_v20 }
 0x2f0   : > { %v6475_v63 = vpop.eup %6474  ;;  %v3829_v38 = vadd.f32 %v3828_v18, %v3629_v7  ;;  %v3630_v33 = vmul.f32 %v6473_v8, %v10748_v55  ;;  %6494 = vpow2.f32 %v5388_v58  ;;  %v5398_v58 = vmul.f32 -1.442695, %v9051_v60 }
 0x2f1   : > { %v6477_v25 = vpop.eup %6476  ;;  %v3881_v30 = vadd.f32 %v3880_v36, %v3531_v41  ;;  %v3532_v48 = vmul.f32 %v6475_v63, %v10750_v43  ;;  %6496 = vpow2.f32 %v5487_v2  ;;  %v9427_v36 = vadd.f32 %v9355_v47, %v10737_v32  ;;  %v1191_v47 = vpop.f32.mrb[91].mxu1 }
 0x2f2   : > { %v6479_v52 = vpop.eup %6478  ;;  %v3860_v61 = vadd.f32 %v3859_v42, %v3630_v33  ;;  %v2689_v34 = vadd.f32 1.0, %v6477_v25  ;;  %6498 = vpow2.f32 %v5389_v62  ;;  %v9432_v42 = vadd.f32 %v9365_v24, %v7713_v21  ;;  %v10777_v25 = vld [vmem:[#allocation63_spill] sm:$0xff] }
 0x2f3   : > { %v6481_v18 = vpop.eup %6480  ;;  %v3912_v7 = vadd.f32 %v3911_v6, %v3532_v48  ;;  %v2591_v55 = vadd.f32 1.0, %v6479_v52  ;;  %6500 = vpow2.f32 %v5496_v10  ;;  %v5497_v62 = vmul.f32 -1.442695, %v9055_v1  ;;  %v5888_v52 = vld [vmem:[#allocation9 + $0xf0] sm:$0xff]  }
 0x2f4   : > { %v6483_v43 = vpop.eup %6482  ;;  %6502 = vrcp.f32 %v2689_v34  ;;  %v2690_v41 = vadd.f32 1.0, %v6481_v18  ;;  %v9437_v10 = vadd.f32 %v9367_v45, %v10740_v15  ;;  %v5399_v6 = vmul.f32 -1.442695, %v9064_v0  ;;  %5682 = vmatprep.subr.bf16.mxu1 %v5888_v52  ;;  %v10782_v52 = vld [vmem:[#allocation40_spill] sm:$0xff] }
 0x2f5   : > { %v6485_v2 = vpop.eup %6484  ;;  %6504 = vrcp.f32 %v2591_v55  ;;  %v2592_v29 = vadd.f32 1.0, %v6483_v43  ;;  %v9442_v63 = vadd.f32 %v1102_v17, %v7710_v20  ;;  %v5506_v48 = vmul.f32 -1.442695, %v10777_v25  ;;  %v5889_v55 = vld [vmem:[#allocation9 + $0xb0] sm:$0xff]   ;;  %v322_v17 = vld [vmem:[#allocation8 + $0x8] sm:$0x3] }
 0x2f6   : > { %v6487_v49 = vpop.eup %6486  ;;  %v3639_v8 = vmul.f32 %v6485_v2, %v10751_v27  ;;  %6506 = vrcp.f32 %v2690_v41  ;;  %v9448_v45 = vadd.f32 %v9393_v16, %v10737_v32  ;;  %v9454_v16 = vadd.f32 %v9398_v44, %v7713_v21  ;;  %5683 = vmatpush3.bf16.msra.mxu1 %v5889_v55 }
 0x2f7   : > { %v6489_v24 = vpop.eup %6488  ;;  %v3541_v33 = vmul.f32 %v6487_v49, %v10752_v4  ;;  %6508 = vrcp.f32 %v2592_v29  ;;  %v9466_v44 = vadd.f32 %v9413_v46, %v7710_v20  ;;  %v9476_v20 = vadd.f32 %v9419_v59, %v7713_v21  ;;  %v5890_v46 = vld [vmem:[#allocation9 + $0xf8] sm:$0xff]  }
 0x2f8   : > { %v6491_v34 = vpop.eup %6490  ;;  %v3830_v18 = vadd.f32 %v3829_v38, %v3639_v8  ;;  %v3640_v27 = vmul.f32 %v6489_v24, %v10755_v14  ;;  %6510 = vpow2.f32 %v5398_v58  ;;  %5684 = vmatprep.subr.bf16.mxu1 %v5890_v46 }
 0x2f9   : > { %v6493_v43 = vpop.eup %6492  ;;  %v3882_v41 = vadd.f32 %v3881_v30, %v3541_v33  ;;  %v3542_v2 = vmul.f32 %v6491_v34, %v10757_v11  ;;  %6512 = vpow2.f32 %v5497_v62  ;;  %v9458_v30 = vadd.f32 %v9400_v35, %v10740_v15  ;;  %v10779_v62 = vld [vmem:[#allocation16_spill] sm:$0xff]  ;;  %10781 = vst [vmem:[#allocation46_spill] sm:$0xff] %v9466_v44  ;;  %v1338_v33 = vpop.f32.mrb[120].mxu0  ;;  %10785 = vst [vmem:[#allocation45_spill] sm:$0xff] %v9476_v20 }
 0x2fa   : > { %v6495_v4 = vpop.eup %6494  ;;  %v3861_v29 = vadd.f32 %v3860_v61, %v3640_v27  ;;  %v2699_v49 = vadd.f32 1.0, %v6493_v43  ;;  %6514 = vpow2.f32 %v5399_v6  ;;  %v10780_v8 = vsub.s32 0, %v10779_v62  ;;  %v1195_v6 = vpop.f32.mrb[92].mxu1  ;;  %v10784_v43 = vld [vmem:[#allocation70_spill] sm:$0xff] }
 0x2fb   : > { %v6497_v38 = vpop.eup %6496  ;;  %v3913_v14 = vadd.f32 %v3912_v7, %v3542_v2  ;;  %v2601_v58 = vadd.f32 1.0, %v6495_v4  ;;  %6516 = vpow2.f32 %v5506_v48  ;;  %10778 = vst [vmem:[#allocation57_spill] sm:$0xff] %v9458_v30  ;;  %v5408_v34 = vmul.f32 -1.442695, %v10782_v52  ;;  %v5891_v30 = vld [vmem:[#allocation9 + $0xb8] sm:$0xff]  }
 0x2fc   : > { %v6499_v11 = vpop.eup %6498  ;;  %v9462_v24 = vrot.slane %v322_v17, %v10780_v8  ;;  %6518 = vrcp.f32 %v2699_v49  ;;  %v2700_v61 = vadd.f32 1.0, %v6497_v38  ;;  %v9471_v35 = vadd.f32 %v9415_v23, %v10737_v32  ;;  %v10786_v38 = vld [vmem:[#allocation21_spill] sm:$0xff]  ;;  %v1197_v23 = vpop.f32.mrb[93].mxu1  ;;  %5685 = vmatpush3.bf16.msra.mxu1 %v5891_v30  ;;  %v10793_v30 = vld [vmem:[#allocation64_spill] sm:$0xff] }
 0x2fd   : > { %v6501_v7 = vpop.eup %6500  ;;  %6520 = vrcp.f32 %v2601_v58  ;;  %v2602_v48 = vadd.f32 1.0, %v6499_v11  ;;  %v5507_v2 = vmul.f32 -1.442695, %v10784_v43  ;;  %v5409_v58 = vmul.f32 -1.442695, %v10786_v38  ;;  %v1340_v8 = vpop.f32.mrb[121].mxu0 }
 0x2fe   : > { %10783 = vst [vmem:[#allocation58_spill] sm:$0xff] %v9471_v35  ;;  %v6503_v27 = vpop.eup %6502  ;;  %6522 = vrcp.f32 %v2700_v61  ;;  %v2709_v55 = vadd.f32 1.0, %v6501_v7  ;;  %v9481_v11 = vadd.f32 %v1191_v47, %v10740_v15  ;;  %v10788_v35 = vld [vmem:[#allocation44_spill] sm:$0xff]  ;;  %v9486_v21 = vadd.f32 %v1195_v6, %v10737_v32  ;;  %v1342_v20 = vpop.f32.mrb[122].mxu0 }
 0x2ff   : > { %v6505_v4 = vpop.eup %6504  ;;  %v3649_v49 = vmul.f32 %v6503_v27, %v10758_v57  ;;  %6524 = vrcp.f32 %v2602_v48  ;;  %v5516_v44 = vmul.f32 -1.442695, %v10788_v35  ;;  %v10790_v57 = vsub.s32 1, %v10779_v62 }
 0x300   : > { %10787 = vst [vmem:[#allocation43_spill] sm:$0xff] %v9481_v11  ;;  %v6507_v61 = vpop.eup %6506  ;;  %v3551_v7 = vmul.f32 %v6505_v4, %v10762_v5  ;;  %6526 = vrcp.f32 %v2709_v55  ;;  %10789 = vst [vmem:[#allocation48_spill] sm:$0xff] %v9486_v21  ;;  %v1199_v11 = vpop.f32.mrb[94].mxu1  ;;  %v9495_v62 = vadd.f32 %v1338_v33, %v9462_v24 }
 0x301   : > { %v6509_v59 = vpop.eup %6508  ;;  %v9490_v48 = vrot.slane %v322_v17, %v10790_v57  ;;  %v3831_v27 = vadd.f32 %v3830_v18, %v3649_v49  ;;  %v3650_v47 = vmul.f32 %v6507_v61, %v10764_v31  ;;  %6528 = vpow2.f32 %v5408_v34  ;;  %v1201_v49 = vpop.f32.mrb[95].mxu1  ;;  %v10795_v57 = vld [vmem:[#allocation65_spill] sm:$0xff] }
 0x302   : > { %v6511_v5 = vpop.eup %6510  ;;  %v3883_v55 = vadd.f32 %v3882_v41, %v3551_v7  ;;  %v3552_v4 = vmul.f32 %v6509_v59, %v10765_v9  ;;  %6530 = vpow2.f32 %v5507_v2  ;;  %v9498_v34 = vadd.f32 %v1197_v23, %v10740_v15  ;;  %v10791_v2 = vld [vmem:[#allocation33_spill] sm:$0xff] }
 0x303   : > { %v6513_v6 = vpop.eup %6512  ;;  %v3862_v21 = vadd.f32 %v3861_v29, %v3650_v47  ;;  %v2611_v46 = vadd.f32 1.0, %v6511_v5  ;;  %6532 = vpow2.f32 %v5409_v58  ;;  %v5418_v61 = vmul.f32 -1.442695, %v10791_v2 }
 0x304   : > { %v6515_v18 = vpop.eup %6514  ;;  %v3914_v17 = vadd.f32 %v3913_v14, %v3552_v4  ;;  %v2710_v31 = vadd.f32 1.0, %v6513_v6  ;;  %6534 = vpow2.f32 %v5516_v44  ;;  %v9502_v29 = vadd.f32 %v1340_v8, %v9490_v48  ;;  %v1344_v44 = vpop.f32.mrb[123].mxu0  ;;  %v10797_v6 = vld [vmem:[#allocation72_spill] sm:$0xff] }
 0x305   : > { %v6517_v41 = vpop.eup %6516  ;;  %6536 = vrcp.f32 %v2611_v46  ;;  %v2612_v9 = vadd.f32 1.0, %v6515_v18  ;;  %v5517_v7 = vmul.f32 -1.442695, %v10793_v30  ;;  %v9506_v14 = vadd.f32 %v1199_v11, %v10737_v32 }
 0x306   : > { %10792 = vst [vmem:[#allocation35_spill] sm:$0xff] %v9502_v29  ;;  %v6519_v58 = vpop.eup %6518  ;;  %6538 = vrcp.f32 %v2710_v31  ;;  %v2719_v33 = vadd.f32 1.0, %v6517_v41  ;;  %v5419_v47 = vmul.f32 -1.442695, %v10795_v57  ;;  %v9511_v5 = vadd.f32 %v1342_v20, %v9462_v24 }
 0x307   : > { %10794 = vst [vmem:[#allocation59_spill] sm:$0xff] %v9506_v14  ;;  %v6521_v23 = vpop.eup %6520  ;;  %v3659_v59 = vmul.f32 %v6519_v58, %v10767_v22  ;;  %6540 = vrcp.f32 %v2612_v9  ;;  %v5526_v46 = vmul.f32 -1.442695, %v10797_v6  ;;  %v9516_v18 = vadd.f32 %v1201_v49, %v10740_v15  ;;  %v10799_v22 = vld [vmem:[#allocation66_spill] sm:$0xff] }
 0x308   : > { %10796 = vst [vmem:[#allocation20_spill] sm:$0xff] %v9511_v5  ;;  %v6523_v8 = vpop.eup %6522  ;;  %v3561_v4 = vmul.f32 %v6521_v23, %v10771_v50  ;;  %6542 = vrcp.f32 %v2719_v33  ;;  %v5428_v9 = vmul.f32 -1.442695, %v10799_v22  ;;  %v9523_v49 = vadd.f32 %v1344_v44, %v9490_v48 }
 0x309   : > { %10798 = vst [vmem:[#allocation22_spill] sm:$0xff] %v9516_v18  ;;  %v6525_v11 = vpop.eup %6524  ;;  %v3832_v31 = vadd.f32 %v3831_v27, %v3659_v59  ;;  %v3660_v41 = vmul.f32 %v6523_v8, %v10773_v51  ;;  %6544 = vpow2.f32 %v5418_v61  ;;  %v10801_v51 = vld [vmem:[#allocation31_spill] sm:$0xff]  ;;  %v1205_v8 = vpop.f32.mrb[96].mxu1 }
 0x30a   : > { %v6527_v58 = vpop.eup %6526  ;;  %v3884_v14 = vadd.f32 %v3883_v55, %v3561_v4  ;;  %v3562_v20 = vmul.f32 %v6525_v11, %v10774_v53  ;;  %6546 = vpow2.f32 %v5517_v7  ;;  %10800 = vst [vmem:[#allocation23_spill] sm:$0xff] %v9523_v49  ;;  %v5527_v61 = vmul.f32 -1.442695, %v10801_v51  ;;  %v1348_v18 = vpop.f32.mrb[124].mxu0  ;;  %v10802_v7 = vld [vmem:[#allocation47_spill] sm:$0xff] }
 0x30b   : > { %v6529_v5 = vpop.eup %6528  ;;  %v3863_v50 = vadd.f32 %v3862_v21, %v3660_v41  ;;  %v3669_v33 = vmul.f32 %v6527_v58, %v10775_v54  ;;  %6548 = vpow2.f32 %v5419_v47  ;;  %v5429_v21 = vmul.f32 -1.442695, %v10802_v7  ;;  %v1207_v11 = vpop.f32.mrb[97].mxu1 }
 0x30c   : > { %v6531_v23 = vpop.eup %6530  ;;  %v3915_v27 = vadd.f32 %v3914_v17, %v3562_v20  ;;  %v2621_v59 = vadd.f32 1.0, %v6529_v5  ;;  %6550 = vpow2.f32 %v5526_v46  ;;  %v1350_v54 = vpop.f32.mrb[125].mxu0  ;;  %v9528_v41 = vadd.f32 %v1205_v8, %v10737_v32 }
 0x30d   : > { %v6533_v55 = vpop.eup %6532  ;;  %v3833_v4 = vadd.f32 %v3832_v31, %v3669_v33  ;;  %v2720_v53 = vadd.f32 1.0, %v6531_v23  ;;  %6552 = vpow2.f32 %v5428_v9  ;;  %v9531_v17 = vadd.f32 %v1348_v18, %v9462_v24  ;;  %v10807_v33 = vld [vmem:[#allocation32_spill] sm:$0xff] }
 0x30e   : > { %v6535_v47 = vpop.eup %6534  ;;  %6554 = vrcp.f32 %v2621_v59  ;;  %v2622_v44 = vadd.f32 1.0, %v6533_v55  ;;  %10803 = vst [vmem:[#allocation62_spill] sm:$0xff] %v9528_v41  ;;  %v9534_v31 = vadd.f32 %v1207_v11, %v10740_v15  ;;  %v9537_v9 = vadd.f32 %v1350_v54, %v9490_v48  ;;  %v1209_v59 = vpop.f32.mrb[98].mxu1  ;;  %v10808_v55 = vld [vmem:[#allocation26_spill] sm:$0xff] }
 0x30f   : > { %10804 = vst [vmem:[#allocation67_spill] sm:$0xff] %v9531_v17  ;;  %v6537_v5 = vpop.eup %6536  ;;  %6556 = vrcp.f32 %v2720_v53  ;;  %v2729_v46 = vadd.f32 1.0, %v6535_v47  ;;  %v5536_v23 = vmul.f32 -1.442695, %v10807_v33  ;;  %v5438_v53 = vmul.f32 -1.442695, %v10808_v55 }
 0x310   : > { %10805 = vst [vmem:[#allocation38_spill] sm:$0xff] %v9534_v31  ;;  %10806 = vst [vmem:[#allocation39_spill] sm:$0xff] %v9537_v9  ;;  %v6539_v58 = vpop.eup %6538  ;;  %v3571_v20 = vmul.f32 %v6537_v5, %v9051_v60  ;;  %6558 = vrcp.f32 %v2622_v44  ;;  %v9545_v54 = vadd.f32 %v1209_v59, %v10737_v32  ;;  %v1352_v9 = vpop.f32.mrb[126].mxu0 }
 0x311   : > { %v6541_v8 = vpop.eup %6540  ;;  %v3670_v18 = vmul.f32 %v6539_v58, %v9055_v1  ;;  %6560 = vrcp.f32 %v2729_v46  ;;  %v9549_v31 = vadd.f32 %v1352_v9, %v9462_v24 }
 0x312   : > { %v6543_v47 = vpop.eup %6542  ;;  %v3885_v17 = vadd.f32 %v3884_v14, %v3571_v20  ;;  %v3572_v11 = vmul.f32 %v6541_v8, %v9064_v0  ;;  %6562 = vpow2.f32 %v5527_v61  ;;  %10809 = vst [vmem:[#allocation63_spill] sm:$0xff] %v9545_v54 }
 0x313   : > { %v6545_v60 = vpop.eup %6544  ;;  %v3864_v44 = vadd.f32 %v3863_v50, %v3670_v18  ;;  %v3679_v5 = vmul.f32 %v6543_v47, %v10777_v25  ;;  %6564 = vpow2.f32 %v5429_v21  ;;  %10810 = vst [vmem:[#allocation16_spill] sm:$0xff] %v9549_v31  ;;  %v10811_v18 = vld [vmem:[#allocation37_spill] sm:$0xff]  ;;  %v10812_v47 = vld [vmem:[#allocation56_spill] sm:$0xff] }
 0x314   : > { %v6547_v1 = vpop.eup %6546  ;;  %v3916_v46 = vadd.f32 %v3915_v27, %v3572_v11  ;;  %v2631_v58 = vadd.f32 1.0, %v6545_v60  ;;  %6566 = vpow2.f32 %v5536_v23  ;;  %v5537_v25 = vmul.f32 -1.442695, %v10811_v18 }
 0x315   : > { %v6549_v14 = vpop.eup %6548  ;;  %v3834_v20 = vadd.f32 %v3833_v4, %v3679_v5  ;;  %v2730_v0 = vadd.f32 1.0, %v6547_v1  ;;  %6568 = vpow2.f32 %v5438_v53  ;;  %v5439_v31 = vmul.f32 -1.442695, %v10812_v47  ;;  %v10813_v4 = vld [vmem:[#allocation68_spill] sm:$0xff]  ;;  %v10814_v53 = vld [vmem:[#allocation73_spill] sm:$0xff]  ;;  %v1211_v5 = vpop.f32.mrb[99].mxu1 }
 0x316   : > { %v6551_v61 = vpop.eup %6550  ;;  %6570 = vrcp.f32 %v2631_v58  ;;  %v2632_v59 = vadd.f32 1.0, %v6549_v14  ;;  %v5546_v11 = vmul.f32 -1.442695, %v10813_v4  ;;  %v5448_v60 = vmul.f32 -1.442695, %v10814_v53  ;;  %v1354_v1 = vpop.f32.mrb[127].mxu0 }
 0x317   : > { %v6553_v8 = vpop.eup %6552  ;;  %6572 = vrcp.f32 %v2730_v0  ;;  %v2739_v50 = vadd.f32 1.0, %v6551_v61  ;;  %v9558_v0 = vadd.f32 %v1211_v5, %v10740_v15  ;;  %v9561_v61 = vadd.f32 %v1354_v1, %v9490_v48 }
 0x318   : > { %v6555_v21 = vpop.eup %6554  ;;  %6574 = vrcp.f32 %v2632_v59  ;;  %v2641_v9 = vadd.f32 1.0, %v6553_v8  ;;  %v5892_v59 = vld [vmem:[#allocation9 + $0x140] sm:$0xff]   ;;  %v5547_v5 = vmul.f32 -1.442695, %v9193_v56 }
 0x319   : > { %v6557_v27 = vpop.eup %6556  ;;  %v3581_v23 = vmul.f32 %v6555_v21, %v10782_v52  ;;  %6576 = vrcp.f32 %v2739_v50  ;;  %10815 = vst [vmem:[#allocation40_spill] sm:$0xff] %v9558_v0  ;;  %10816 = vst [vmem:[#allocation70_spill] sm:$0xff] %v9561_v61  ;;  %5692 = vmatprep.subr.bf16.mxu1 %v5892_v59 }
 0x31a   : > { %v6559_v58 = vpop.eup %6558  ;;  %v3680_v14 = vmul.f32 %v6557_v27, %v10784_v43  ;;  %6578 = vrcp.f32 %v2641_v9 }
 0x31b   : > { %v6561_v8 = vpop.eup %6560  ;;  %v3886_v52 = vadd.f32 %v3885_v17, %v3581_v23  ;;  %v3582_v50 = vmul.f32 %v6559_v58, %v10786_v38  ;;  %6580 = vpow2.f32 %v5537_v25  ;;  %v5449_v17 = vmul.f32 -1.442695, %v9203_v12 }
 0x31c   : > { %v6563_v21 = vpop.eup %6562  ;;  %v3865_v54 = vadd.f32 %v3864_v44, %v3680_v14  ;;  %v3689_v41 = vmul.f32 %v6561_v8, %v10788_v35  ;;  %6582 = vpow2.f32 %v5439_v31  ;;  %v10817_v44 = vld [vmem:[#allocation29_spill] sm:$0xff]  ;;  %v1215_v35 = vpop.f32.mrb[100].mxu1 }
 0x31d   : > { %v6565_v43 = vpop.eup %6564  ;;  %v3917_v9 = vadd.f32 %v3916_v46, %v3582_v50  ;;  %v2740_v27 = vadd.f32 1.0, %v6563_v21  ;;  %6584 = vpow2.f32 %v5546_v11  ;;  %v5556_v23 = vmul.f32 -1.442695, %v10817_v44  ;;  %v1358_v31 = vpop.f32.mrb[128].mxu0 }
 0x31e   : > { %v6567_v1 = vpop.eup %6566  ;;  %v3835_v61 = vadd.f32 %v3834_v20, %v3689_v41  ;;  %v2642_v0 = vadd.f32 1.0, %v6565_v43  ;;  %6586 = vpow2.f32 %v5448_v60  ;;  %v9569_v11 = vadd.f32 %v1215_v35, %v10737_v32  ;;  %v1217_v41 = vpop.f32.mrb[101].mxu1 }
 0x31f   : > { %v6569_v38 = vpop.eup %6568  ;;  %6588 = vrcp.f32 %v2740_v27  ;;  %v2749_v25 = vadd.f32 1.0, %v6567_v1  ;;  %v9572_v14 = vadd.f32 %v1358_v31, %v9462_v24  ;;  %v1360_v20 = vpop.f32.mrb[129].mxu0  ;;  %v9576_v8 = vadd.f32 %v1217_v41, %v10740_v15  ;;  %v10822_v1 = vld [vmem:[#allocation69_spill] sm:$0xff] }
 0x320   : > { %v6571_v58 = vpop.eup %6570  ;;  %6590 = vrcp.f32 %v2642_v0  ;;  %v2651_v46 = vadd.f32 1.0, %v6569_v38  ;;  %10818 = vst [vmem:[#allocation21_spill] sm:$0xff] %v9569_v11  ;;  %v9579_v50 = vadd.f32 %v1360_v20, %v9490_v48  ;;  %v1219_v0 = vpop.f32.mrb[102].mxu1  ;;  %v5458_v38 = vmul.f32 -1.442695, %v10822_v1 }
 0x321   : > { %10819 = vst [vmem:[#allocation44_spill] sm:$0xff] %v9572_v14  ;;  %v6573_v60 = vpop.eup %6572  ;;  %v3591_v59 = vmul.f32 %v6571_v58, %v10791_v2  ;;  %6592 = vrcp.f32 %v2749_v25  ;;  %10820 = vst [vmem:[#allocation33_spill] sm:$0xff] %v9576_v8  ;;  %v1362_v21 = vpop.f32.mrb[130].mxu0  ;;  %v10823_v2 = vld [vmem:[#allocation19_spill] sm:$0xff] }
 0x322   : > { %10821 = vst [vmem:[#allocation64_spill] sm:$0xff] %v9579_v50  ;;  %v6575_v43 = vpop.eup %6574  ;;  %v3690_v27 = vmul.f32 %v6573_v60, %v10793_v30  ;;  %6594 = vrcp.f32 %v2651_v46  ;;  %v5557_v25 = vmul.f32 -1.442695, %v10823_v2  ;;  %v1221_v58 = vpop.f32.mrb[103].mxu1  ;;  %v9588_v46 = vadd.f32 %v1219_v0, %v10737_v32 }
 0x323   : > { %v6577_v35 = vpop.eup %6576  ;;  %v3887_v31 = vadd.f32 %v3886_v52, %v3591_v59  ;;  %v3592_v14 = vmul.f32 %v6575_v43, %v10795_v57  ;;  %6596 = vpow2.f32 %v5547_v5  ;;  %v1364_v41 = vpop.f32.mrb[131].mxu0  ;;  %v9591_v60 = vadd.f32 %v1362_v21, %v9462_v24 }
 0x324   : > { %v6579_v8 = vpop.eup %6578  ;;  %v3866_v20 = vadd.f32 %v3865_v54, %v3690_v27  ;;  %v3699_v50 = vmul.f32 %v6577_v35, %v10797_v6  ;;  %6598 = vpow2.f32 %v5449_v17  ;;  %10824 = vst [vmem:[#allocation65_spill] sm:$0xff] %v9588_v46  ;;  %v10826_v17 = vld [vmem:[#allocation50_spill] sm:$0xff]  ;;  %v1225_v0 = vpop.f32.mrb[104].mxu1  ;;  %v10830_v35 = vld [vmem:[#allocation52_spill] sm:$0xff] }
 0x325   : > { %v6581_v11 = vpop.eup %6580  ;;  %v3918_v49 = vadd.f32 %v3917_v9, %v3592_v14  ;;  %v3601_v30 = vmul.f32 %v6579_v8, %v10799_v22  ;;  %6600 = vpow2.f32 %v5556_v23  ;;  %10825 = vst [vmem:[#allocation72_spill] sm:$0xff] %v9591_v60  ;;  %v5459_v22 = vmul.f32 -1.442695, %v10826_v17  ;;  %v1368_v21 = vpop.f32.mrb[132].mxu0 }
 0x326   : > { %v6583_v52 = vpop.eup %6582  ;;  %v3836_v57 = vadd.f32 %v3835_v61, %v3699_v50  ;;  %v2750_v5 = vadd.f32 1.0, %v6581_v11  ;;  %6602 = vpow2.f32 %v5458_v38  ;;  %v9595_v23 = vadd.f32 %v1221_v58, %v10740_v15  ;;  %v10828_v11 = vld [vmem:[#allocation51_spill] sm:$0xff] }
 0x327   : > { %v6585_v59 = vpop.eup %6584  ;;  %v3888_v54 = vadd.f32 %v3887_v31, %v3601_v30  ;;  %v2652_v43 = vadd.f32 1.0, %v6583_v52  ;;  %6604 = vpow2.f32 %v5557_v25  ;;  %v5468_v8 = vmul.f32 -1.442695, %v10828_v11  ;;  %v10832_v52 = vld [vmem:[#allocation30_spill] sm:$0xff] }
 0x328   : > { %v6587_v6 = vpop.eup %6586  ;;  %6606 = vrcp.f32 %v2750_v5  ;;  %v2759_v9 = vadd.f32 1.0, %v6585_v59  ;;  %10827 = vst [vmem:[#allocation66_spill] sm:$0xff] %v9595_v23  ;;  %v9599_v50 = vadd.f32 %v1364_v41, %v9490_v48  ;;  %v5250_v31 = vmul.f32 -1.442695, %v10830_v35 }
 0x329   : > { %v6589_v14 = vpop.eup %6588  ;;  %6608 = vrcp.f32 %v2652_v43  ;;  %v2661_v61 = vadd.f32 1.0, %v6587_v6  ;;  %v9604_v25 = vadd.f32 %v1225_v0, %v10737_v32  ;;  %v5469_v5 = vmul.f32 -1.442695, %v10832_v52  ;;  %v1227_v0 = vpop.f32.mrb[105].mxu1 }
 0x32a   : > { %10829 = vst [vmem:[#allocation31_spill] sm:$0xff] %v9599_v50  ;;  %v6591_v27 = vpop.eup %6590  ;;  %v3700_v38 = vmul.f32 %v6589_v14, %v10801_v51  ;;  %6610 = vrcp.f32 %v2759_v9  ;;  %v9609_v41 = vadd.f32 %v1368_v21, %v9462_v24 }
 0x32b   : > { %10831 = vst [vmem:[#allocation47_spill] sm:$0xff] %v9604_v25  ;;  %v6593_v58 = vpop.eup %6592  ;;  %v3602_v30 = vmul.f32 %v6591_v27, %v10802_v7  ;;  %6612 = vrcp.f32 %v2661_v61  ;;  %v9614_v61 = vadd.f32 %v1227_v0, %v10740_v15 }
 0x32c   : > { %10833 = vst [vmem:[#allocation32_spill] sm:$0xff] %v9609_v41  ;;  %v6595_v59 = vpop.eup %6594  ;;  %v3867_v43 = vadd.f32 %v3866_v20, %v3700_v38  ;;  %v3709_v6 = vmul.f32 %v6593_v58, %v10807_v33  ;;  %6614 = vpow2.f32 %v5459_v22  ;;  %v10836_v58 = vld [vmem:[#allocation74_spill] sm:$0xff] }
 0x32d   : > { %v6597_v51 = vpop.eup %6596  ;;  %v3919_v9 = vadd.f32 %v3918_v49, %v3602_v30  ;;  %v3611_v14 = vmul.f32 %v6595_v59, %v10808_v55  ;;  %6616 = vpow2.f32 %v5468_v8  ;;  %10834 = vst [vmem:[#allocation26_spill] sm:$0xff] %v9614_v61  ;;  %v10835_v55 = vld [vmem:[#allocation60_spill] sm:$0xff]  ;;  %v1370_v30 = vpop.f32.mrb[133].mxu0 }
 0x32e   : > { %v6599_v25 = vpop.eup %6598  ;;  %v3837_v50 = vadd.f32 %v3836_v57, %v3709_v6  ;;  %v2760_v7 = vadd.f32 1.0, %v6597_v51  ;;  %6618 = vpow2.f32 %v5250_v31  ;;  %v5251_v8 = vmul.f32 -1.442695, %v10835_v55 }
 0x32f   : > { %v6601_v21 = vpop.eup %6600  ;;  %v3889_v27 = vadd.f32 %v3888_v54, %v3611_v14  ;;  %v2662_v41 = vadd.f32 1.0, %v6599_v25  ;;  %6620 = vpow2.f32 %v5469_v5  ;;  %v5478_v31 = vmul.f32 -1.442695, %v10836_v58  ;;  %v10837_v54 = vld [vmem:[#allocation61_spill] sm:$0xff]  ;;  %v10839_v14 = vld [vmem:[#allocation24_spill] sm:$0xff] }
 0x330   : > { %v6603_v20 = vpop.eup %6602  ;;  %6622 = vrcp.f32 %v2760_v7  ;;  %v2769_v33 = vadd.f32 1.0, %v6601_v21  ;;  %v5260_v25 = vmul.f32 -1.442695, %v10837_v54  ;;  %v9621_v5 = vadd.f32 %v1370_v30, %v9490_v48  ;;  %v1229_v7 = vpop.f32.mrb[106].mxu1 }
 0x331   : > { %v6605_v22 = vpop.eup %6604  ;;  %6624 = vrcp.f32 %v2662_v41  ;;  %v2671_v49 = vadd.f32 1.0, %v6603_v20  ;;  %v5479_v0 = vmul.f32 -1.442695, %v10839_v14  ;;  %v1372_v21 = vpop.f32.mrb[134].mxu0  ;;  %v9628_v30 = vadd.f32 %v1229_v7, %v10737_v32 }
 0x332   : > { %v6607_v38 = vpop.eup %6606  ;;  %6626 = vrcp.f32 %v2769_v33  ;;  %v2770_v57 = vadd.f32 1.0, %v6605_v22  ;;  %10838 = vst [vmem:[#allocation37_spill] sm:$0xff] %v9621_v5  ;;  %v1231_v5 = vpop.f32.mrb[107].mxu1  ;;  %v9631_v61 = vadd.f32 %v1372_v21, %v9462_v24 }
 0x333   : > { %v6609_v59 = vpop.eup %6608  ;;  %v3710_v6 = vmul.f32 %v6607_v38, %v10811_v18  ;;  %6628 = vrcp.f32 %v2671_v49  ;;  %10840 = vst [vmem:[#allocation56_spill] sm:$0xff] %v9628_v30 }
 0x334   : > { %v6611_v51 = vpop.eup %6610  ;;  %v3612_v41 = vmul.f32 %v6609_v59, %v10812_v47  ;;  %6630 = vrcp.f32 %v2770_v57  ;;  %10841 = vst [vmem:[#allocation68_spill] sm:$0xff] %v9631_v61 }
 0x335   : > { %v6613_v20 = vpop.eup %6612  ;;  %v3868_v33 = vadd.f32 %v3867_v43, %v3710_v6  ;;  %v3719_v22 = vmul.f32 %v6611_v51, %v10813_v4  ;;  %6632 = vpow2.f32 %v5251_v8  ;;  %v1374_v43 = vpop.f32.mrb[135].mxu0 }
 0x336   : > { %v6615_v18 = vpop.eup %6614  ;;  %v3920_v49 = vadd.f32 %v3919_v9, %v3612_v41  ;;  %v3621_v38 = vmul.f32 %v6613_v20, %v10814_v53  ;;  %6634 = vpow2.f32 %v5478_v31  ;;  %v10842_v31 = vld [vmem:[#allocation49_spill] sm:$0xff]  ;;  %v9635_v41 = vadd.f32 %v1231_v5, %v10740_v15 }
 0x337   : > { %v6617_v47 = vpop.eup %6616  ;;  %v3838_v57 = vadd.f32 %v3837_v50, %v3719_v22  ;;  %v2672_v59 = vadd.f32 1.0, %v6615_v18  ;;  %6636 = vpow2.f32 %v5260_v25  ;;  %v5261_v51 = vmul.f32 -1.442695, %v10842_v31 }
 0x338   : > { %v6619_v6 = vpop.eup %6618  ;;  %v3890_v4 = vadd.f32 %v3889_v27, %v3621_v38  ;;  %v2681_v8 = vadd.f32 1.0, %v6617_v47  ;;  %6638 = vpow2.f32 %v5479_v0  ;;  %10843 = vst [vmem:[#allocation73_spill] sm:$0xff] %v9635_v41  ;;  %v5488_v25 = vmul.f32 -1.442695, %v9289_v26  ;;  %v10845_v38 = vld [vmem:[#allocation34_spill] sm:$0xff] }
 0x339   : > { %v6621_v9 = vpop.eup %6620  ;;  %6640 = vrcp.f32 %v2672_v59  ;;  %v2463_v53 = vadd.f32 1.0, %v6619_v6  ;;  %v9639_v21 = vadd.f32 %v1374_v43, %v9490_v48  ;;  %v5270_v0 = vmul.f32 -1.442695, %v9293_v19  ;;  %v10846_v43 = vld [vmem:[#allocation25_spill] sm:$0xff] }
 0x33a   : > { %v6623_v7 = vpop.eup %6622  ;;  %6642 = vrcp.f32 %v2681_v8  ;;  %v2682_v50 = vadd.f32 1.0, %v6621_v9  ;;  %v5489_v5 = vmul.f32 -1.442695, %v9299_v3  ;;  %v5271_v47 = vmul.f32 -1.442695, %v10845_v38 }
 0x33b   : > { %10844 = vst [vmem:[#allocation29_spill] sm:$0xff] %v9639_v21  ;;  %v6625_v20 = vpop.eup %6624  ;;  %v3720_v27 = vmul.f32 %v6623_v7, %v9193_v56  ;;  %6644 = vrcp.f32 %v2463_v53  ;;  %v5498_v9 = vmul.f32 -1.442695, %v10846_v43  ;;  %v1235_v21 = vpop.f32.mrb[108].mxu1 }
 0x33c   : > { %v6627_v22 = vpop.eup %6626  ;;  %v3622_v18 = vmul.f32 %v6625_v20, %v9203_v12  ;;  %6646 = vrcp.f32 %v2682_v50  ;;  %v1378_v56 = vpop.f32.mrb[136].mxu0  ;;  %v9650_v12 = vadd.f32 %v1235_v21, %v10737_v32 }
 0x33d   : > { %v6629_v59 = vpop.eup %6628  ;;  %v3869_v6 = vadd.f32 %v3868_v33, %v3720_v27  ;;  %v3729_v8 = vmul.f32 %v6627_v22, %v10817_v44  ;;  %6648 = vpow2.f32 %v5261_v51  ;;  %v1237_v50 = vpop.f32.mrb[109].mxu1  ;;  %v9654_v44 = vadd.f32 %v1378_v56, %v9462_v24 }
 0x33e   : > { %v6631_v53 = vpop.eup %6630  ;;  %v3921_v7 = vadd.f32 %v3920_v49, %v3622_v18  ;;  %v3631_v41 = vmul.f32 %v6629_v59, %v10822_v1  ;;  %6650 = vpow2.f32 %v5488_v25  ;;  %10847 = vst [vmem:[#allocation69_spill] sm:$0xff] %v9650_v12  ;;  %v1380_v20 = vpop.f32.mrb[137].mxu0  ;;  %v10849_v1 = vld [vmem:[#allocation36_spill] sm:$0xff] }
 0x33f   : > { %v6633_v61 = vpop.eup %6632  ;;  %v3839_v30 = vadd.f32 %v3838_v57, %v3729_v8  ;;  %v3730_v33 = vmul.f32 %v6631_v53, %v10823_v2  ;;  %6652 = vpow2.f32 %v5270_v0  ;;  %10848 = vst [vmem:[#allocation19_spill] sm:$0xff] %v9654_v44  ;;  %v1239_v51 = vpop.f32.mrb[110].mxu1  ;;  %v5280_v25 = vmul.f32 -1.442695, %v10849_v1 }
 0x340   : > { %v1382_v27 = vpop.f32.mrb[138].mxu0  ;;  %v6635_v22 = vpop.eup %6634  ;;  %v3891_v49 = vadd.f32 %v3890_v4, %v3631_v41  ;;  %v2464_v18 = vadd.f32 1.0, %v6633_v61  ;;  %6654 = vpow2.f32 %v5489_v5  ;;  %v5499_v0 = vmul.f32 -1.442695, %v9329_v28 }
 0x341   : > { %v6637_v21 = vpop.eup %6636  ;;  %v4102_v59 = vrot.slane %v3839_v30, 4  ;;  %v3870_v12 = vadd.f32 %v3869_v6, %v3730_v33  ;;  %v2691_v23 = vadd.f32 1.0, %v6635_v22  ;;  %6656 = vpow2.f32 %v5271_v47  ;;  %v1241_v33 = vpop.f32.mrb[111].mxu1 }
 0x342   : > { %v6639_v57 = vpop.eup %6638  ;;  %6658 = vrcp.f32 %v2464_v18  ;;  %v2473_v2 = vadd.f32 1.0, %v6637_v21  ;;  %v9659_v8 = vadd.f32 %v1237_v50, %v10740_v15  ;;  %v5281_v6 = vmul.f32 -1.442695, %v9335_v13 }
 0x343   : > { %v6641_v56 = vpop.eup %6640  ;;  %v4103_v53 = vadd.f32 %v4102_v59, %v3839_v30  ;;  %v4108_v4 = vrot.slane %v3870_v12, 4  ;;  %6660 = vrcp.f32 %v2691_v23  ;;  %v2692_v61 = vadd.f32 1.0, %v6639_v57  ;;  %v10852_v23 = vld [vmem:[#allocation54_spill] sm:$0xff] }
 0x344   : > { %10850 = vst [vmem:[#allocation50_spill] sm:$0xff] %v9659_v8  ;;  %v6643_v41 = vpop.eup %6642  ;;  %v3632_v5 = vmul.f32 %v6641_v56, %v10826_v17  ;;  %6662 = vrcp.f32 %v2473_v2  ;;  %v9664_v47 = vadd.f32 %v1380_v20, %v9490_v48  ;;  %v5508_v57 = vmul.f32 -1.442695, %v10852_v23  ;;  %v10853_v8 = vld [vmem:[#allocation71_spill] sm:$0xff]  ;;  %v1384_v2 = vpop.f32.mrb[139].mxu0 }
 0x345   : > { %v6645_v22 = vpop.eup %6644  ;;  %v4104_v18 = vrot.slane %v4103_v53, 2  ;;  %v4109_v21 = vadd.f32 %v4108_v4, %v3870_v12  ;;  %v3641_v50 = vmul.f32 %v6643_v41, %v10828_v11  ;;  %6664 = vrcp.f32 %v2692_v61 }
 0x346   : > { %10851 = vst [vmem:[#allocation51_spill] sm:$0xff] %v9664_v47  ;;  %v6647_v30 = vpop.eup %6646  ;;  %v3922_v59 = vadd.f32 %v3921_v7, %v3632_v5  ;;  %6666 = vpow2.f32 %v5498_v9  ;;  %v5290_v17 = vmul.f32 -1.442695, %v10853_v8  ;;  %v9671_v11 = vadd.f32 %v1239_v51, %v10737_v32 }
 0x347   : > { %v6649_v56 = vpop.eup %6648  ;;  %v4105_v44 = vadd.f32 %v4104_v18, %v4103_v53  ;;  %v4110_v60 = vrot.slane %v4109_v21, 2  ;;  %v3892_v20 = vadd.f32 %v3891_v49, %v3641_v50  ;;  %v3642_v47 = vmul.f32 %v6647_v30, %v10832_v52  ;;  %v10856_v49 = vld [vmem:[#allocation53_spill] sm:$0xff]  ;;  %v10857_v50 = vld [vmem:[#allocation27_spill] sm:$0xff] }
 0x348   : > { %v6651_v46 = vpop.eup %6650  ;;  %v2474_v29 = vadd.f32 1.0, %v6649_v56  ;;  %6668 = vpow2.f32 %v5280_v25  ;;  %10854 = vst [vmem:[#allocation52_spill] sm:$0xff] %v9671_v11  ;;  %v9674_v7 = vadd.f32 %v1382_v27, %v9462_v24  ;;  %v5509_v5 = vmul.f32 -1.442695, %v10856_v49 }
 0x349   : > { %v6653_v9 = vpop.eup %6652  ;;  %v3923_v12 = vadd.f32 %v3922_v59, %v3642_v47  ;;  %v2701_v4 = vadd.f32 1.0, %v6651_v46  ;;  %6670 = vpow2.f32 %v5499_v0  ;;  %v4111_v61 = vadd.f32 %v4110_v60, %v4109_v21 }
 0x34a   : > { %10855 = vst [vmem:[#allocation30_spill] sm:$0xff] %v9674_v7  ;;  %v6655_v41 = vpop.eup %6654  ;;  %6672 = vrcp.f32 %v2474_v29  ;;  %v2483_v53 = vadd.f32 1.0, %v6653_v9  ;;  %v4106_v52 = vrot.slane %v4105_v44, 1  ;;  %v5291_v51 = vmul.f32 -1.442695, %v10857_v50  ;;  %v10859_v29 = vld [vmem:[#allocation41_spill] sm:$0xff] }
 0x34b   : > { %v6657_v18 = vpop.eup %6656  ;;  %6674 = vrcp.f32 %v2701_v4  ;;  %v2702_v25 = vadd.f32 1.0, %v6655_v41  ;;  %v4112_v30 = vrot.slane %v4111_v61, 1  ;;  %v9679_v46 = vadd.f32 %v1241_v33, %v10740_v15 }
 0x34c   : > { %v6659_v56 = vpop.eup %6658  ;;  %6676 = vrcp.f32 %v2483_v53  ;;  %v2484_v27 = vadd.f32 1.0, %v6657_v18  ;;  %v4107_v7 = vadd.f32 %v4106_v52, %v4105_v44  ;;  %v9682_v0 = vmul.f32 -1.442695, %v10859_v29 }
 0x34d   : > { %10858 = vst [vmem:[#allocation60_spill] sm:$0xff] %v9679_v46  ;;  %v6661_v60 = vpop.eup %6660  ;;  %6678 = vrcp.f32 %v2702_v25  ;;  %v4113_v47 = vadd.f32 %v4112_v30, %v4111_v61  ;;  %v9685_v21 = vadd.f32 %v1384_v2, %v9490_v48  ;;  %v9689_v4 = vmul.f32 -1.442695, %v9372_v40 }
 0x34e   : > { %v6663_v59 = vpop.eup %6662  ;;  %v3651_v9 = vmul.f32 %v6661_v60, %v10836_v58  ;;  %6680 = vrcp.f32 %v2484_v27  ;;  %v4152_v44 = vmul.f32 0.00390625, %v4107_v7  ;;  %v3423_v33 = vmul.f32 %v6645_v22, %v10830_v35  ;;  %v5893_v60 = vld [vmem:[#allocation9 + $0x100] sm:$0xff]   ;;  %v1388_v7 = vpop.f32.mrb[140].mxu0  ;;  %v5894_v35 = vld [vmem:[#allocation9 + $0x148] sm:$0xff]  }
 0x34f   : > { %10860 = vst [vmem:[#allocation74_spill] sm:$0xff] %v9685_v21  ;;  %v6665_v41 = vpop.eup %6664  ;;  %v3433_v53 = vmul.f32 %v6663_v59, %v10837_v54  ;;  %6682 = vpow2.f32 %v5281_v6  ;;  %v4153_v52 = vmul.f32 0.00390625, %v4113_v47  ;;  %v1245_v21 = vpop.f32.mrb[112].mxu1  ;;  %v9698_v6 = vadd.f32 %v1388_v7, %v9462_v24 }
 0x350   : > { %v6667_v18 = vpop.eup %6666  ;;  %v3893_v61 = vadd.f32 %v3892_v20, %v3651_v9  ;;  %v3652_v2 = vmul.f32 %v6665_v41, %v10839_v14  ;;  %6684 = vpow2.f32 %v5508_v57  ;;  %v4162_v25 = vpack.c.bf16 %v4152_v44, %v4152_v44  ;;  %v1247_v14 = vpop.f32.mrb[113].mxu1  ;;  %v10861_v9 = vld [vmem:[#allocation17_spill] sm:$0xff]  ;;  %v10862_v41 = vld [vmem:[#allocation18_spill] sm:$0xff] }
 0x351   : > { %v3933_v30 = vadd.f32 %v3433_v53, %v3423_v33  ;;  %v2711_v58 = vadd.f32 1.0, %v6667_v18  ;;  %6686 = vpow2.f32 %v5290_v17  ;;  %v4163_v27 = vpack.c.bf16 %v4153_v52, %v4153_v52  ;;  %v1390_v22 = vpop.f32.mrb[141].mxu0  ;;  %v10863_v18 = vld [vmem:[#allocation28_spill] sm:$0xff] }
 0x352   : > { %v6669_v46 = vpop.eup %6668  ;;  %v3924_v11 = vadd.f32 %v3923_v12, %v3652_v2  ;;  %6688 = vpow2.f32 %v5509_v5  ;;  %v9695_v54 = vadd.f32 %v1245_v21, %v10737_v32  ;;  %v9701_v17 = vadd.f32 %v1247_v14, %v10740_v15  ;;  %v1249_v12 = vpop.f32.mrb[114].mxu1 }
 0x353   : > { %v6671_v57 = vpop.eup %6670  ;;  %6690 = vrcp.f32 %v2711_v58  ;;  %v2493_v20 = vadd.f32 1.0, %v6669_v46  ;;  %4883 = vmatprep.mubr.bf16.mxu1 %v4163_v27  ;;  %v9704_v47 = vadd.f32 %v1390_v22, %v9490_v48  ;;  %v1392_v5 = vpop.f32.mrb[142].mxu0  ;;  %v5519_v44 = vmul.f32 -1.442695, %v10861_v9  ;;  %v5895_v58 = vld [vmem:[#allocation9 + $0x108] sm:$0xff]   ;;  %v5896_v22 = vld [vmem:[#allocation9 + $0x150] sm:$0xff]  }
 0x354   : > { %v6673_v59 = vpop.eup %6672  ;;  %v2712_v21 = vadd.f32 1.0, %v6671_v57  ;;  %6692 = vpow2.f32 %v5291_v51  ;;  %v5301_v33 = vmul.f32 -1.442695, %v10862_v41  ;;  %4884 = vmatmul.mubr.bf16.vlgmr.msra.gmra.mrb[140].mxu1 %v4162_v25  ;;  %v3424_v46 = vmul.f32 %v6659_v56, %v10835_v55  ;;  %v1251_v27 = vpop.f32.mrb[115].mxu1 }
 0x355   : > { %v6675_v53 = vpop.eup %6674  ;;  %v3434_v52 = vmul.f32 %v6673_v59, %v10842_v31  ;;  %6694 = vrcp.f32 %v2493_v20  ;;  %v5528_v2 = vmul.f32 -1.442695, %v10863_v18  ;;  %5693 = vmatpush3.bf16.msra.mxu1 %v5893_v60  ;;  %v1394_v7 = vpop.f32.mrb[143].mxu0  ;;  %v9713_v25 = vadd.f32 %v1249_v12, %v10737_v32 }
 0x356   : > { %v6677_v14 = vpop.eup %6676  ;;  %v3661_v51 = vmul.f32 %v6675_v53, %v9289_v26  ;;  %6696 = vrcp.f32 %v2712_v21  ;;  %5694 = vmatprep.subr.bf16.mxu1 %v5894_v35  ;;  %v9716_v55 = vadd.f32 %v1392_v5, %v9462_v24  ;;  %v9721_v60 = vadd.f32 %v1251_v27, %v10740_v15  ;;  %v5897_v21 = vld [vmem:[#allocation9 + $0x110] sm:$0xff]   ;;  %v5898_v27 = vld [vmem:[#allocation9 + $0x158] sm:$0xff]  }
 0x357   : > { %v6679_v31 = vpop.eup %6678  ;;  %v3964_v56 = vadd.f32 %v3434_v52, %v3424_v46  ;;  %v3443_v57 = vmul.f32 %v6677_v14, %v9293_v19  ;;  %6698 = vpow2.f32 %v9682_v0  ;;  %v10864_v0 = vld [vmem:[#allocation42_spill] sm:$0xff] }
 0x358   : > { %v6681_v20 = vpop.eup %6680  ;;  %v3894_v26 = vadd.f32 %v3893_v61, %v3661_v51  ;;  %v3662_v35 = vmul.f32 %v6679_v31, %v9299_v3  ;;  %6700 = vpow2.f32 %v9689_v4  ;;  %v5310_v52 = vmul.f32 -1.442695, %v10864_v0 }
 0x359   : > { %v6683_v12 = vpop.eup %6682  ;;  %v3934_v59 = vadd.f32 %v3933_v30, %v3443_v57  ;;  %v3444_v5 = vmul.f32 %v6681_v20, %v10845_v38  ;;  %6702 = vpow2.f32 %v5519_v44  ;;  %5695 = vmatpush3.bf16.msra.mxu1 %v5895_v58  ;;  %v9730_v4 = vadd.f32 %v1394_v7, %v9490_v48  ;;  %v1255_v38 = vpop.f32.mrb[116].mxu1 }
 0x35a   : > { %v6685_v53 = vpop.eup %6684  ;;  %v3925_v19 = vadd.f32 %v3924_v11, %v3662_v35  ;;  %v2494_v46 = vadd.f32 1.0, %v6683_v12  ;;  %6704 = vpow2.f32 %v5301_v33  ;;  %5696 = vmatprep.subr.bf16.mxu1 %v5896_v22  ;;  %v1398_v30 = vpop.f32.mrb[144].mxu0  ;;  %v9733_v11 = vadd.f32 %v1255_v38, %v10737_v32  ;;  %v10868_v35 = vld [vmem:[#allocation55_spill] sm:$0xff] }
 0x35b   : > { %v6687_v61 = vpop.eup %6686  ;;  %v9727_v14 = vadd.f32 %v3964_v56, %v3444_v5  ;;  %v2721_v3 = vadd.f32 1.0, %v6685_v53  ;;  %6706 = vpow2.f32 %v5528_v2  ;;  %v9736_v33 = vadd.f32 %v1398_v30, %v9462_v24  ;;  %v1257_v51 = vpop.f32.mrb[117].mxu1  ;;  %v5899_v2 = vld [vmem:[#allocation9 + $0x118] sm:$0xff]   ;;  %v5900_v5 = vld [vmem:[#allocation9 + $0x160] sm:$0xff]  }
 0x35c   : > { %v6689_v44 = vpop.eup %6688  ;;  %6708 = vrcp.f32 %v2494_v46  ;;  %v2503_v58 = vadd.f32 1.0, %v6687_v61  ;;  %10865 = vst [vmem:[#allocation61_spill] sm:$0xff] %v9733_v11  ;;  %v9739_v7 = vadd.f32 %v1257_v51, %v10740_v15  ;;  %v1400_v56 = vpop.f32.mrb[145].mxu0  ;;  %v5529_v12 = vmul.f32 -1.442695, %v10868_v35 }
 0x35d   : > { %10866 = vst [vmem:[#allocation24_spill] sm:$0xff] %v9736_v33  ;;  %v6691_v22 = vpop.eup %6690  ;;  %6710 = vrcp.f32 %v2721_v3  ;;  %v2722_v31 = vadd.f32 1.0, %v6689_v44  ;;  %5697 = vmatpush3.bf16.msra.mxu1 %v5897_v21  ;;  %v5311_v61 = vmul.f32 -1.442695, %v9411_v39  ;;  %v9745_v21 = vadd.f32 %v1400_v56, %v9490_v48 }
 0x35e   : > { %10867 = vst [vmem:[#allocation49_spill] sm:$0xff] %v9739_v7  ;;  %v6693_v57 = vpop.eup %6692  ;;  %v3671_v20 = vmul.f32 %v6691_v22, %v10846_v43  ;;  %6712 = vrcp.f32 %v2503_v58  ;;  %5698 = vmatprep.subr.bf16.mxu1 %v5898_v27  ;;  %v5901_v27 = vld [vmem:[#allocation9 + $0x120] sm:$0xff]   ;;  %v1259_v58 = vpop.f32.mrb[118].mxu1 }
 0x35f   : > { %v6695_v53 = vpop.eup %6694  ;;  %6714 = vrcp.f32 %v2722_v31  ;;  %v2504_v46 = vadd.f32 1.0, %v6693_v57  ;;  %10869 = vst [vmem:[#allocation34_spill] sm:$0xff] %v9745_v21  ;;  %v5902_v57 = vld [vmem:[#allocation9 + $0x168] sm:$0xff]   ;;  %v9750_v56 = vadd.f32 %v1259_v58, %v10737_v32 }
 0x360   : > { %v6697_v3 = vpop.eup %6696  ;;  %v3895_v38 = vadd.f32 %v3894_v26, %v3671_v20  ;;  %v3453_v30 = vmul.f32 %v6695_v53, %v10849_v1  ;;  %6716 = vpow2.f32 %v5310_v52 }
 0x361   : > { %v6699_v44 = vpop.eup %6698  ;;  %v3672_v43 = vmul.f32 %v6697_v3, %v9329_v28  ;;  %6718 = vrcp.f32 %v2504_v46  ;;  %5699 = vmatpush3.bf16.msra.mxu1 %v5899_v2  ;;  %10870 = vst [vmem:[#allocation25_spill] sm:$0xff] %v9750_v56  ;;  %v5538_v46 = vmul.f32 -1.442695, %v9423_v37  ;;  %v5320_v3 = vmul.f32 -1.442695, %v9427_v36 }
 0x362   : > { %v6701_v51 = vpop.eup %6700  ;;  %v3935_v22 = vadd.f32 %v3934_v59, %v3453_v30  ;;  %v2731_v31 = vadd.f32 1.0, %v6699_v44  ;;  %6720 = vpow2.f32 %v5529_v12  ;;  %5700 = vmatprep.subr.bf16.mxu1 %v5900_v5  ;;  %v5903_v59 = vld [vmem:[#allocation9 + $0x128] sm:$0xff]   ;;  %v5904_v30 = vld [vmem:[#allocation9 + $0x170] sm:$0xff]  }
 0x363   : > { %v6703_v26 = vpop.eup %6702  ;;  %v3926_v20 = vadd.f32 %v3925_v19, %v3672_v43  ;;  %v2513_v1 = vadd.f32 1.0, %v6701_v51  ;;  %6722 = vpow2.f32 %v5311_v61  ;;  %v1402_v19 = vpop.f32.mrb[146].mxu0  ;;  %v5539_v43 = vmul.f32 -1.442695, %v9432_v42 }
 0x364   : > { %v6705_v52 = vpop.eup %6704  ;;  %6724 = vrcp.f32 %v2731_v31  ;;  %v2732_v28 = vadd.f32 1.0, %v6703_v26  ;;  %v9757_v58 = vadd.f32 %v1402_v19, %v9462_v24  ;;  %v5321_v31 = vmul.f32 -1.442695, %v9437_v10  ;;  %v1261_v26 = vpop.f32.mrb[119].mxu1 }
 0x365   : > { %v6707_v53 = vpop.eup %6706  ;;  %6726 = vrcp.f32 %v2513_v1  ;;  %v2514_v2 = vadd.f32 1.0, %v6705_v52  ;;  %5701 = vmatpush3.bf16.msra.mxu1 %v5901_v27  ;;  %v1404_v1 = vpop.f32.mrb[147].mxu0 }
 0x366   : > { %v6709_v12 = vpop.eup %6708  ;;  %6728 = vrcp.f32 %v2732_v28  ;;  %v2741_v5 = vadd.f32 1.0, %v6707_v53  ;;  %5702 = vmatprep.subr.bf16.mxu1 %v5902_v57  ;;  %10871 = vst [vmem:[#allocation36_spill] sm:$0xff] %v9757_v58  ;;  %v5905_v53 = vld [vmem:[#allocation9 + $0x130] sm:$0xff]  }
 0x367   : > { %v6711_v44 = vpop.eup %6710  ;;  %v3454_v61 = vmul.f32 %v6709_v12, %v9335_v13  ;;  %6730 = vrcp.f32 %v2514_v2  ;;  %v5548_v13 = vmul.f32 -1.442695, %v9442_v63 }
 0x368   : > { %v6713_v51 = vpop.eup %6712  ;;  %v3681_v27 = vmul.f32 %v6711_v44, %v10852_v23  ;;  %6732 = vrcp.f32 %v2741_v5  ;;  %v5906_v23 = vld [vmem:[#allocation9 + $0x178] sm:$0xff]   ;;  %v9766_v5 = vadd.f32 %v1261_v26, %v10740_v15 }
 0x369   : > { %v6715_v57 = vpop.eup %6714  ;;  %v3966_v52 = vadd.f32 %v9727_v14, %v3454_v61  ;;  %v3463_v28 = vmul.f32 %v6713_v51, %v10853_v8  ;;  %6734 = vpow2.f32 %v5538_v46  ;;  %5703 = vmatpush3.bf16.msra.mxu1 %v5903_v59  ;;  %v9769_v8 = vadd.f32 %v1404_v1, %v9490_v48  ;;  %v10874_v51 = vld [vmem:[#allocation57_spill] sm:$0xff] }
 0x36a   : > { %v6717_v2 = vpop.eup %6716  ;;  %v3896_v12 = vadd.f32 %v3895_v38, %v3681_v27  ;;  %v3682_v19 = vmul.f32 %v6715_v57, %v10856_v49  ;;  %6736 = vpow2.f32 %v5320_v3  ;;  %5704 = vmatprep.subr.bf16.mxu1 %v5904_v30  ;;  %10872 = vst [vmem:[#allocation54_spill] sm:$0xff] %v9766_v5  ;;  %v5330_v49 = vmul.f32 -1.442695, %v9448_v45  ;;  %v10875_v57 = vld [vmem:[#allocation46_spill] sm:$0xff] }
 0x36b   : > { %v6719_v44 = vpop.eup %6718  ;;  %v3936_v58 = vadd.f32 %v3935_v22, %v3463_v28  ;;  %v2523_v14 = vadd.f32 1.0, %v6717_v2  ;;  %6738 = vpow2.f32 %v5539_v43  ;;  %10873 = vst [vmem:[#allocation71_spill] sm:$0xff] %v9769_v8  ;;  %v5549_v30 = vmul.f32 -1.442695, %v9454_v16  ;;  %v5907_v22 = vld [vmem:[#allocation9 + $0x138] sm:$0xff]   ;;  %v10922_v8 = vld [vmem:[#allocation72_spill] sm:$0xff] }
 0x36c   : > { %v6721_v46 = vpop.eup %6720  ;;  %v3927_v59 = vadd.f32 %v3926_v20, %v3682_v19  ;;  %v3464_v61 = vmul.f32 %v6719_v44, %v10857_v50  ;;  %6740 = vpow2.f32 %v5321_v31  ;;  %v5331_v27 = vmul.f32 -1.442695, %v10874_v51  ;;  %v1265_v50 = vpop.f32.mrb[120].mxu1 }
 0x36d   : > { %v6723_v38 = vpop.eup %6722  ;;  %6742 = vrcp.f32 %v2523_v14  ;;  %v2742_v3 = vadd.f32 1.0, %v6721_v46  ;;  %5705 = vmatpush3.bf16.msra.mxu1 %v5905_v53  ;;  %v5558_v20 = vmul.f32 -1.442695, %v10875_v57  ;;  %v1408_v31 = vpop.f32.mrb[148].mxu0  ;;  %v9778_v19 = vadd.f32 %v1265_v50, %v10737_v32  ;;  %v10880_v50 = vld [vmem:[#allocation58_spill] sm:$0xff] }
 0x36e   : > { %v6725_v43 = vpop.eup %6724  ;;  %v3967_v26 = vadd.f32 %v3966_v52, %v3464_v61  ;;  %v2524_v1 = vadd.f32 1.0, %v6723_v38  ;;  %6744 = vpow2.f32 %v5548_v13  ;;  %5706 = vmatprep.subr.bf16.mxu1 %v5906_v23  ;;  %v9781_v44 = vadd.f32 %v1408_v31, %v9462_v24  ;;  %v1267_v53 = vpop.f32.mrb[121].mxu1 }
 0x36f   : > { %v6727_v28 = vpop.eup %6726  ;;  %v3691_v2 = vmul.f32 %v6725_v43, %v10859_v29  ;;  %6746 = vrcp.f32 %v2742_v3  ;;  %10876 = vst [vmem:[#allocation53_spill] sm:$0xff] %v9778_v19  ;;  %v1410_v14 = vpop.f32.mrb[149].mxu0  ;;  %v9785_v23 = vadd.f32 %v1267_v53, %v10740_v15  ;;  %v5340_v31 = vmul.f32 -1.442695, %v10880_v50 }
 0x370   : > { %10877 = vst [vmem:[#allocation27_spill] sm:$0xff] %v9781_v44  ;;  %v6729_v52 = vpop.eup %6728  ;;  %v3473_v13 = vmul.f32 %v6727_v28, %v9372_v40  ;;  %6748 = vrcp.f32 %v2524_v1  ;;  %v9788_v46 = vadd.f32 %v1410_v14, %v9490_v48  ;;  %v1269_v29 = vpop.f32.mrb[122].mxu1  ;;  %v5302_v5 = vmul.f32 -1.442695, %v10922_v8 }
 0x371   : > { %10878 = vst [vmem:[#allocation41_spill] sm:$0xff] %v9785_v23  ;;  %v1412_v61 = vpop.f32.mrb[150].mxu0  ;;  %v6731_v38 = vpop.eup %6730  ;;  %v3897_v3 = vadd.f32 %v3896_v12, %v3691_v2  ;;  %v3692_v43 = vmul.f32 %v6729_v52, %v10861_v9  ;;  %6750 = vpow2.f32 %v5330_v49  ;;  %5707 = vmatpush3.bf16.msra.mxu1 %v5907_v22  ;;  %v10881_v9 = vld [vmem:[#allocation45_spill] sm:$0xff] }
 0x372   : > { %10879 = vst [vmem:[#allocation17_spill] sm:$0xff] %v9788_v46  ;;  %v6733_v44 = vpop.eup %6732  ;;  %v3937_v19 = vadd.f32 %v3936_v58, %v3473_v13  ;;  %v3474_v40 = vmul.f32 %v6731_v38, %v10862_v41  ;;  %6752 = vpow2.f32 %v5549_v30  ;;  %v1271_v1 = vpop.f32.mrb[123].mxu1  ;;  %v5559_v49 = vmul.f32 -1.442695, %v10881_v9  ;;  %v5908_v41 = vld [vmem:[#allocation9 + $0x240] sm:$0xff]  }
 0x373   : > { %v1414_v28 = vpop.f32.mrb[151].mxu0  ;;  %v6735_v53 = vpop.eup %6734  ;;  %v3928_v14 = vadd.f32 %v3927_v59, %v3692_v43  ;;  %v3701_v46 = vmul.f32 %v6733_v44, %v10863_v18  ;;  %6754 = vpow2.f32 %v5331_v27  ;;  %v5909_v30 = vld [vmem:[#allocation9 + $0x200] sm:$0xff]   ;;  %v9798_v13 = vadd.f32 %v1269_v29, %v10737_v32  ;;  %5736 = vmatprep.subr.bf16.mxu0 %v5908_v41 }
 0x374   : > { %v6737_v23 = vpop.eup %6736  ;;  %v3968_v12 = vadd.f32 %v3967_v26, %v3474_v40  ;;  %v2751_v2 = vadd.f32 1.0, %v6735_v53  ;;  %6756 = vpow2.f32 %v5558_v20  ;;  %v9801_v27 = vadd.f32 %v1412_v61, %v9462_v24  ;;  %v10886_v38 = vld [vmem:[#allocation43_spill] sm:$0xff]  ;;  %5737 = vmatpush3.bf16.msra.mxu0 %v5909_v30  ;;  %v1418_v30 = vpop.f32.mrb[152].mxu0 }
 0x375   : > { %v6739_v52 = vpop.eup %6738  ;;  %v9795_v22 = vadd.f32 %v3897_v3, %v3701_v46  ;;  %v2533_v58 = vadd.f32 1.0, %v6737_v23  ;;  %6758 = vpow2.f32 %v5340_v31  ;;  %10882 = vst [vmem:[#allocation18_spill] sm:$0xff] %v9798_v13  ;;  %v9804_v26 = vadd.f32 %v1271_v1, %v10740_v15  ;;  %v10887_v31 = vld [vmem:[#allocation48_spill] sm:$0xff] }
 0x376   : > { %v6741_v59 = vpop.eup %6740  ;;  %6760 = vrcp.f32 %v2751_v2  ;;  %v2752_v18 = vadd.f32 1.0, %v6739_v52  ;;  %10883 = vst [vmem:[#allocation28_spill] sm:$0xff] %v9801_v27  ;;  %v9807_v23 = vadd.f32 %v1414_v28, %v9490_v48  ;;  %v5341_v3 = vmul.f32 -1.442695, %v10886_v38  ;;  %v5911_v27 = vld [vmem:[#allocation9 + $0x208] sm:$0xff]  }
 0x377   : > { %10884 = vst [vmem:[#allocation42_spill] sm:$0xff] %v9804_v26  ;;  %v6743_v20 = vpop.eup %6742  ;;  %6762 = vrcp.f32 %v2533_v58  ;;  %v2534_v44 = vadd.f32 1.0, %v6741_v59  ;;  %v5350_v40 = vmul.f32 -1.442695, %v10887_v31  ;;  %v1275_v59 = vpop.f32.mrb[124].mxu1  ;;  %v5910_v26 = vld [vmem:[#allocation9 + $0x248] sm:$0xff]  }
 0x378   : > { %10885 = vst [vmem:[#allocation55_spill] sm:$0xff] %v9807_v23  ;;  %v6745_v46 = vpop.eup %6744  ;;  %v3483_v29 = vmul.f32 %v6743_v20, %v10864_v0  ;;  %6764 = vrcp.f32 %v2752_v18  ;;  %5738 = vmatprep.subr.bf16.mxu0 %v5910_v26 }
 0x379   : > { %v6747_v43 = vpop.eup %6746  ;;  %6766 = vrcp.f32 %v2534_v44  ;;  %v2761_v61 = vadd.f32 1.0, %v6745_v46  ;;  %v9815_v46 = vadd.f32 %v1275_v59, %v10737_v32  ;;  %5739 = vmatpush3.bf16.msra.mxu0 %v5911_v27 }
 0x37a   : > { %v6749_v1 = vpop.eup %6748  ;;  %v3938_v53 = vadd.f32 %v3937_v19, %v3483_v29  ;;  %v3702_v2 = vmul.f32 %v6747_v43, %v10868_v35  ;;  %6768 = vpow2.f32 %v5559_v49  ;;  %v9818_v49 = vadd.f32 %v1418_v30, %v9462_v24 }
 0x37b   : > { %v6751_v52 = vpop.eup %6750  ;;  %v3484_v28 = vmul.f32 %v6749_v1, %v9411_v39  ;;  %6770 = vrcp.f32 %v2761_v61  ;;  %10888 = vst [vmem:[#allocation57_spill] sm:$0xff] %v9815_v46  ;;  %v5252_v29 = vmul.f32 -1.442695, %v9495_v62  ;;  %v10890_v1 = vld [vmem:[#allocation35_spill] sm:$0xff] }
 0x37c   : > { %v6753_v58 = vpop.eup %6752  ;;  %v3929_v0 = vadd.f32 %v3928_v14, %v3702_v2  ;;  %v2543_v41 = vadd.f32 1.0, %v6751_v52  ;;  %6772 = vpow2.f32 %v5341_v3  ;;  %10889 = vst [vmem:[#allocation46_spill] sm:$0xff] %v9818_v49  ;;  %v5253_v2 = vmul.f32 -1.442695, %v10890_v1  ;;  %v10891_v52 = vld [vmem:[#allocation59_spill] sm:$0xff] }
 0x37d   : > { %v6755_v18 = vpop.eup %6754  ;;  %v3969_v20 = vadd.f32 %v3968_v12, %v3484_v28  ;;  %v2762_v44 = vadd.f32 1.0, %v6753_v58  ;;  %6774 = vpow2.f32 %v5350_v40  ;;  %v5351_v12 = vmul.f32 -1.442695, %v9498_v34  ;;  %v1277_v58 = vpop.f32.mrb[125].mxu1 }
 0x37e   : > { %v6757_v19 = vpop.eup %6756  ;;  %6776 = vrcp.f32 %v2543_v41  ;;  %v2544_v35 = vadd.f32 1.0, %v6755_v18  ;;  %v5360_v28 = vmul.f32 -1.442695, %v10891_v52  ;;  %v1420_v41 = vpop.f32.mrb[153].mxu0  ;;  %v9827_v18 = vadd.f32 %v1277_v58, %v10740_v15 }
 0x37f   : > { %v6759_v39 = vpop.eup %6758  ;;  %6778 = vrcp.f32 %v2762_v44  ;;  %v2771_v14 = vadd.f32 1.0, %v6757_v19  ;;  %v9830_v44 = vadd.f32 %v1420_v41, %v9490_v48  ;;  %v10895_v41 = vld [vmem:[#allocation22_spill] sm:$0xff] }
 0x380   : > { %v6761_v3 = vpop.eup %6760  ;;  %6780 = vrcp.f32 %v2544_v35  ;;  %v2553_v43 = vadd.f32 1.0, %v6759_v39  ;;  %10892 = vst [vmem:[#allocation58_spill] sm:$0xff] %v9827_v18  ;;  %v1279_v39 = vpop.f32.mrb[126].mxu1 }
 0x381   : > { %v6763_v61 = vpop.eup %6762  ;;  %v3711_v40 = vmul.f32 %v6761_v3, %v9423_v37  ;;  %6782 = vrcp.f32 %v2771_v14  ;;  %10893 = vst [vmem:[#allocation45_spill] sm:$0xff] %v9830_v44  ;;  %v1422_v14 = vpop.f32.mrb[154].mxu0  ;;  %v5361_v44 = vmul.f32 -1.442695, %v10895_v41 }
 0x382   : > { %v6765_v59 = vpop.eup %6764  ;;  %v3493_v30 = vmul.f32 %v6763_v61, %v9427_v36  ;;  %6784 = vrcp.f32 %v2553_v43  ;;  %v10894_v36 = vld [vmem:[#allocation20_spill] sm:$0xff] }
 0x383   : > { %v6767_v19 = vpop.eup %6766  ;;  %v3899_v37 = vadd.f32 %v9795_v22, %v3711_v40  ;;  %v3712_v35 = vmul.f32 %v6765_v59, %v9432_v42  ;;  %6786 = vpow2.f32 %v5252_v29  ;;  %v5262_v43 = vmul.f32 -1.442695, %v10894_v36  ;;  %v1424_v40 = vpop.f32.mrb[155].mxu0 }
 0x384   : > { %v6769_v3 = vpop.eup %6768  ;;  %v3939_v49 = vadd.f32 %v3938_v53, %v3493_v30  ;;  %v3494_v46 = vmul.f32 %v6767_v19, %v9437_v10  ;;  %6788 = vpow2.f32 %v5351_v12  ;;  %v9839_v29 = vadd.f32 %v1279_v39, %v10737_v32  ;;  %v1281_v53 = vpop.f32.mrb[127].mxu1 }
 0x385   : > { %v6771_v61 = vpop.eup %6770  ;;  %v3930_v58 = vadd.f32 %v3929_v0, %v3712_v35  ;;  %v2772_v18 = vadd.f32 1.0, %v6769_v3  ;;  %6790 = vpow2.f32 %v5253_v2  ;;  %v9842_v59 = vadd.f32 %v1422_v14, %v9462_v24  ;;  %v10900_v35 = vld [vmem:[#allocation62_spill] sm:$0xff]  ;;  %v10901_v14 = vld [vmem:[#allocation67_spill] sm:$0xff] }
 0x386   : > { %v6773_v23 = vpop.eup %6772  ;;  %v3970_v22 = vadd.f32 %v3969_v20, %v3494_v46  ;;  %v3721_v42 = vmul.f32 %v6771_v61, %v9442_v63  ;;  %6792 = vpow2.f32 %v5360_v28  ;;  %10896 = vst [vmem:[#allocation43_spill] sm:$0xff] %v9839_v29  ;;  %v9845_v0 = vadd.f32 %v1281_v53, %v10740_v15  ;;  %v10899_v63 = vld [vmem:[#allocation23_spill] sm:$0xff]  ;;  %v10903_v53 = vld [vmem:[#allocation38_spill] sm:$0xff] }
 0x387   : > { %v6775_v10 = vpop.eup %6774  ;;  %6794 = vrcp.f32 %v2772_v18  ;;  %v2554_v12 = vadd.f32 1.0, %v6773_v23  ;;  %10897 = vst [vmem:[#allocation48_spill] sm:$0xff] %v9842_v59  ;;  %v5263_v46 = vmul.f32 -1.442695, %v10899_v63  ;;  %v5370_v39 = vmul.f32 -1.442695, %v10900_v35 }
 0x388   : > { %10898 = vst [vmem:[#allocation35_spill] sm:$0xff] %v9845_v0  ;;  %v6777_v2 = vpop.eup %6776  ;;  %v3900_v30 = vadd.f32 %v3899_v37, %v3721_v42  ;;  %v2563_v20 = vadd.f32 1.0, %v6775_v10  ;;  %6796 = vpow2.f32 %v5262_v43  ;;  %v5272_v3 = vmul.f32 -1.442695, %v10901_v14 }
 0x389   : > { %v6779_v28 = vpop.eup %6778  ;;  %v3503_v19 = vmul.f32 %v6777_v2, %v9448_v45  ;;  %6798 = vrcp.f32 %v2554_v12  ;;  %v9853_v61 = vadd.f32 %v1424_v40, %v9490_v48  ;;  %v5371_v10 = vmul.f32 -1.442695, %v10903_v53  ;;  %v1428_v40 = vpop.f32.mrb[156].mxu0 }
 0x38a   : > { %v6781_v18 = vpop.eup %6780  ;;  %v3722_v23 = vmul.f32 %v6779_v28, %v9454_v16  ;;  %6800 = vrcp.f32 %v2563_v20  ;;  %v1285_v28 = vpop.f32.mrb[128].mxu1 }
 0x38b   : > { %10902 = vst [vmem:[#allocation59_spill] sm:$0xff] %v9853_v61  ;;  %v6783_v37 = vpop.eup %6782  ;;  %v3940_v42 = vadd.f32 %v3939_v49, %v3503_v19  ;;  %v3504_v43 = vmul.f32 %v6781_v18, %v10874_v51  ;;  %6802 = vpow2.f32 %v5361_v44  ;;  %v9860_v51 = vadd.f32 %v1285_v28, %v10737_v32  ;;  %v1287_v44 = vpop.f32.mrb[129].mxu1 }
 0x38c   : > { %v6785_v45 = vpop.eup %6784  ;;  %v3931_v12 = vadd.f32 %v3930_v58, %v3722_v23  ;;  %v3731_v2 = vmul.f32 %v6783_v37, %v10875_v57  ;;  %6804 = vpow2.f32 %v5263_v46  ;;  %v1430_v19 = vpop.f32.mrb[157].mxu0 }
 0x38d   : > { %v6787_v0 = vpop.eup %6786  ;;  %v3971_v16 = vadd.f32 %v3970_v22, %v3504_v43  ;;  %v3513_v20 = vmul.f32 %v6785_v45, %v10880_v50  ;;  %6806 = vpow2.f32 %v5370_v39  ;;  %10904 = vst [vmem:[#allocation20_spill] sm:$0xff] %v9860_v51  ;;  %v9863_v22 = vadd.f32 %v1428_v40, %v9462_v24  ;;  %v1289_v50 = vpop.f32.mrb[130].mxu1  ;;  %v10907_v43 = vld [vmem:[#allocation63_spill] sm:$0xff] }
 0x38e   : > { %v6789_v61 = vpop.eup %6788  ;;  %v3901_v59 = vadd.f32 %v3900_v30, %v3731_v2  ;;  %v2465_v49 = vadd.f32 1.0, %v6787_v0  ;;  %6808 = vpow2.f32 %v5272_v3  ;;  %v10906_v30 = vld [vmem:[#allocation39_spill] sm:$0xff]  ;;  %v5380_v45 = vmul.f32 -1.442695, %v10907_v43 }
 0x38f   : > { %v6791_v58 = vpop.eup %6790  ;;  %v3941_v18 = vadd.f32 %v3940_v42, %v3513_v20  ;;  %v2564_v57 = vadd.f32 1.0, %v6789_v61  ;;  %6810 = vpow2.f32 %v5371_v10  ;;  %10905 = vst [vmem:[#allocation22_spill] sm:$0xff] %v9863_v22  ;;  %v5273_v0 = vmul.f32 -1.442695, %v10906_v30  ;;  %v1432_v61 = vpop.f32.mrb[158].mxu0 }
 0x390   : > { %v6793_v46 = vpop.eup %6792  ;;  %v4114_v39 = vrot.slane %v3901_v59, 4  ;;  %6812 = vrcp.f32 %v2465_v49  ;;  %v2466_v23 = vadd.f32 1.0, %v6791_v58  ;;  %v9868_v2 = vadd.f32 %v1287_v44, %v10740_v15  ;;  %v10910_v58 = vld [vmem:[#allocation16_spill] sm:$0xff] }
 0x391   : > { %v6795_v3 = vpop.eup %6794  ;;  %6814 = vrcp.f32 %v2564_v57  ;;  %v2573_v37 = vadd.f32 1.0, %v6793_v46  ;;  %v9872_v28 = vadd.f32 %v1430_v19, %v9490_v48  ;;  %v5282_v57 = vmul.f32 -1.442695, %v10910_v58  ;;  %v10912_v19 = vld [vmem:[#allocation40_spill] sm:$0xff] }
 0x392   : > { %10908 = vst [vmem:[#allocation23_spill] sm:$0xff] %v9868_v2  ;;  %v6797_v42 = vpop.eup %6796  ;;  %v4115_v10 = vadd.f32 %v4114_v39, %v3901_v59  ;;  %v3732_v20 = vmul.f32 %v6795_v3, %v10881_v9  ;;  %6816 = vrcp.f32 %v2466_v23  ;;  %v9876_v46 = vadd.f32 %v1289_v50, %v10737_v32  ;;  %v10913_v23 = vld [vmem:[#allocation70_spill] sm:$0xff] }
 0x393   : > { %10909 = vst [vmem:[#allocation62_spill] sm:$0xff] %v9872_v28  ;;  %v6799_v40 = vpop.eup %6798  ;;  %6818 = vrcp.f32 %v2573_v37  ;;  %v2475_v49 = vadd.f32 1.0, %v6797_v42  ;;  %v5381_v39 = vmul.f32 -1.442695, %v10912_v19  ;;  %v5283_v3 = vmul.f32 -1.442695, %v10913_v23 }
 0x394   : > { %10911 = vst [vmem:[#allocation67_spill] sm:$0xff] %v9876_v46  ;;  %v6801_v22 = vpop.eup %6800  ;;  %v4116_v44 = vrot.slane %v4115_v10, 2  ;;  %v3932_v2 = vadd.f32 %v3931_v12, %v3732_v20  ;;  %v3514_v51 = vmul.f32 %v6799_v40, %v10886_v38  ;;  %6820 = vpow2.f32 %v5273_v0  ;;  %v1291_v37 = vpop.f32.mrb[131].mxu1 }
 0x395   : > { %v6803_v59 = vpop.eup %6802  ;;  %v3523_v9 = vmul.f32 %v6801_v22, %v10887_v31  ;;  %6822 = vrcp.f32 %v2475_v49  ;;  %v9883_v0 = vadd.f32 %v1432_v61, %v9462_v24  ;;  %v1295_v7 = vpop.f32.mrb[132].mxu1 }
 0x396   : > { %v6805_v42 = vpop.eup %6804  ;;  %v4117_v28 = vadd.f32 %v4116_v44, %v4115_v10  ;;  %v4120_v29 = vrot.slane %v3932_v2, 4  ;;  %v3972_v50 = vadd.f32 %v3971_v16, %v3514_v51  ;;  %v2574_v46 = vadd.f32 1.0, %v6803_v59  ;;  %v10915_v16 = vld [vmem:[#allocation21_spill] sm:$0xff]  ;;  %v10917_v59 = vld [vmem:[#allocation44_spill] sm:$0xff] }
 0x397   : > { %v6807_v12 = vpop.eup %6806  ;;  %v3942_v20 = vadd.f32 %v3941_v18, %v3523_v9  ;;  %v2476_v38 = vadd.f32 1.0, %v6805_v42  ;;  %6824 = vpow2.f32 %v5380_v45  ;;  %10914 = vst [vmem:[#allocation38_spill] sm:$0xff] %v9883_v0  ;;  %v5390_v51 = vmul.f32 -1.442695, %v10915_v16 }
 0x398   : > { %v6809_v31 = vpop.eup %6808  ;;  %v4121_v22 = vadd.f32 %v4120_v29, %v3932_v2  ;;  %6826 = vrcp.f32 %v2574_v46  ;;  %v2583_v40 = vadd.f32 1.0, %v6807_v12  ;;  %v4118_v49 = vrot.slane %v4117_v28, 1  ;;  %v1434_v29 = vpop.f32.mrb[159].mxu0  ;;  %v10918_v46 = vld [vmem:[#allocation33_spill] sm:$0xff] }
 0x399   : > { %v6811_v13 = vpop.eup %6810  ;;  %6828 = vrcp.f32 %v2476_v38  ;;  %v2485_v10 = vadd.f32 1.0, %v6809_v31  ;;  %v9887_v44 = vadd.f32 %v1291_v37, %v10740_v15  ;;  %v5292_v9 = vmul.f32 -1.442695, %v10917_v59  ;;  %v10920_v37 = vld [vmem:[#allocation64_spill] sm:$0xff]  ;;  %v1438_v33 = vpop.f32.mrb[160].mxu0 }
 0x39a   : > { %v6813_v18 = vpop.eup %6812  ;;  %v4122_v45 = vrot.slane %v4121_v22, 2  ;;  %6830 = vrcp.f32 %v2583_v40  ;;  %v2584_v61 = vadd.f32 1.0, %v6811_v13  ;;  %v5391_v26 = vmul.f32 -1.442695, %v10918_v46  ;;  %v10921_v13 = vld [vmem:[#allocation65_spill] sm:$0xff] }
 0x39b   : > { %10916 = vst [vmem:[#allocation39_spill] sm:$0xff] %v9887_v44  ;;  %v6815_v2 = vpop.eup %6814  ;;  %6832 = vrcp.f32 %v2485_v10  ;;  %v4119_v42 = vadd.f32 %v4118_v49, %v4117_v28  ;;  %v9892_v12 = vadd.f32 %v1434_v29, %v9490_v48  ;;  %v5293_v31 = vmul.f32 -1.442695, %v10920_v37  ;;  %v10923_v10 = vld [vmem:[#allocation66_spill] sm:$0xff] }
 0x39c   : > { %v6817_v38 = vpop.eup %6816  ;;  %v3524_v27 = vmul.f32 %v6815_v2, %v9498_v34  ;;  %6834 = vrcp.f32 %v2584_v61  ;;  %v4123_v44 = vadd.f32 %v4122_v45, %v4121_v22  ;;  %v5400_v0 = vmul.f32 -1.442695, %v10921_v13 }
 0x39d   : > { %10919 = vst [vmem:[#allocation63_spill] sm:$0xff] %v9892_v12  ;;  %v6819_v40 = vpop.eup %6818  ;;  %6836 = vpow2.f32 %v5282_v57  ;;  %v5401_v56 = vmul.f32 -1.442695, %v10923_v10  ;;  %v3425_v34 = vmul.f32 %v6813_v18, %v9495_v62  ;;  %v4154_v22 = vmul.f32 0.00390625, %v4119_v42  ;;  %v1297_v62 = vpop.f32.mrb[133].mxu1 }
 0x39e   : > { %v6821_v21 = vpop.eup %6820  ;;  %v3973_v28 = vadd.f32 %v3972_v50, %v3524_v27  ;;  %v3533_v49 = vmul.f32 %v6819_v40, %v10891_v52  ;;  %6838 = vpow2.f32 %v5381_v39  ;;  %v4124_v29 = vrot.slane %v4123_v44, 1  ;;  %v10924_v50 = vld [vmem:[#allocation31_spill] sm:$0xff] }
 0x39f   : > { %v6823_v12 = vpop.eup %6822  ;;  %v2486_v61 = vadd.f32 1.0, %v6821_v21  ;;  %6840 = vpow2.f32 %v5283_v3  ;;  %v5303_v27 = vmul.f32 -1.442695, %v10924_v50  ;;  %v9904_v52 = vadd.f32 %v1295_v7, %v10737_v32  ;;  %v1440_v21 = vpop.f32.mrb[161].mxu0 }
 0x3a0   : > { %v3943_v45 = vadd.f32 %v3942_v20, %v3533_v49  ;;  %v3435_v57 = vmul.f32 %v6823_v12, %v10894_v36  ;;  %6842 = vpow2.f32 %v5390_v51  ;;  %v4125_v2 = vadd.f32 %v4124_v29, %v4123_v44  ;;  %v1299_v51 = vpop.f32.mrb[134].mxu1  ;;  %v1442_v44 = vpop.f32.mrb[162].mxu0 }
 0x3a1   : > { %v6825_v11 = vpop.eup %6824  ;;  %6844 = vrcp.f32 %v2486_v61  ;;  %v9907_v39 = vadd.f32 %v1438_v33, %v9462_v24  ;;  %v3426_v12 = vmul.f32 %v6817_v38, %v10890_v1  ;;  %v4164_v7 = vpack.c.bf16 %v4154_v22, %v4154_v22 }
 0x3a2   : > { %v6827_v3 = vpop.eup %6826  ;;  %v3995_v20 = vadd.f32 %v3435_v57, %v3425_v34  ;;  %v2593_v18 = vadd.f32 1.0, %v6825_v11  ;;  %6846 = vpow2.f32 %v5292_v9  ;;  %v4155_v36 = vmul.f32 0.00390625, %v4125_v2  ;;  %v1301_v11 = vpop.f32.mrb[135].mxu1 }
 0x3a3   : > { %v6829_v42 = vpop.eup %6828  ;;  %v3534_v40 = vmul.f32 %v6827_v3, %v10895_v41  ;;  %6848 = vpow2.f32 %v5391_v26  ;;  %v9913_v61 = vadd.f32 %v1297_v62, %v10740_v15  ;;  %v1444_v9 = vpop.f32.mrb[163].mxu0  ;;  %v9917_v1 = vadd.f32 %v1440_v21, %v9490_v48 }
 0x3a4   : > { %v6831_v49 = vpop.eup %6830  ;;  %v3436_v33 = vmul.f32 %v6829_v42, %v10899_v63  ;;  %6850 = vrcp.f32 %v2593_v18  ;;  %v4165_v29 = vpack.c.bf16 %v4155_v36, %v4155_v36 }
 0x3a5   : > { %v6833_v34 = vpop.eup %6832  ;;  %v3974_v57 = vadd.f32 %v3973_v28, %v3534_v40  ;;  %v3543_v2 = vmul.f32 %v6831_v49, %v10900_v35  ;;  %6852 = vpow2.f32 %v5293_v31  ;;  %v9924_v31 = vadd.f32 %v1299_v51, %v10737_v32 }
 0x3a6   : > { %v6835_v41 = vpop.eup %6834  ;;  %v4026_v26 = vadd.f32 %v3436_v33, %v3426_v12  ;;  %v3445_v38 = vmul.f32 %v6833_v34, %v10901_v14  ;;  %6854 = vpow2.f32 %v5400_v0  ;;  %4923 = vmatprep.mubr.bf16.mxu1 %v4165_v29  ;;  %v9929_v0 = vadd.f32 %v1442_v44, %v9462_v24  ;;  %v10926_v33 = vld [vmem:[#allocation32_spill] sm:$0xff] }
 0x3a7   : > { %v6837_v63 = vpop.eup %6836  ;;  %v3944_v22 = vadd.f32 %v3943_v45, %v3543_v2  ;;  %v3544_v62 = vmul.f32 %v6835_v41, %v10903_v53  ;;  %6856 = vpow2.f32 %v5302_v5  ;;  %4924 = vmatmul.mubr.bf16.vlgmr.msra.gmra.mrb[144].mxu1 %v4164_v7  ;;  %v10925_v53 = vld [vmem:[#allocation47_spill] sm:$0xff]  ;;  %v9936_v51 = vadd.f32 %v1444_v9, %v9490_v48 }
 0x3a8   : > { %v6839_v3 = vpop.eup %6838  ;;  %v9921_v28 = vadd.f32 %v3995_v20, %v3445_v38  ;;  %v2495_v35 = vadd.f32 1.0, %v6837_v63  ;;  %6858 = vpow2.f32 %v5401_v56  ;;  %v5410_v36 = vmul.f32 -1.442695, %v10925_v53  ;;  %v1448_v56 = vpop.f32.mrb[164].mxu0 }
 0x3a9   : > { %v6841_v21 = vpop.eup %6840  ;;  %v9926_v18 = vadd.f32 %v3974_v57, %v3544_v62  ;;  %v2594_v14 = vadd.f32 1.0, %v6839_v3  ;;  %6860 = vpow2.f32 %v5303_v27  ;;  %v9933_v20 = vadd.f32 %v1301_v11, %v10740_v15  ;;  %v1450_v12 = vpop.f32.mrb[165].mxu0 }
 0x3aa   : > { %v6843_v45 = vpop.eup %6842  ;;  %6862 = vrcp.f32 %v2495_v35  ;;  %v2496_v5 = vadd.f32 1.0, %v6841_v21  ;;  %v9940_v40 = vadd.f32 %v1448_v56, %v9462_v24  ;;  %v1452_v7 = vpop.f32.mrb[166].mxu0  ;;  %v5312_v29 = vmul.f32 -1.442695, %v10926_v33 }
 0x3ab   : > { %v6845_v42 = vpop.eup %6844  ;;  %6864 = vrcp.f32 %v2594_v14  ;;  %v2603_v32 = vadd.f32 1.0, %v6843_v45  ;;  %v9944_v11 = vadd.f32 %v1450_v12, %v9490_v48  ;;  %v9948_v41 = vadd.f32 %v1452_v7, %v9462_v24  ;;  %v1454_v38 = vpop.f32.mrb[167].mxu0  ;;  %v10930_v12 = vld [vmem:[#allocation37_spill] sm:$0xff] }
 0x3ac   : > { %v6847_v27 = vpop.eup %6846  ;;  %v3446_v44 = vmul.f32 %v6845_v42, %v10906_v30  ;;  %6866 = vrcp.f32 %v2496_v5  ;;  %v9951_v3 = vadd.f32 %v1454_v38, %v9490_v48 }
 0x3ad   : > { %v6849_v49 = vpop.eup %6848  ;;  %6868 = vrcp.f32 %v2603_v32  ;;  %v2505_v15 = vadd.f32 1.0, %v6847_v27  ;;  %10927 = vst [vmem:[#allocation16_spill] sm:$0xff] %v9948_v41  ;;  %v5313_v27 = vmul.f32 -1.442695, %v10930_v12 }
 0x3ae   : > { %v6851_v34 = vpop.eup %6850  ;;  %v4027_v9 = vadd.f32 %v4026_v26, %v3446_v44  ;;  %v2604_v57 = vadd.f32 1.0, %v6849_v49  ;;  %6870 = vpow2.f32 %v5410_v36  ;;  %10928 = vst [vmem:[#allocation40_spill] sm:$0xff] %v9951_v3  ;;  %v10929_v36 = vld [vmem:[#allocation26_spill] sm:$0xff] }
 0x3af   : > { %v6853_v2 = vpop.eup %6852  ;;  %v3553_v30 = vmul.f32 %v6851_v34, %v10907_v43  ;;  %6872 = vrcp.f32 %v2505_v15  ;;  %v5411_v56 = vmul.f32 -1.442695, %v10929_v36  ;;  %v10932_v34 = vld [vmem:[#allocation68_spill] sm:$0xff] }
 0x3b0   : > { %v6855_v63 = vpop.eup %6854  ;;  %6874 = vrcp.f32 %v2604_v57  ;;  %v2506_v62 = vadd.f32 1.0, %v6853_v2  ;;  %v5322_v57 = vmul.f32 -1.442695, %v10932_v34 }
 0x3b1   : > { %v6857_v35 = vpop.eup %6856  ;;  %v3945_v21 = vadd.f32 %v3944_v22, %v3553_v30  ;;  %v2613_v14 = vadd.f32 1.0, %v6855_v63  ;;  %6876 = vpow2.f32 %v5312_v29  ;;  %v10931_v22 = vld [vmem:[#allocation56_spill] sm:$0xff]  ;;  %v10933_v63 = vld [vmem:[#allocation73_spill] sm:$0xff] }
 0x3b2   : > { %v6859_v26 = vpop.eup %6858  ;;  %6878 = vrcp.f32 %v2506_v62  ;;  %v2515_v45 = vadd.f32 1.0, %v6857_v35  ;;  %v5420_v49 = vmul.f32 -1.442695, %v10931_v22  ;;  %v5421_v62 = vmul.f32 -1.442695, %v10933_v63 }
 0x3b3   : > { %v6861_v5 = vpop.eup %6860  ;;  %6880 = vrcp.f32 %v2613_v14  ;;  %v2614_v43 = vadd.f32 1.0, %v6859_v26  ;;  %v10934_v26 = vld [vmem:[#allocation29_spill] sm:$0xff] }
 0x3b4   : > { %v6863_v42 = vpop.eup %6862  ;;  %6882 = vrcp.f32 %v2515_v45  ;;  %v2516_v32 = vadd.f32 1.0, %v6861_v5  ;;  %v5323_v45 = vmul.f32 -1.442695, %v10934_v26 }
 0x3b5   : > { %v6865_v44 = vpop.eup %6864  ;;  %v3455_v7 = vmul.f32 %v6863_v42, %v10910_v58  ;;  %6884 = vrcp.f32 %v2614_v43  ;;  %v10935_v42 = vld [vmem:[#allocation69_spill] sm:$0xff] }
 0x3b6   : > { %v6867_v15 = vpop.eup %6866  ;;  %v3554_v29 = vmul.f32 %v6865_v44, %v10912_v19  ;;  %6886 = vrcp.f32 %v2516_v32  ;;  %v5430_v32 = vmul.f32 -1.442695, %v10935_v42 }
 0x3b7   : > { %v6869_v2 = vpop.eup %6868  ;;  %v3997_v30 = vadd.f32 %v9921_v28, %v3455_v7  ;;  %v3456_v38 = vmul.f32 %v6867_v15, %v10913_v23  ;;  %6888 = vpow2.f32 %v5411_v56  ;;  %v1458_v28 = vpop.f32.mrb[168].mxu0  ;;  %v5912_v7 = vld [vmem:[#allocation9 + $0x250] sm:$0xff]  }
 0x3b8   : > { %v6871_v35 = vpop.eup %6870  ;;  %v3976_v58 = vadd.f32 %v9926_v18, %v3554_v29  ;;  %v3563_v14 = vmul.f32 %v6869_v2, %v10915_v16  ;;  %6890 = vpow2.f32 %v5313_v27  ;;  %v5913_v15 = vld [vmem:[#allocation9 + $0x210] sm:$0xff]   ;;  %v9968_v18 = vadd.f32 %v1458_v28, %v9462_v24  ;;  %v1460_v16 = vpop.f32.mrb[169].mxu0  ;;  %5740 = vmatprep.subr.bf16.mxu0 %v5912_v7  ;;  %v5916_v28 = vld [vmem:[#allocation9 + $0x1c0] sm:$0xff]  }
 0x3b9   : > { %v6873_v19 = vpop.eup %6872  ;;  %v4028_v5 = vadd.f32 %v4027_v9, %v3456_v38  ;;  %v2623_v43 = vadd.f32 1.0, %v6871_v35  ;;  %6892 = vpow2.f32 %v5420_v49  ;;  %v10937_v9 = vld [vmem:[#allocation19_spill] sm:$0xff]  ;;  %v9973_v2 = vadd.f32 %v1460_v16, %v9490_v48  ;;  %v1462_v38 = vpop.f32.mrb[170].mxu0  ;;  %5741 = vmatpush3.bf16.msra.mxu0 %v5913_v15  ;;  %5714 = vmatprep.subr.bf16.mxu1 %v5916_v28 }
 0x3ba   : > { %v6875_v44 = vpop.eup %6874  ;;  %v3946_v23 = vadd.f32 %v3945_v21, %v3563_v14  ;;  %v3465_v56 = vmul.f32 %v6873_v19, %v10917_v59  ;;  %6894 = vpow2.f32 %v5322_v57  ;;  %10936 = vst [vmem:[#allocation70_spill] sm:$0xff] %v9968_v18  ;;  %v5332_v49 = vmul.f32 -1.442695, %v10937_v9  ;;  %v10939_v57 = vld [vmem:[#allocation50_spill] sm:$0xff]  ;;  %v1464_v19 = vpop.f32.mrb[171].mxu0  ;;  %v5917_v16 = vld [vmem:[#allocation9 + $0x180] sm:$0xff]  }
 0x3bb   : > { %v6877_v27 = vpop.eup %6876  ;;  %v3564_v29 = vmul.f32 %v6875_v44, %v10918_v46  ;;  %6896 = vrcp.f32 %v2623_v43  ;;  %10938 = vst [vmem:[#allocation21_spill] sm:$0xff] %v9973_v2  ;;  %v5431_v14 = vmul.f32 -1.442695, %v10939_v57  ;;  %v10940_v43 = vld [vmem:[#allocation51_spill] sm:$0xff]  ;;  %5715 = vmatpush3.bf16.msra.mxu1 %v5917_v16 }
 0x3bc   : > { %v6879_v21 = vpop.eup %6878  ;;  %v3998_v35 = vadd.f32 %v3997_v30, %v3465_v56  ;;  %v2525_v59 = vadd.f32 1.0, %v6877_v27  ;;  %6898 = vpow2.f32 %v5421_v62  ;;  %v5333_v44 = vmul.f32 -1.442695, %v10940_v43 }
 0x3bd   : > { %v6881_v18 = vpop.eup %6880  ;;  %v3977_v3 = vadd.f32 %v3976_v58, %v3564_v29  ;;  %v3466_v46 = vmul.f32 %v6879_v21, %v10920_v37  ;;  %6900 = vpow2.f32 %v5323_v45  ;;  %v9980_v30 = vadd.f32 %v1462_v38, %v9462_v24  ;;  %v10941_v45 = vld [vmem:[#allocation52_spill] sm:$0xff] }
 0x3be   : > { %v6883_v2 = vpop.eup %6882  ;;  %v3573_v41 = vmul.f32 %v6881_v18, %v10921_v13  ;;  %6902 = vrcp.f32 %v2525_v59  ;;  %v9983_v62 = vadd.f32 %v1464_v19, %v9490_v48  ;;  %v5440_v7 = vmul.f32 -1.442695, %v10941_v45  ;;  %v5918_v18 = vld [vmem:[#allocation9 + $0x1c8] sm:$0xff]   ;;  %v1468_v59 = vpop.f32.mrb[172].mxu0 }
 0x3bf   : > { %v6885_v56 = vpop.eup %6884  ;;  %v4029_v58 = vadd.f32 %v4028_v5, %v3466_v46  ;;  %v3475_v37 = vmul.f32 %v6883_v2, %v10922_v8  ;;  %6904 = vpow2.f32 %v5430_v32  ;;  %v5919_v19 = vld [vmem:[#allocation9 + $0x188] sm:$0xff]   ;;  %v9992_v32 = vadd.f32 %v1468_v59, %v9462_v24  ;;  %5716 = vmatprep.subr.bf16.mxu1 %v5918_v18 }
 0x3c0   : > { %v6887_v15 = vpop.eup %6886  ;;  %v3947_v27 = vadd.f32 %v3946_v23, %v3573_v41  ;;  %v3574_v13 = vmul.f32 %v6885_v56, %v10923_v10  ;;  %6906 = vpow2.f32 %v5332_v49  ;;  %v1470_v41 = vpop.f32.mrb[173].mxu0  ;;  %5717 = vmatpush3.bf16.msra.mxu1 %v5919_v19  ;;  %v5921_v56 = vld [vmem:[#allocation9 + $0x1d0] sm:$0xff]   ;;  %v10943_v59 = vld [vmem:[#allocation60_spill] sm:$0xff] }
 0x3c1   : > { %v6889_v29 = vpop.eup %6888  ;;  %v3999_v38 = vadd.f32 %v3998_v35, %v3475_v37  ;;  %v3476_v21 = vmul.f32 %v6887_v15, %v10924_v50  ;;  %6908 = vpow2.f32 %v5431_v14  ;;  %v9997_v50 = vadd.f32 %v1470_v41, %v9490_v48  ;;  %v1472_v2 = vpop.f32.mrb[174].mxu0  ;;  %v10942_v14 = vld [vmem:[#allocation30_spill] sm:$0xff]  ;;  %5718 = vmatprep.subr.bf16.mxu1 %v5921_v56 }
 0x3c2   : > { %v6891_v5 = vpop.eup %6890  ;;  %v9989_v28 = vadd.f32 %v3977_v3, %v3574_v13  ;;  %v2624_v8 = vadd.f32 1.0, %v6889_v29  ;;  %6910 = vpow2.f32 %v5333_v44  ;;  %v5342_v46 = vmul.f32 -1.442695, %v10942_v14  ;;  %v1474_v16 = vpop.f32.mrb[175].mxu0  ;;  %v5923_v15 = vld [vmem:[#allocation9 + $0x190] sm:$0xff]  }
 0x3c3   : > { %v6893_v10 = vpop.eup %6892  ;;  %v9994_v23 = vadd.f32 %v4029_v58, %v3476_v21  ;;  %v2526_v49 = vadd.f32 1.0, %v6891_v5  ;;  %6912 = vpow2.f32 %v5440_v7  ;;  %v10001_v44 = vadd.f32 %v1472_v2, %v9462_v24 }
 0x3c4   : > { %v6895_v35 = vpop.eup %6894  ;;  %6914 = vrcp.f32 %v2624_v8  ;;  %v2633_v3 = vadd.f32 1.0, %v6893_v10  ;;  %v10004_v7 = vadd.f32 %v1474_v16, %v9490_v48  ;;  %v5441_v19 = vmul.f32 -1.442695, %v10943_v59  ;;  %5719 = vmatpush3.bf16.msra.mxu1 %v5923_v15  ;;  %v5924_v10 = vld [vmem:[#allocation9 + $0x1d8] sm:$0xff]  }
 0x3c5   : > { %v6897_v37 = vpop.eup %6896  ;;  %6916 = vrcp.f32 %v2526_v49  ;;  %v2535_v58 = vadd.f32 1.0, %v6895_v35  ;;  %v1478_v35 = vpop.f32.mrb[176].mxu0  ;;  %v5925_v16 = vld [vmem:[#allocation9 + $0x198] sm:$0xff]   ;;  %5720 = vmatprep.subr.bf16.mxu1 %v5924_v10 }
 0x3c6   : > { %v6899_v13 = vpop.eup %6898  ;;  %v3583_v18 = vmul.f32 %v6897_v37, %v10925_v53  ;;  %6918 = vrcp.f32 %v2633_v3  ;;  %v10010_v56 = vadd.f32 %v1478_v35, %v9462_v24  ;;  %v1480_v37 = vpop.f32.mrb[177].mxu0  ;;  %v10946_v10 = vld [vmem:[#allocation74_spill] sm:$0xff] }
 0x3c7   : > { %v6901_v29 = vpop.eup %6900  ;;  %6920 = vrcp.f32 %v2535_v58  ;;  %v2634_v21 = vadd.f32 1.0, %v6899_v13  ;;  %v1482_v13 = vpop.f32.mrb[178].mxu0 }
 0x3c8   : > { %v6903_v5 = vpop.eup %6902  ;;  %v3948_v8 = vadd.f32 %v3947_v27, %v3583_v18  ;;  %v2536_v41 = vadd.f32 1.0, %v6901_v29  ;;  %6922 = vpow2.f32 %v5342_v46  ;;  %v10013_v46 = vadd.f32 %v1480_v37, %v9490_v48  ;;  %5721 = vmatpush3.bf16.msra.mxu1 %v5925_v16 }
 0x3c9   : > { %v6905_v49 = vpop.eup %6904  ;;  %v3485_v2 = vmul.f32 %v6903_v5, %v10926_v33  ;;  %6924 = vrcp.f32 %v2634_v21  ;;  %v10016_v29 = vadd.f32 %v1482_v13, %v9462_v24  ;;  %v1484_v21 = vpop.f32.mrb[179].mxu0  ;;  %v5450_v16 = vmul.f32 -1.442695, %v9695_v54 }
 0x3ca   : > { %v6907_v53 = vpop.eup %6906  ;;  %6926 = vrcp.f32 %v2536_v41  ;;  %v2643_v3 = vadd.f32 1.0, %v6905_v49  ;;  %10944 = vst [vmem:[#allocation44_spill] sm:$0xff] %v10013_v46  ;;  %v5343_v49 = vmul.f32 -1.442695, %v10946_v10 }
 0x3cb   : > { %v6909_v58 = vpop.eup %6908  ;;  %v4000_v15 = vadd.f32 %v3999_v38, %v3485_v2  ;;  %v2545_v27 = vadd.f32 1.0, %v6907_v53  ;;  %6928 = vpow2.f32 %v5441_v19  ;;  %10945 = vst [vmem:[#allocation33_spill] sm:$0xff] %v10016_v29  ;;  %v10020_v38 = vadd.f32 %v1484_v21, %v9490_v48  ;;  %v5926_v19 = vld [vmem:[#allocation9 + $0x1e0] sm:$0xff]  }
 0x3cc   : > { %v6911_v33 = vpop.eup %6910  ;;  %6930 = vrcp.f32 %v2643_v3  ;;  %v2644_v18 = vadd.f32 1.0, %v6909_v58  ;;  %v5927_v53 = vld [vmem:[#allocation9 + $0x1a0] sm:$0xff]   ;;  %v5352_v58 = vmul.f32 -1.442695, %v9698_v6  ;;  %5722 = vmatprep.subr.bf16.mxu1 %v5926_v19 }
 0x3cd   : > { %v6913_v5 = vpop.eup %6912  ;;  %6932 = vrcp.f32 %v2545_v27  ;;  %v2546_v41 = vadd.f32 1.0, %v6911_v33  ;;  %10947 = vst [vmem:[#allocation64_spill] sm:$0xff] %v10020_v38  ;;  %v5451_v33 = vmul.f32 -1.442695, %v9701_v17  ;;  %5723 = vmatpush3.bf16.msra.mxu1 %v5927_v53  ;;  %v5353_v38 = vmul.f32 -1.442695, %v9704_v47 }
 0x3ce   : > { %v6915_v2 = vpop.eup %6914  ;;  %6934 = vrcp.f32 %v2644_v18  ;;  %v2653_v35 = vadd.f32 1.0, %v6913_v5 }
 0x3cf   : > { %v6917_v3 = vpop.eup %6916  ;;  %v3584_v37 = vmul.f32 %v6915_v2, %v10929_v36  ;;  %6936 = vrcp.f32 %v2546_v41  ;;  %v5928_v36 = vld [vmem:[#allocation9 + $0x1e8] sm:$0xff]  }
 0x3d0   : > { %v6919_v27 = vpop.eup %6918  ;;  %v3486_v13 = vmul.f32 %v6917_v3, %v10930_v12  ;;  %6938 = vrcp.f32 %v2653_v35  ;;  %v5460_v12 = vmul.f32 -1.442695, %v9713_v25  ;;  %v1488_v35 = vpop.f32.mrb[180].mxu0  ;;  %v5929_v3 = vld [vmem:[#allocation9 + $0x1a8] sm:$0xff]   ;;  %5724 = vmatprep.subr.bf16.mxu1 %v5928_v36 }
 0x3d1   : > { %v6921_v21 = vpop.eup %6920  ;;  %v3979_v18 = vadd.f32 %v9989_v28, %v3584_v37  ;;  %v3593_v5 = vmul.f32 %v6919_v27, %v10931_v22  ;;  %6940 = vpow2.f32 %v5343_v49  ;;  %v5914_v28 = vld [vmem:[#allocation9 + $0x258] sm:$0xff]   ;;  %v10034_v49 = vadd.f32 %v1488_v35, %v9462_v24  ;;  %v1490_v37 = vpop.f32.mrb[181].mxu0  ;;  %5725 = vmatpush3.bf16.msra.mxu1 %v5929_v3  ;;  %v5933_v35 = vld [vmem:[#allocation9 + $0x1b0] sm:$0xff]  }
 0x3d2   : > { %v6923_v41 = vpop.eup %6922  ;;  %v4031_v2 = vadd.f32 %v9994_v23, %v3486_v13  ;;  %v3495_v19 = vmul.f32 %v6921_v21, %v10932_v34  ;;  %6942 = vpow2.f32 %v5450_v16  ;;  %v5915_v22 = vld [vmem:[#allocation9 + $0x218] sm:$0xff]   ;;  %v10038_v16 = vadd.f32 %v1490_v37, %v9490_v48  ;;  %v1492_v13 = vpop.f32.mrb[182].mxu0  ;;  %5742 = vmatprep.subr.bf16.mxu0 %v5914_v28  ;;  %v10948_v37 = vld [vmem:[#allocation61_spill] sm:$0xff] }
 0x3d3   : > { %v6925_v53 = vpop.eup %6924  ;;  %v3949_v29 = vadd.f32 %v3948_v8, %v3593_v5  ;;  %v2555_v46 = vadd.f32 1.0, %v6923_v41  ;;  %6944 = vpow2.f32 %v5352_v58  ;;  %v5362_v21 = vmul.f32 -1.442695, %v9716_v55  ;;  %v1494_v36 = vpop.f32.mrb[183].mxu0  ;;  %5743 = vmatpush3.bf16.msra.mxu0 %v5915_v22 }
 0x3d4   : > { %v6927_v27 = vpop.eup %6926  ;;  %v4001_v23 = vadd.f32 %v4000_v15, %v3495_v19  ;;  %v3594_v34 = vmul.f32 %v6925_v53, %v10933_v63  ;;  %6946 = vpow2.f32 %v5451_v33  ;;  %v10043_v5 = vadd.f32 %v1492_v13, %v9462_v24  ;;  %v5931_v15 = vld [vmem:[#allocation9 + $0x1f0] sm:$0xff]  }
 0x3d5   : > { %v6929_v8 = vpop.eup %6928  ;;  %v3496_v58 = vmul.f32 %v6927_v27, %v10934_v26  ;;  %6948 = vrcp.f32 %v2555_v46  ;;  %v5461_v19 = vmul.f32 -1.442695, %v9721_v60  ;;  %v5363_v46 = vmul.f32 -1.442695, %v9730_v4  ;;  %5726 = vmatprep.subr.bf16.mxu1 %v5931_v15 }
 0x3d6   : > { %v6931_v41 = vpop.eup %6930  ;;  %v3980_v63 = vadd.f32 %v3979_v18, %v3594_v34  ;;  %v2654_v33 = vadd.f32 1.0, %v6929_v8  ;;  %6950 = vpow2.f32 %v5353_v38  ;;  %v5470_v18 = vmul.f32 -1.442695, %v10948_v37  ;;  %5727 = vmatpush3.bf16.msra.mxu1 %v5933_v35  ;;  %v5934_v34 = vld [vmem:[#allocation9 + $0x1f8] sm:$0xff]  }
 0x3d7   : > { %v6933_v3 = vpop.eup %6932  ;;  %v4032_v53 = vadd.f32 %v4031_v2, %v3496_v58  ;;  %v3603_v26 = vmul.f32 %v6931_v41, %v10935_v42  ;;  %6952 = vpow2.f32 %v5460_v12  ;;  %v10051_v38 = vadd.f32 %v1494_v36, %v9490_v48  ;;  %v10949_v42 = vld [vmem:[#allocation24_spill] sm:$0xff]  ;;  %5728 = vmatprep.subr.bf16.mxu1 %v5934_v34 }
 0x3d8   : > { %v6935_v24 = vpop.eup %6934  ;;  %v3505_v28 = vmul.f32 %v6933_v3, %v10937_v9  ;;  %6954 = vrcp.f32 %v2654_v33  ;;  %v5372_v12 = vmul.f32 -1.442695, %v10949_v42  ;;  %v5935_v9 = vld [vmem:[#allocation9 + $0x1b8] sm:$0xff]   ;;  %v10950_v3 = vld [vmem:[#allocation49_spill] sm:$0xff] }
 0x3d9   : > { %v6937_v22 = vpop.eup %6936  ;;  %v3950_v27 = vadd.f32 %v3949_v29, %v3603_v26  ;;  %v3604_v2 = vmul.f32 %v6935_v24, %v10939_v57  ;;  %6956 = vpow2.f32 %v5362_v21 }
 0x3da   : > { %v6939_v13 = vpop.eup %6938  ;;  %v4002_v8 = vadd.f32 %v4001_v23, %v3505_v28  ;;  %v3506_v58 = vmul.f32 %v6937_v22, %v10940_v43  ;;  %6958 = vpow2.f32 %v5461_v19  ;;  %5729 = vmatpush3.bf16.msra.mxu1 %v5935_v9  ;;  %v5920_v43 = vld [vmem:[#allocation9 + $0x260] sm:$0xff]   ;;  %v10951_v22 = vld [vmem:[#allocation34_spill] sm:$0xff] }
 0x3db   : > { %v6941_v15 = vpop.eup %6940  ;;  %v3981_v41 = vadd.f32 %v3980_v63, %v3604_v2  ;;  %v3613_v48 = vmul.f32 %v6939_v13, %v10941_v45  ;;  %6960 = vpow2.f32 %v5363_v46  ;;  %v5922_v19 = vld [vmem:[#allocation9 + $0x220] sm:$0xff]   ;;  %v5471_v45 = vmul.f32 -1.442695, %v10950_v3  ;;  %5744 = vmatprep.subr.bf16.mxu0 %v5920_v43  ;;  %v5664_v13 = vpop.f32.mrb[136].mxu1 }
 0x3dc   : > { %v6943_v36 = vpop.eup %6942  ;;  %v10057_v29 = vadd.f32 %v4032_v53, %v3506_v58  ;;  %v2556_v57 = vadd.f32 1.0, %v6941_v15  ;;  %6962 = vpow2.f32 %v5470_v18  ;;  %5745 = vmatpush3.bf16.msra.mxu0 %v5922_v19  ;;  %v5665_v15 = vpop.f32.mrb[137].mxu1 }
 0x3dd   : > { %v6945_v21 = vpop.eup %6944  ;;  %v10059_v33 = vadd.f32 %v3950_v27, %v3613_v48  ;;  %v2663_v23 = vadd.f32 1.0, %v6943_v36  ;;  %6964 = vpow2.f32 %v5372_v12  ;;  %v5373_v27 = vmul.f32 -1.442695, %v10951_v22 }
 0x3de   : > { %v6947_v35 = vpop.eup %6946  ;;  %6966 = vrcp.f32 %v2556_v57  ;;  %v2565_v63 = vadd.f32 1.0, %v6945_v21  ;;  %v10065_v36 = vadd.f32 %v5665_v15, %v5664_v13  ;;  %v5667_v57 = vpop.f32.mrb[138].mxu1 }
 0x3df   : > { %v6949_v26 = vpop.eup %6948  ;;  %6968 = vrcp.f32 %v2663_v23  ;;  %v2664_v46 = vadd.f32 1.0, %v6947_v35  ;;  %v5668_v19 = vpop.f32.mrb[139].mxu1 }
 0x3e0   : > { %v6951_v53 = vpop.eup %6950  ;;  %v3515_v24 = vmul.f32 %v6949_v26, %v10942_v14  ;;  %6970 = vrcp.f32 %v2565_v63 }
 0x3e1   : > { %v6953_v28 = vpop.eup %6952  ;;  %6972 = vrcp.f32 %v2664_v46  ;;  %v2566_v18 = vadd.f32 1.0, %v6951_v53 }
 0x3e2   : > { %v6955_v2 = vpop.eup %6954  ;;  %v4003_v12 = vadd.f32 %v4002_v8, %v3515_v24  ;;  %v2673_v34 = vadd.f32 1.0, %v6953_v28  ;;  %6974 = vpow2.f32 %v5471_v45  ;;  %v10953_v24 = vld [vmem:[#allocation36_spill] sm:$0xff] }
 0x3e3   : > { %v6957_v58 = vpop.eup %6956  ;;  %v3614_v9 = vmul.f32 %v6955_v2, %v10943_v59  ;;  %6976 = vrcp.f32 %v2566_v18  ;;  %v10952_v59 = vld [vmem:[#allocation25_spill] sm:$0xff]  ;;  %v5382_v28 = vmul.f32 -1.442695, %v10953_v24 }
 0x3e4   : > { %v6959_v48 = vpop.eup %6958  ;;  %6978 = vrcp.f32 %v2673_v34  ;;  %v2575_v14 = vadd.f32 1.0, %v6957_v58  ;;  %v5480_v26 = vmul.f32 -1.442695, %v10952_v59  ;;  %v10955_v58 = vld [vmem:[#allocation71_spill] sm:$0xff] }
 0x3e5   : > { %v6961_v21 = vpop.eup %6960  ;;  %v3982_v23 = vadd.f32 %v3981_v41, %v3614_v9  ;;  %v2674_v43 = vadd.f32 1.0, %v6959_v48  ;;  %6980 = vpow2.f32 %v5373_v27  ;;  %v10954_v41 = vld [vmem:[#allocation54_spill] sm:$0xff]  ;;  %v5383_v9 = vmul.f32 -1.442695, %v10955_v58 }
 0x3e6   : > { %v6963_v8 = vpop.eup %6962  ;;  %6982 = vrcp.f32 %v2575_v14  ;;  %v2576_v35 = vadd.f32 1.0, %v6961_v21  ;;  %v5481_v27 = vmul.f32 -1.442695, %v10954_v41 }
 0x3e7   : > { %v6965_v63 = vpop.eup %6964  ;;  %6984 = vrcp.f32 %v2674_v43  ;;  %v2683_v45 = vadd.f32 1.0, %v6963_v8  ;;  %v10956_v43 = vld [vmem:[#allocation53_spill] sm:$0xff] }
 0x3e8   : > { %v6967_v46 = vpop.eup %6966  ;;  %6986 = vrcp.f32 %v2576_v35  ;;  %v2585_v53 = vadd.f32 1.0, %v6965_v63  ;;  %v5490_v19 = vmul.f32 -1.442695, %v10956_v43  ;;  %v10957_v63 = vld [vmem:[#allocation27_spill] sm:$0xff] }
 0x3e9   : > { %v6969_v18 = vpop.eup %6968  ;;  %v3516_v2 = vmul.f32 %v6967_v46, %v10946_v10  ;;  %6988 = vrcp.f32 %v2683_v45  ;;  %v5392_v45 = vmul.f32 -1.442695, %v10957_v63 }
 0x3ea   : > { %v6971_v34 = vpop.eup %6970  ;;  %v3623_v13 = vmul.f32 %v6969_v18, %v9695_v54  ;;  %6990 = vrcp.f32 %v2585_v53 }
 0x3eb   : > { %v6973_v15 = vpop.eup %6972  ;;  %v4034_v48 = vadd.f32 %v10057_v29, %v3516_v2  ;;  %v3525_v14 = vmul.f32 %v6971_v34, %v9698_v6  ;;  %6992 = vpow2.f32 %v5480_v26 }
 0x3ec   : > { %v6975_v57 = vpop.eup %6974  ;;  %v3952_v21 = vadd.f32 %v10059_v33, %v3623_v13  ;;  %v3624_v10 = vmul.f32 %v6973_v15, %v9701_v17  ;;  %6994 = vpow2.f32 %v5382_v28  ;;  %v10958_v33 = vld [vmem:[#allocation41_spill] sm:$0xff] }
 0x3ed   : > { %v6977_v8 = vpop.eup %6976  ;;  %v4004_v35 = vadd.f32 %v4003_v12, %v3525_v14  ;;  %v2684_v54 = vadd.f32 1.0, %v6975_v57  ;;  %6996 = vpow2.f32 %v5481_v27  ;;  %v5491_v17 = vmul.f32 -1.442695, %v10958_v33  ;;  %v10959_v12 = vld [vmem:[#allocation17_spill] sm:$0xff] }
 0x3ee   : > { %v6979_v46 = vpop.eup %6978  ;;  %v3983_v53 = vadd.f32 %v3982_v23, %v3624_v10  ;;  %v3526_v29 = vmul.f32 %v6977_v8, %v9704_v47  ;;  %6998 = vpow2.f32 %v5383_v9  ;;  %v5393_v34 = vmul.f32 -1.442695, %v10959_v12  ;;  %v10960_v23 = vld [vmem:[#allocation18_spill] sm:$0xff] }
 0x3ef   : > { %v6981_v6 = vpop.eup %6980  ;;  %v3633_v26 = vmul.f32 %v6979_v46, %v9713_v25  ;;  %7000 = vrcp.f32 %v2684_v54  ;;  %v5500_v47 = vmul.f32 -1.442695, %v10960_v23  ;;  %v10961_v25 = vld [vmem:[#allocation28_spill] sm:$0xff] }
 0x3f0   : > { %v6983_v28 = vpop.eup %6982  ;;  %v4035_v18 = vadd.f32 %v4034_v48, %v3526_v29  ;;  %v2586_v2 = vadd.f32 1.0, %v6981_v6  ;;  %7002 = vpow2.f32 %v5490_v19  ;;  %v5402_v57 = vmul.f32 -1.442695, %v10961_v25  ;;  %v10962_v19 = vld [vmem:[#allocation42_spill] sm:$0xff] }
 0x3f1   : > { %v6985_v27 = vpop.eup %6984  ;;  %v3953_v13 = vadd.f32 %v3952_v21, %v3633_v26  ;;  %v3535_v15 = vmul.f32 %v6983_v28, %v9716_v55  ;;  %7004 = vpow2.f32 %v5392_v45  ;;  %v5501_v54 = vmul.f32 -1.442695, %v10962_v19 }
 0x3f2   : > { %v6987_v9 = vpop.eup %6986  ;;  %v3634_v14 = vmul.f32 %v6985_v27, %v9721_v60  ;;  %7006 = vrcp.f32 %v2586_v2 }
 0x3f3   : > { %v6989_v10 = vpop.eup %6988  ;;  %v4005_v8 = vadd.f32 %v4004_v35, %v3535_v15  ;;  %v3536_v48 = vmul.f32 %v6987_v9, %v9730_v4  ;;  %7008 = vpow2.f32 %v5491_v17 }
 0x3f4   : > { %v6991_v46 = vpop.eup %6990  ;;  %v3984_v21 = vadd.f32 %v3983_v53, %v3634_v14  ;;  %v3643_v55 = vmul.f32 %v6989_v10, %v10948_v37  ;;  %7010 = vpow2.f32 %v5393_v34  ;;  %v10963_v37 = vld [vmem:[#allocation55_spill] sm:$0xff] }
 0x3f5   : > { %v6993_v45 = vpop.eup %6992  ;;  %v4036_v29 = vadd.f32 %v4035_v18, %v3536_v48  ;;  %v3545_v6 = vmul.f32 %v6991_v46, %v10949_v42  ;;  %7012 = vpow2.f32 %v5500_v47  ;;  %v5403_v34 = vmul.f32 -1.442695, %v10963_v37  ;;  %v5930_v42 = vld [vmem:[#allocation9 + $0x268] sm:$0xff]  }
 0x3f6   : > { %v6995_v60 = vpop.eup %6994  ;;  %v10091_v26 = vadd.f32 %v3953_v13, %v3643_v55  ;;  %v2693_v28 = vadd.f32 1.0, %v6993_v45  ;;  %7014 = vpow2.f32 %v5402_v57  ;;  %v5932_v47 = vld [vmem:[#allocation9 + $0x228] sm:$0xff]   ;;  %5746 = vmatprep.subr.bf16.mxu0 %v5930_v42  ;;  %v5936_v45 = vld [vmem:[#allocation9 + $0x270] sm:$0xff]  }
 0x3f7   : > { %v6997_v35 = vpop.eup %6996  ;;  %v10093_v4 = vadd.f32 %v4005_v8, %v3545_v6  ;;  %v2595_v17 = vadd.f32 1.0, %v6995_v60  ;;  %7016 = vpow2.f32 %v5501_v54  ;;  %v10964_v57 = vld [vmem:[#allocation57_spill] sm:$0xff]  ;;  %5747 = vmatpush3.bf16.msra.mxu0 %v5932_v47  ;;  %v10966_v47 = vld [vmem:[#allocation58_spill] sm:$0xff] }
 0x3f8   : > { %v6999_v2 = vpop.eup %6998  ;;  %7018 = vrcp.f32 %v2693_v28  ;;  %v2694_v53 = vadd.f32 1.0, %v6997_v35  ;;  %v5510_v10 = vmul.f32 -1.442695, %v10964_v57  ;;  %v5937_v60 = vld [vmem:[#allocation9 + $0x230] sm:$0xff]   ;;  %5748 = vmatprep.subr.bf16.mxu0 %v5936_v45 }
 0x3f9   : > { %v7001_v27 = vpop.eup %7000  ;;  %7020 = vrcp.f32 %v2595_v17  ;;  %v2596_v18 = vadd.f32 1.0, %v6999_v2  ;;  %v5938_v2 = vld [vmem:[#allocation9 + $0x278] sm:$0xff]  }
 0x3fa   : > { %v7003_v15 = vpop.eup %7002  ;;  %v3644_v13 = vmul.f32 %v7001_v27, %v10950_v3  ;;  %7022 = vrcp.f32 %v2694_v53 }
 0x3fb   : > { %v7005_v9 = vpop.eup %7004  ;;  %7024 = vrcp.f32 %v2596_v18  ;;  %v2703_v14 = vadd.f32 1.0, %v7003_v15  ;;  %5749 = vmatpush3.bf16.msra.mxu0 %v5937_v60  ;;  %v10965_v18 = vld [vmem:[#allocation46_spill] sm:$0xff] }
 0x3fc   : > { %v7007_v8 = vpop.eup %7006  ;;  %v3985_v48 = vadd.f32 %v3984_v21, %v3644_v13  ;;  %v2605_v54 = vadd.f32 1.0, %v7005_v9  ;;  %7026 = vpow2.f32 %v5403_v34  ;;  %v5939_v34 = vld [vmem:[#allocation9 + $0x238] sm:$0xff]   ;;  %v5412_v42 = vmul.f32 -1.442695, %v10965_v18  ;;  %5750 = vmatprep.subr.bf16.mxu0 %v5938_v2  ;;  %v10969_v2 = vld [vmem:[#allocation48_spill] sm:$0xff] }
 0x3fd   : > { %v7009_v46 = vpop.eup %7008  ;;  %v3546_v55 = vmul.f32 %v7007_v8, %v10951_v22  ;;  %7028 = vrcp.f32 %v2703_v14 }
 0x3fe   : > { %v7011_v6 = vpop.eup %7010  ;;  %7030 = vrcp.f32 %v2605_v54  ;;  %v2704_v3 = vadd.f32 1.0, %v7009_v46 }
 0x3ff   : > { %v7013_v28 = vpop.eup %7012  ;;  %v4037_v35 = vadd.f32 %v4036_v29, %v3546_v55  ;;  %v2606_v17 = vadd.f32 1.0, %v7011_v6  ;;  %7032 = vpow2.f32 %v5510_v10  ;;  %v5511_v29 = vmul.f32 -1.442695, %v10966_v47  ;;  %v10967_v10 = vld [vmem:[#allocation45_spill] sm:$0xff]  ;;  %v10968_v55 = vld [vmem:[#allocation43_spill] sm:$0xff]  ;;  %5751 = vmatpush3.bf16.msra.mxu0 %v5939_v34 }
 0x400   : > { %v7015_v53 = vpop.eup %7014  ;;  %7034 = vrcp.f32 %v2704_v3  ;;  %v2713_v21 = vadd.f32 1.0, %v7013_v28  ;;  %v5413_v8 = vmul.f32 -1.442695, %v10967_v10  ;;  %v5520_v45 = vmul.f32 -1.442695, %v10968_v55 }
 0x401   : > { %v7017_v27 = vpop.eup %7016  ;;  %7036 = vrcp.f32 %v2606_v17  ;;  %v2615_v22 = vadd.f32 1.0, %v7015_v53  ;;  %v5422_v53 = vmul.f32 -1.442695, %v10969_v2 }
 0x402   : > { %v7019_v15 = vpop.eup %7018  ;;  %7038 = vrcp.f32 %v2713_v21  ;;  %v2714_v13 = vadd.f32 1.0, %v7017_v27 }
 0x403   : > { %v7021_v9 = vpop.eup %7020  ;;  %v3653_v14 = vmul.f32 %v7019_v15, %v10952_v59  ;;  %7040 = vrcp.f32 %v2615_v22  ;;  %v10970_v22 = vld [vmem:[#allocation35_spill] sm:$0xff] }
 0x404   : > { %v7023_v54 = vpop.eup %7022  ;;  %v3555_v46 = vmul.f32 %v7021_v9, %v10953_v24  ;;  %7042 = vrcp.f32 %v2714_v13  ;;  %v5521_v34 = vmul.f32 -1.442695, %v10970_v22 }
 0x405   : > { %v7025_v6 = vpop.eup %7024  ;;  %v3955_v3 = vadd.f32 %v10091_v26, %v3653_v14  ;;  %v3654_v60 = vmul.f32 %v7023_v54, %v10954_v41  ;;  %7044 = vpow2.f32 %v5412_v42 }
 0x406   : > { %v7027_v28 = vpop.eup %7026  ;;  %v4007_v17 = vadd.f32 %v10093_v4, %v3555_v46  ;;  %v3556_v59 = vmul.f32 %v7025_v6, %v10955_v58  ;;  %7046 = vpow2.f32 %v5511_v29  ;;  %v10971_v4 = vld [vmem:[#allocation59_spill] sm:$0xff] }
 0x407   : > { %v7029_v21 = vpop.eup %7028  ;;  %v3986_v24 = vadd.f32 %v3985_v48, %v3654_v60  ;;  %v2616_v27 = vadd.f32 1.0, %v7027_v28  ;;  %7048 = vpow2.f32 %v5413_v8  ;;  %v5423_v58 = vmul.f32 -1.442695, %v10971_v4  ;;  %v10972_v48 = vld [vmem:[#allocation20_spill] sm:$0xff] }
 0x408   : > { %v7031_v15 = vpop.eup %7030  ;;  %v4038_v13 = vadd.f32 %v4037_v35, %v3556_v59  ;;  %v3663_v26 = vmul.f32 %v7029_v21, %v10956_v43  ;;  %7050 = vpow2.f32 %v5520_v45  ;;  %v5530_v54 = vmul.f32 -1.442695, %v10972_v48  ;;  %v10973_v35 = vld [vmem:[#allocation22_spill] sm:$0xff] }
 0x409   : > { %v7033_v41 = vpop.eup %7032  ;;  %v3565_v42 = vmul.f32 %v7031_v15, %v10957_v63  ;;  %7052 = vrcp.f32 %v2616_v27  ;;  %v5432_v43 = vmul.f32 -1.442695, %v10973_v35  ;;  %v10974_v63 = vld [vmem:[#allocation23_spill] sm:$0xff] }
 0x40a   : > { %v7035_v29 = vpop.eup %7034  ;;  %v3956_v9 = vadd.f32 %v3955_v3, %v3663_v26  ;;  %v2723_v14 = vadd.f32 1.0, %v7033_v41  ;;  %7054 = vpow2.f32 %v5422_v53  ;;  %v5531_v28 = vmul.f32 -1.442695, %v10974_v63  ;;  %v10975_v53 = vld [vmem:[#allocation62_spill] sm:$0xff] }
 0x40b   : > { %v7037_v8 = vpop.eup %7036  ;;  %v4008_v46 = vadd.f32 %v4007_v17, %v3565_v42  ;;  %v3664_v6 = vmul.f32 %v7035_v29, %v10958_v33  ;;  %7056 = vpow2.f32 %v5521_v34  ;;  %v5433_v27 = vmul.f32 -1.442695, %v10975_v53 }
 0x40c   : > { %v7039_v45 = vpop.eup %7038  ;;  %v3566_v60 = vmul.f32 %v7037_v8, %v10959_v12  ;;  %7058 = vrcp.f32 %v2723_v14 }
 0x40d   : > { %v7041_v59 = vpop.eup %7040  ;;  %v3987_v21 = vadd.f32 %v3986_v24, %v3664_v6  ;;  %v3673_v3 = vmul.f32 %v7039_v45, %v10960_v23  ;;  %7060 = vpow2.f32 %v5423_v58  ;;  %v10977_v45 = vld [vmem:[#allocation38_spill] sm:$0xff] }
 0x40e   : > { %v7043_v15 = vpop.eup %7042  ;;  %v4039_v17 = vadd.f32 %v4038_v13, %v3566_v60  ;;  %v3575_v33 = vmul.f32 %v7041_v59, %v10961_v25  ;;  %7062 = vpow2.f32 %v5530_v54  ;;  %v10976_v13 = vld [vmem:[#allocation67_spill] sm:$0xff]  ;;  %v5442_v60 = vmul.f32 -1.442695, %v10977_v45 }
 0x40f   : > { %v7045_v34 = vpop.eup %7044  ;;  %v3957_v26 = vadd.f32 %v3956_v9, %v3673_v3  ;;  %v3674_v41 = vmul.f32 %v7043_v15, %v10962_v19  ;;  %7064 = vpow2.f32 %v5432_v43  ;;  %v5540_v6 = vmul.f32 -1.442695, %v10976_v13 }
 0x410   : > { %v7047_v12 = vpop.eup %7046  ;;  %v4009_v42 = vadd.f32 %v4008_v46, %v3575_v33  ;;  %v2625_v29 = vadd.f32 1.0, %v7045_v34  ;;  %7066 = vpow2.f32 %v5531_v28 }
 0x411   : > { %v7049_v24 = vpop.eup %7048  ;;  %v3988_v14 = vadd.f32 %v3987_v21, %v3674_v41  ;;  %v2724_v23 = vadd.f32 1.0, %v7047_v12  ;;  %7068 = vpow2.f32 %v5433_v27 }
 0x412   : > { %v7051_v58 = vpop.eup %7050  ;;  %7070 = vrcp.f32 %v2625_v29  ;;  %v2626_v8 = vadd.f32 1.0, %v7049_v24 }
 0x413   : > { %v7053_v25 = vpop.eup %7052  ;;  %7072 = vrcp.f32 %v2724_v23  ;;  %v2733_v54 = vadd.f32 1.0, %v7051_v58 }
 0x414   : > { %v7055_v9 = vpop.eup %7054  ;;  %v3576_v19 = vmul.f32 %v7053_v25, %v10963_v37  ;;  %7074 = vrcp.f32 %v2626_v8 }
 0x415   : > { %v7057_v43 = vpop.eup %7056  ;;  %7076 = vrcp.f32 %v2733_v54  ;;  %v2635_v46 = vadd.f32 1.0, %v7055_v9 }
 0x416   : > { %v7059_v28 = vpop.eup %7058  ;;  %v4040_v59 = vadd.f32 %v4039_v17, %v3576_v19  ;;  %v2734_v21 = vadd.f32 1.0, %v7057_v43  ;;  %7078 = vpow2.f32 %v5540_v6  ;;  %v10978_v17 = vld [vmem:[#allocation39_spill] sm:$0xff] }
 0x417   : > { %v7061_v3 = vpop.eup %7060  ;;  %v3683_v27 = vmul.f32 %v7059_v28, %v10964_v57  ;;  %7080 = vrcp.f32 %v2635_v46  ;;  %v5541_v58 = vmul.f32 -1.442695, %v10978_v17  ;;  %v10979_v57 = vld [vmem:[#allocation63_spill] sm:$0xff]  ;;  %v5452_v46 = vmul.f32 -1.442695, %v9907_v39 }
 0x418   : > { %v7063_v15 = vpop.eup %7062  ;;  %7082 = vrcp.f32 %v2734_v21  ;;  %v2636_v33 = vadd.f32 1.0, %v7061_v3  ;;  %v5443_v25 = vmul.f32 -1.442695, %v10979_v57 }
 0x419   : > { %v7065_v34 = vpop.eup %7064  ;;  %v3958_v41 = vadd.f32 %v3957_v26, %v3683_v27  ;;  %v2743_v37 = vadd.f32 1.0, %v7063_v15  ;;  %7084 = vpow2.f32 %v5442_v60  ;;  %v5550_v26 = vmul.f32 -1.442695, %v9904_v52 }
 0x41a   : > { %v7067_v12 = vpop.eup %7066  ;;  %7086 = vrcp.f32 %v2636_v33  ;;  %v2645_v29 = vadd.f32 1.0, %v7065_v34 }
 0x41b   : > { %v7069_v24 = vpop.eup %7068  ;;  %7088 = vrcp.f32 %v2743_v37  ;;  %v2744_v23 = vadd.f32 1.0, %v7067_v12 }
 0x41c   : > { %v7071_v8 = vpop.eup %7070  ;;  %7090 = vrcp.f32 %v2645_v29  ;;  %v2646_v6 = vadd.f32 1.0, %v7069_v24 }
 0x41d   : > { %v7073_v54 = vpop.eup %7072  ;;  %v3585_v9 = vmul.f32 %v7071_v8, %v10965_v18  ;;  %7092 = vrcp.f32 %v2744_v23  ;;  %v5551_v18 = vmul.f32 -1.442695, %v9913_v61 }
 0x41e   : > { %v7075_v19 = vpop.eup %7074  ;;  %v3684_v43 = vmul.f32 %v7073_v54, %v10966_v47  ;;  %7094 = vrcp.f32 %v2646_v6  ;;  %v5453_v47 = vmul.f32 -1.442695, %v9917_v1 }
 0x41f   : > { %v7077_v60 = vpop.eup %7076  ;;  %v4010_v28 = vadd.f32 %v4009_v42, %v3585_v9  ;;  %v3586_v21 = vmul.f32 %v7075_v19, %v10967_v10  ;;  %7096 = vpow2.f32 %v5541_v58  ;;  %v5463_v9 = vmul.f32 -1.442695, %v9936_v51 }
 0x420   : > { %v7079_v3 = vpop.eup %7078  ;;  %v3989_v27 = vadd.f32 %v3988_v14, %v3684_v43  ;;  %v3693_v15 = vmul.f32 %v7077_v60, %v10968_v55  ;;  %7098 = vpow2.f32 %v5443_v25  ;;  %v5560_v55 = vmul.f32 -1.442695, %v9924_v31 }
 0x421   : > { %v7081_v33 = vpop.eup %7080  ;;  %v4041_v34 = vadd.f32 %v4040_v59, %v3586_v21  ;;  %v2753_v37 = vadd.f32 1.0, %v7079_v3  ;;  %7100 = vpow2.f32 %v5550_v26  ;;  %v5462_v59 = vmul.f32 -1.442695, %v9929_v0 }
 0x422   : > { %v7083_v12 = vpop.eup %7082  ;;  %v3959_v29 = vadd.f32 %v3958_v41, %v3693_v15  ;;  %v3595_v42 = vmul.f32 %v7081_v33, %v10969_v2  ;;  %7102 = vpow2.f32 %v5452_v46  ;;  %v5561_v2 = vmul.f32 -1.442695, %v9933_v20 }
 0x423   : > { %v7085_v10 = vpop.eup %7084  ;;  %v3694_v24 = vmul.f32 %v7083_v12, %v10970_v22  ;;  %7104 = vrcp.f32 %v2753_v37  ;;  %v4330_v22 = vld [vmem:[%s10265_s4] sm:$0x1] }
 0x424   : > { %v7087_v14 = vpop.eup %7086  ;;  %v4011_v23 = vadd.f32 %v4010_v28, %v3595_v42  ;;  %v2655_v58 = vadd.f32 1.0, %v7085_v10  ;;  %7106 = vpow2.f32 %v5551_v18  ;;  %v4846_v3 = vadd.f32 %v10065_v36, %v4330_v22 }
 0x425   : > { %v7089_v8 = vpop.eup %7088  ;;  %v3990_v6 = vadd.f32 %v3989_v27, %v3694_v24  ;;  %v3596_v25 = vmul.f32 %v7087_v14, %v10971_v4  ;;  %7108 = vpow2.f32 %v5453_v47  ;;  %v5472_v4 = vmul.f32 -1.442695, %v9940_v40 }
 0x426   : > { %v7091_v41 = vpop.eup %7090  ;;  %v3703_v54 = vmul.f32 %v7089_v8, %v10972_v48  ;;  %7110 = vrcp.f32 %v2655_v58 }
 0x427   : > { %v7093_v26 = vpop.eup %7092  ;;  %v4042_v19 = vadd.f32 %v4041_v34, %v3596_v25  ;;  %v3605_v43 = vmul.f32 %v7091_v41, %v10973_v35  ;;  %7112 = vpow2.f32 %v5560_v55  ;;  %v5686_v46 = vpop.f32.mrb[140].mxu1  ;;  %v5473_v55 = vmul.f32 -1.442695, %v9944_v11 }
 0x428   : > { %v7095_v60 = vpop.eup %7094  ;;  %v3960_v28 = vadd.f32 %v3959_v29, %v3703_v54  ;;  %v3704_v21 = vmul.f32 %v7093_v26, %v10974_v63  ;;  %7114 = vpow2.f32 %v5462_v59  ;;  %v5687_v27 = vpop.f32.mrb[141].mxu1 }
 0x429   : > { %v7097_v48 = vpop.eup %7096  ;;  %v4012_v15 = vadd.f32 %v4011_v23, %v3605_v43  ;;  %v3606_v18 = vmul.f32 %v7095_v60, %v10975_v53  ;;  %7116 = vpow2.f32 %v5561_v2  ;;  %v5688_v33 = vadd.f32 %v5687_v27, %v5686_v46  ;;  %v5689_v34 = vpop.f32.mrb[142].mxu1 }
 0x42a   : > { %v7099_v35 = vpop.eup %7098  ;;  %v3991_v37 = vadd.f32 %v3990_v6, %v3704_v21  ;;  %v2754_v47 = vadd.f32 1.0, %v7097_v48  ;;  %7118 = vpow2.f32 %v5463_v9  ;;  %v5690_v12 = vpop.f32.mrb[143].mxu1  ;;  %v10980_v6 = vld [vmem:[#allocation16_spill] sm:$0xff] }
 0x42b   : > { %v7101_v42 = vpop.eup %7100  ;;  %v4043_v29 = vadd.f32 %v4042_v19, %v3606_v18  ;;  %v2656_v10 = vadd.f32 1.0, %v7099_v35  ;;  %7120 = vpow2.f32 %v5472_v4  ;;  %v10153_v63 = vadd.f32 %v5688_v33, %v4846_v3 }
 0x42c   : > { %v7103_v36 = vpop.eup %7102  ;;  %7122 = vrcp.f32 %v2754_v47  ;;  %v2763_v24 = vadd.f32 1.0, %v7101_v42  ;;  %v5482_v25 = vmul.f32 -1.442695, %v10980_v6 }
 0x42d   : > { %v7105_v53 = vpop.eup %7104  ;;  %7124 = vrcp.f32 %v2656_v10  ;;  %v2665_v14 = vadd.f32 1.0, %v7103_v36  ;;  %v5502_v10 = vmul.f32 -1.442695, %v9980_v30 }
 0x42e   : > { %v7107_v23 = vpop.eup %7106  ;;  %v3713_v58 = vmul.f32 %v7105_v53, %v10976_v13  ;;  %7126 = vrcp.f32 %v2763_v24 }
 0x42f   : > { %v7109_v59 = vpop.eup %7108  ;;  %7128 = vrcp.f32 %v2665_v14  ;;  %v2764_v8 = vadd.f32 1.0, %v7107_v23 }
 0x430   : > { %v7111_v2 = vpop.eup %7110  ;;  %v3961_v22 = vadd.f32 %v3960_v28, %v3713_v58  ;;  %v2666_v41 = vadd.f32 1.0, %v7109_v59  ;;  %7130 = vpow2.f32 %v5473_v55  ;;  %v10981_v28 = vld [vmem:[#allocation40_spill] sm:$0xff] }
 0x431   : > { %v7113_v54 = vpop.eup %7112  ;;  %v3615_v9 = vmul.f32 %v7111_v2, %v10977_v45  ;;  %7132 = vrcp.f32 %v2764_v8  ;;  %v5483_v27 = vmul.f32 -1.442695, %v10981_v28  ;;  %v10982_v45 = vld [vmem:[#allocation70_spill] sm:$0xff] }
 0x432   : > { %v7115_v26 = vpop.eup %7114  ;;  %7134 = vrcp.f32 %v2666_v41  ;;  %v2773_v19 = vadd.f32 1.0, %v7113_v54  ;;  %v5492_v33 = vmul.f32 -1.442695, %v10982_v45 }
 0x433   : > { %v7117_v43 = vpop.eup %7116  ;;  %v4013_v4 = vadd.f32 %v4012_v15, %v3615_v9  ;;  %v2675_v13 = vadd.f32 1.0, %v7115_v26  ;;  %7136 = vpow2.f32 %v5482_v25  ;;  %v10983_v15 = vld [vmem:[#allocation21_spill] sm:$0xff] }
 0x434   : > { %v7119_v46 = vpop.eup %7118  ;;  %7138 = vrcp.f32 %v2773_v19  ;;  %v2774_v60 = vadd.f32 1.0, %v7117_v43  ;;  %v5493_v47 = vmul.f32 -1.442695, %v10983_v15 }
 0x435   : > { %v7121_v21 = vpop.eup %7120  ;;  %7140 = vrcp.f32 %v2675_v13  ;;  %v2676_v3 = vadd.f32 1.0, %v7119_v46 }
 0x436   : > { %v7123_v48 = vpop.eup %7122  ;;  %7142 = vrcp.f32 %v2774_v60  ;;  %v2685_v18 = vadd.f32 1.0, %v7121_v21 }
 0x437   : > { %v7125_v34 = vpop.eup %7124  ;;  %v3714_v35 = vmul.f32 %v7123_v48, %v10978_v17  ;;  %7144 = vrcp.f32 %v2676_v3  ;;  %v5503_v17 = vmul.f32 -1.442695, %v9983_v62 }
 0x438   : > { %v7127_v12 = vpop.eup %7126  ;;  %v3616_v42 = vmul.f32 %v7125_v34, %v10979_v57  ;;  %7146 = vrcp.f32 %v2685_v18  ;;  %v5512_v57 = vmul.f32 -1.442695, %v9992_v32 }
 0x439   : > { %v7129_v36 = vpop.eup %7128  ;;  %v3992_v24 = vadd.f32 %v3991_v37, %v3714_v35  ;;  %v3723_v55 = vmul.f32 %v7127_v12, %v9904_v52  ;;  %7148 = vpow2.f32 %v5483_v27 }
 0x43a   : > { %v7131_v53 = vpop.eup %7130  ;;  %v4044_v14 = vadd.f32 %v4043_v29, %v3616_v42  ;;  %v3625_v23 = vmul.f32 %v7129_v36, %v9907_v39  ;;  %7150 = vpow2.f32 %v5492_v33  ;;  %v5513_v39 = vmul.f32 -1.442695, %v9997_v50 }
 0x43b   : > { %v7133_v58 = vpop.eup %7132  ;;  %v3962_v59 = vadd.f32 %v3961_v22, %v3723_v55  ;;  %v2686_v8 = vadd.f32 1.0, %v7131_v53  ;;  %7152 = vpow2.f32 %v5493_v47  ;;  %v5522_v22 = vmul.f32 -1.442695, %v10001_v44 }
 0x43c   : > { %v7135_v25 = vpop.eup %7134  ;;  %v4014_v2 = vadd.f32 %v4013_v4, %v3625_v23  ;;  %v3724_v37 = vmul.f32 %v7133_v58, %v9913_v61  ;;  %7154 = vpow2.f32 %v5502_v10  ;;  %v5523_v61 = vmul.f32 -1.442695, %v10004_v7 }
 0x43d   : > { %v7137_v52 = vpop.eup %7136  ;;  %v3626_v41 = vmul.f32 %v7135_v25, %v9917_v1  ;;  %7156 = vrcp.f32 %v2686_v8  ;;  %v5532_v1 = vmul.f32 -1.442695, %v10010_v56  ;;  %v10985_v8 = vld [vmem:[#allocation33_spill] sm:$0xff] }
 0x43e   : > { %v7139_v29 = vpop.eup %7138  ;;  %v3993_v54 = vadd.f32 %v3992_v24, %v3724_v37  ;;  %v2695_v9 = vadd.f32 1.0, %v7137_v52  ;;  %7158 = vpow2.f32 %v5503_v17 }
 0x43f   : > { %v7141_v26 = vpop.eup %7140  ;;  %v4045_v19 = vadd.f32 %v4044_v14, %v3626_v41  ;;  %v3733_v43 = vmul.f32 %v7139_v29, %v9924_v31  ;;  %7160 = vpow2.f32 %v5512_v57  ;;  %v5542_v57 = vmul.f32 -1.442695, %v10985_v8 }
 0x440   : > { %v7143_v4 = vpop.eup %7142  ;;  %v3635_v13 = vmul.f32 %v7141_v26, %v9929_v0  ;;  %7162 = vrcp.f32 %v2695_v9 }
 0x441   : > { %v7145_v46 = vpop.eup %7144  ;;  %v3963_v60 = vadd.f32 %v3962_v59, %v3733_v43  ;;  %v3734_v21 = vmul.f32 %v7143_v4, %v9933_v20  ;;  %7164 = vpow2.f32 %v5513_v39 }
 0x442   : > { %v7147_v3 = vpop.eup %7146  ;;  %v4015_v27 = vadd.f32 %v4014_v2, %v3635_v13  ;;  %v3636_v48 = vmul.f32 %v7145_v46, %v9936_v51  ;;  %7166 = vpow2.f32 %v5522_v22  ;;  %v10984_v51 = vld [vmem:[#allocation44_spill] sm:$0xff] }
 0x443   : > { %v7149_v31 = vpop.eup %7148  ;;  %v4126_v18 = vrot.slane %v3963_v60, 4  ;;  %v3994_v33 = vadd.f32 %v3993_v54, %v3734_v21  ;;  %v3645_v34 = vmul.f32 %v7147_v3, %v9940_v40  ;;  %7168 = vpow2.f32 %v5523_v61 }
 0x444   : > { %v7151_v0 = vpop.eup %7150  ;;  %v4046_v35 = vadd.f32 %v4045_v19, %v3636_v48  ;;  %v2696_v47 = vadd.f32 1.0, %v7149_v31  ;;  %7170 = vpow2.f32 %v5532_v1  ;;  %v5533_v53 = vmul.f32 -1.442695, %v10984_v51 }
 0x445   : > { %v7153_v12 = vpop.eup %7152  ;;  %v4127_v42 = vadd.f32 %v4126_v18, %v3963_v60  ;;  %v4132_v10 = vrot.slane %v3994_v33, 4  ;;  %v4016_v20 = vadd.f32 %v4015_v27, %v3645_v34  ;;  %v2705_v36 = vadd.f32 1.0, %v7151_v0  ;;  %v10986_v60 = vld [vmem:[#allocation64_spill] sm:$0xff] }
 0x446   : > { %v7155_v24 = vpop.eup %7154  ;;  %7172 = vrcp.f32 %v2696_v47  ;;  %v2706_v55 = vadd.f32 1.0, %v7153_v12  ;;  %v5543_v21 = vmul.f32 -1.442695, %v10986_v60  ;;  %v5553_v18 = vmul.f32 -1.442695, %v10038_v16 }
 0x447   : > { %v7157_v14 = vpop.eup %7156  ;;  %v4128_v23 = vrot.slane %v4127_v42, 2  ;;  %v4133_v17 = vadd.f32 %v4132_v10, %v3994_v33  ;;  %7174 = vrcp.f32 %v2705_v36  ;;  %v2715_v40 = vadd.f32 1.0, %v7155_v24 }
 0x448   : > { %v7159_v58 = vpop.eup %7158  ;;  %v3646_v59 = vmul.f32 %v7157_v14, %v9944_v11  ;;  %7176 = vrcp.f32 %v2706_v55  ;;  %v5563_v10 = vmul.f32 -1.442695, %v10051_v38 }
 0x449   : > { %v7161_v25 = vpop.eup %7160  ;;  %v4129_v2 = vadd.f32 %v4128_v23, %v4127_v42  ;;  %v4134_v37 = vrot.slane %v4133_v17, 2  ;;  %7178 = vrcp.f32 %v2715_v40  ;;  %v2716_v52 = vadd.f32 1.0, %v7159_v58 }
 0x44a   : > { %v7163_v41 = vpop.eup %7162  ;;  %v4047_v39 = vadd.f32 %v4046_v35, %v3646_v59  ;;  %v2725_v29 = vadd.f32 1.0, %v7161_v25  ;;  %7180 = vpow2.f32 %v5533_v53  ;;  %v5562_v35 = vmul.f32 -1.442695, %v10043_v5 }
 0x44b   : > { %v7165_v54 = vpop.eup %7164  ;;  %v3655_v9 = vmul.f32 %v7163_v41, %v10980_v6  ;;  %7182 = vrcp.f32 %v2716_v52  ;;  %v4135_v22 = vadd.f32 %v4134_v37, %v4133_v17  ;;  %v4130_v26 = vrot.slane %v4129_v2, 1 }
 0x44c   : > { %v7167_v19 = vpop.eup %7166  ;;  %7184 = vrcp.f32 %v2725_v29  ;;  %v2726_v11 = vadd.f32 1.0, %v7165_v54  ;;  %v5552_v6 = vmul.f32 -1.442695, %v10034_v49 }
 0x44d   : > { %v7169_v43 = vpop.eup %7168  ;;  %v4017_v61 = vadd.f32 %v4016_v20, %v3655_v9  ;;  %v2735_v4 = vadd.f32 1.0, %v7167_v19  ;;  %7186 = vpow2.f32 %v5542_v57  ;;  %v4136_v13 = vrot.slane %v4135_v22, 1 }
 0x44e   : > { %v7171_v1 = vpop.eup %7170  ;;  %7188 = vrcp.f32 %v2726_v11  ;;  %v2736_v46 = vadd.f32 1.0, %v7169_v43  ;;  %v4131_v3 = vadd.f32 %v4130_v26, %v4129_v2 }
 0x44f   : > { %7190 = vrcp.f32 %v2735_v4  ;;  %v2745_v27 = vadd.f32 1.0, %v7171_v1  ;;  %v4137_v48 = vadd.f32 %v4136_v13, %v4135_v22 }
 0x450   : > { %v7173_v31 = vpop.eup %7172  ;;  %7192 = vrcp.f32 %v2736_v46  ;;  %v4156_v33 = vmul.f32 0.00390625, %v4131_v3 }
 0x451   : > { %v7175_v34 = vpop.eup %7174  ;;  %v3656_v0 = vmul.f32 %v7173_v31, %v10981_v28  ;;  %7194 = vrcp.f32 %v2745_v27  ;;  %v4157_v47 = vmul.f32 0.00390625, %v4137_v48 }
 0x452   : > { %v7177_v12 = vpop.eup %7176  ;;  %v3665_v42 = vmul.f32 %v7175_v34, %v10982_v45  ;;  %7196 = vpow2.f32 %v5543_v21  ;;  %v4166_v23 = vpack.c.bf16 %v4156_v33, %v4156_v33 }
 0x453   : > { %v7179_v20 = vpop.eup %7178  ;;  %v4048_v36 = vadd.f32 %v4047_v39, %v3656_v0  ;;  %v3666_v24 = vmul.f32 %v7177_v12, %v10983_v15  ;;  %7198 = vpow2.f32 %v5552_v6  ;;  %v4167_v55 = vpack.c.bf16 %v4157_v47, %v4157_v47 }
 0x454   : > { %v7181_v53 = vpop.eup %7180  ;;  %v4018_v14 = vadd.f32 %v4017_v61, %v3665_v42  ;;  %v3675_v28 = vmul.f32 %v7179_v20, %v9980_v30  ;;  %7200 = vpow2.f32 %v5553_v18 }
 0x455   : > { %v7183_v17 = vpop.eup %7182  ;;  %v4049_v40 = vadd.f32 %v4048_v36, %v3666_v24  ;;  %v2746_v58 = vadd.f32 1.0, %v7181_v53  ;;  %7202 = vpow2.f32 %v5562_v35  ;;  %4963 = vmatprep.mubr.bf16.mxu1 %v4167_v55 }
 0x456   : > { %v7185_v45 = vpop.eup %7184  ;;  %v4019_v59 = vadd.f32 %v4018_v14, %v3675_v28  ;;  %v3676_v57 = vmul.f32 %v7183_v17, %v9983_v62  ;;  %7204 = vpow2.f32 %v5563_v10  ;;  %4964 = vmatmul.mubr.bf16.vlgmr.msra.gmra.mrb[148].mxu1 %v4166_v23 }
 0x457   : > { %v7187_v15 = vpop.eup %7186  ;;  %v3685_v25 = vmul.f32 %v7185_v45, %v9992_v32  ;;  %7206 = vrcp.f32 %v2746_v58 }
 0x458   : > { %v7189_v2 = vpop.eup %7188  ;;  %v4050_v37 = vadd.f32 %v4049_v40, %v3676_v57  ;;  %v2755_v30 = vadd.f32 1.0, %v7187_v15 }
 0x459   : > { %v7191_v52 = vpop.eup %7190  ;;  %v4020_v41 = vadd.f32 %v4019_v59, %v3685_v25  ;;  %v3686_v39 = vmul.f32 %v7189_v2, %v9997_v50 }
 0x45a   : > { %v7193_v29 = vpop.eup %7192  ;;  %v3695_v54 = vmul.f32 %v7191_v52, %v10001_v44  ;;  %7208 = vrcp.f32 %v2755_v30 }
 0x45b   : > { %v7195_v9 = vpop.eup %7194  ;;  %v4051_v22 = vadd.f32 %v4050_v37, %v3686_v39  ;;  %v3696_v62 = vmul.f32 %v7193_v29, %v10004_v7 }
 0x45c   : > { %v7197_v26 = vpop.eup %7196  ;;  %v4021_v19 = vadd.f32 %v4020_v41, %v3695_v54  ;;  %v3705_v32 = vmul.f32 %v7195_v9, %v10010_v56 }
 0x45d   : > { %v7199_v11 = vpop.eup %7198  ;;  %v4052_v43 = vadd.f32 %v4051_v22, %v3696_v62  ;;  %v2756_v61 = vadd.f32 1.0, %v7197_v26 }
 0x45e   : > { %v7201_v4 = vpop.eup %7200  ;;  %v4022_v13 = vadd.f32 %v4021_v19, %v3705_v32  ;;  %v2765_v1 = vadd.f32 1.0, %v7199_v11 }
 0x45f   : > { %v7203_v46 = vpop.eup %7202  ;;  %7210 = vrcp.f32 %v2756_v61  ;;  %v2766_v50 = vadd.f32 1.0, %v7201_v4 }
 0x460   : > { %v7205_v21 = vpop.eup %7204  ;;  %7212 = vrcp.f32 %v2765_v1  ;;  %v2775_v44 = vadd.f32 1.0, %v7203_v46 }
 0x461   : > { %v7207_v3 = vpop.eup %7206  ;;  %7214 = vrcp.f32 %v2766_v50  ;;  %v2776_v27 = vadd.f32 1.0, %v7205_v21 }
 0x462   : > { %v3706_v7 = vmul.f32 %v7207_v3, %v10984_v51  ;;  %7216 = vrcp.f32 %v2775_v44 }
 0x463   : > { %7218 = vrcp.f32 %v2776_v27 }
 0x464   : > { %v7209_v56 = vpop.eup %7208  ;;  %v4053_v6 = vadd.f32 %v4052_v43, %v3706_v7 }
 0x465   : > { %v3715_v48 = vmul.f32 %v7209_v56, %v10985_v8 }
 0x467   : > { %v4023_v31 = vadd.f32 %v4022_v13, %v3715_v48 }
 0x469   : > { %v7211_v18 = vpop.eup %7210 }
 0x46a   : > { %v7213_v33 = vpop.eup %7212  ;;  %v3716_v34 = vmul.f32 %v7211_v18, %v10986_v60 }
 0x46b   : > { %v7215_v0 = vpop.eup %7214  ;;  %v3725_v35 = vmul.f32 %v7213_v33, %v10034_v49 }
 0x46c   : > { %v7217_v47 = vpop.eup %7216  ;;  %v4054_v12 = vadd.f32 %v4053_v6, %v3716_v34  ;;  %v3726_v42 = vmul.f32 %v7215_v0, %v10038_v16 }
 0x46d   : > { %v7219_v10 = vpop.eup %7218  ;;  %v4024_v51 = vadd.f32 %v4023_v31, %v3725_v35  ;;  %v3735_v20 = vmul.f32 %v7217_v47, %v10043_v5 }
 0x46e   : > { %v4055_v36 = vadd.f32 %v4054_v12, %v3726_v42  ;;  %v3736_v24 = vmul.f32 %v7219_v10, %v10051_v38 }
 0x46f   : > { %v4025_v8 = vadd.f32 %v4024_v51, %v3735_v20 }
 0x470   : > { %v4056_v55 = vadd.f32 %v4055_v36, %v3736_v24 }
 0x471   : > { %v4138_v53 = vrot.slane %v4025_v8, 4 }
 0x472   : > { %v4144_v14 = vrot.slane %v4056_v55, 4 }
 0x473   : > { %v4139_v28 = vadd.f32 %v4138_v53, %v4025_v8 }
 0x474   : > { %v4145_v60 = vadd.f32 %v4144_v14, %v4056_v55 }
 0x475   : > { %v4140_v23 = vrot.slane %v4139_v28, 2 }
 0x476   : > { %v4146_v17 = vrot.slane %v4145_v60, 2 }
 0x477   : > { %v4141_v49 = vadd.f32 %v4140_v23, %v4139_v28 }
 0x478   : > { %v4147_v40 = vadd.f32 %v4146_v17, %v4145_v60 }
 0x479   : > { %v4142_v58 = vrot.slane %v4141_v49, 1 }
 0x47a   : > { %v4148_v45 = vrot.slane %v4147_v40, 1  ;;  %v5708_v16 = vpop.f32.mrb[144].mxu1 }
 0x47b   : > { %v4143_v59 = vadd.f32 %v4142_v58, %v4141_v49  ;;  %v5709_v57 = vpop.f32.mrb[145].mxu1 }
 0x47c   : > { %v4149_v15 = vadd.f32 %v4148_v45, %v4147_v40  ;;  %v5710_v5 = vadd.f32 %v5709_v57, %v5708_v16  ;;  %v5711_v25 = vpop.f32.mrb[146].mxu1 }
 0x47d   : > { %v4158_v2 = vmul.f32 0.00390625, %v4143_v59  ;;  %v5712_v38 = vpop.f32.mrb[147].mxu1 }
 0x47e   : > { %v4159_v37 = vmul.f32 0.00390625, %v4149_v15  ;;  %v4926_v30 = vadd.f32 %v5710_v5, %v10153_v63 }
 0x47f   : > { %v4168_v41 = vpack.c.bf16 %v4158_v2, %v4158_v2 }
 0x480   : > { %v4169_v52 = vpack.c.bf16 %v4159_v37, %v4159_v37 }
 0x482   : > { %5003 = vmatprep.mubr.bf16.mxu0 %v4169_v52 }
 0x483   : > { %5004 = vmatmul.mubr.bf16.vlgmr.msra.gmra.mrb[184].mxu0 %v4168_v41 }
 0x529   : > { %v5730_v39 = vpop.f32.mrb[148].mxu1 }
 0x52a   : > { %v5731_v29 = vpop.f32.mrb[149].mxu1 }
 0x52b   : > { %v5732_v54 = vadd.f32 %v5731_v29, %v5730_v39  ;;  %v5733_v9 = vpop.f32.mrb[150].mxu1 }
 0x52c   : > { %v5734_v22 = vpop.f32.mrb[151].mxu1 }
 0x52d   : > { %v4966_v62 = vadd.f32 %v5732_v54, %v4926_v30 }
 0x556   : > { %v5752_v26 = vpop.f32.mrb[184].mxu0 }
 0x557   : > { %v5753_v19 = vpop.f32.mrb[185].mxu0 }
 0x558   : > { %v5754_v32 = vadd.f32 %v5753_v19, %v5752_v26  ;;  %v5755_v11 = vpop.f32.mrb[186].mxu0 }
 0x559   : > { %v5756_v43 = vpop.f32.mrb[187].mxu0 }
 0x55a   : > { %v5006_v61 = vadd.f32 %v5754_v32, %v4966_v62 }
 0x55c   : > { %v5012_v63 = vsel %vm5011_vm2, %v5006_v61, -inf }
 0x55d   : > { %5013 = vmax.xlane.f32.xlu1 %v5012_v63 }
 0x5ea   : > { %v5014_v4 = vpop.xlane.xlu1 %5013 }
 0x5eb   : > { %v5015_v13 = vsub.f32 %v5006_v61, %v5014_v4 }
 0x5ed   : > { %v5016_v1 = vmul.f32 1.442695, %v5015_v13 }
 0x5ef   : > { %7220 = vpow2.f32 %v5016_v1 }
 0x5f9   : > { %v7221_v46 = vpop.eup %7220 }
 0x5fa   : > { %v5018_v50 = vsel %vm5011_vm2, %v7221_v46, 0.0 }
 0x5fb   : > { %5019 = vadd.xlane.f32.xlu1 %v5018_v50 }
 0x688   : > { %v5020_v21 = vpop.xlane.xlu1 %5019 }
 0x689   : > { %7222 = vrcp.f32 %v5020_v21 }
 0x693   : > { %v7223_v44 = vpop.eup %7222 }
 0x694   : > { %v5022_v3 = vmul.f32 %v7223_v44, %v7221_v46 }
 0x696   : > { %5023 = vst [vmem:[%s295_s27] sm:$0x1] %v5022_v3 }
 0x697   : > { %7351 = shalt.err (!%p7348_p5)
}
 0x698   : > { %s7352_s14 = scalar_lea.hbm %s10212_s10, 16  ;;  %s7356_s26 = scalar_lea.hbm %s10266_s5, 32 }
 0x699   : > { %p7353_p10 = scmp.ne.s32.totalorder %s10212_s10, %s7352_s14  ;;  %p7357_p7 = scmp.lt.u32.totalorder %s10212_s10, %s10266_s5 }
 0x69a   : > { %p7358_p3 = scmp.lt.u32.totalorder %s7356_s26, %s7352_s14  ;;  %p7360_p11 = scmp.lt.u32.totalorder %s7352_s14, %s10212_s10 }
 0x69b   : > { %p7354_p13 = pnand %p7353_p10, %p7617_p2 }
 0x69c   : > { %p7359_p12 = por %p7358_p3, %p7357_p7 }
 0x69d   : > { %p7355_p9 = pneg %p7354_p13 }
 0x69e   : > { %p7361_p1 = por %p7360_p11, %p7359_p12 }
 0x6a0   : > { %p7362_p4 = pnand %p7361_p1, %p7355_p9 }
 0x6a2   : > { %7365 = shalt.err (!%p7362_p4)
}
 0x6a3   : > { %5774 = dma.vmem_to_hbm [thread:$0]  (%p7617_p2), %s10214_s24, 16, %s10212_s10, %s5025_s7  }
 0x6a4 PF: > { %s5049_s27 = sand.u32 1, %s7408_s18   ;;  %p10987_p6 = scmp.ne.s32.totalorder %s10491_s29, 0 }
 0x6a5   : > { %p10988_p8 = scmp.ge.s32.totalorder %s7428_s23, 2  ;;  %s5050_s11 = scalar_lea.sflag [#allocation5], %s5049_s27 }
 0x6a7   : > { %p5791_p0 = pnand %p10988_p8, %p10987_p6 }
 0x6a9   : > { %7403 = dma.done.wait (!%p5791_p0), %s5050_s11, 16  }
 0x6aa   : > { %7405 = vsyncadd (!%p5791_p0), %s5050_s11, 4294967280  ;;  %s23_s23 = sadd.s32 1, %s7428_s23   ;;  %s10989_s18 = smov %s7412_s19 }
 0x6ab   : > { %p20_p5 = scmp.ge.s32.totalorder %s23_s23, 4   ;;  %s10990_s19 = smov %s7416_s20 }
 0x6ac   : > { %s10991_s20 = smov %s7629_s6  ;;  %s10992_s21 = smov %s7424_s22 }
 0x6ad   : > { %s10993_s22 = smov %s10995_s15  ;;  %22 = sbr.rel (!%p20_p5) target bundleno = 8 (0x8), region = 105 }
 0x6b4   :  { %5054 = vsyncpa [#allocation4], 1 }
 0x6b5   :  { %5056 = vsyncpa [#allocation4 + $0x1], 1 }
 0x6b6   :  { %5057 = vsyncpa [#allocation7], 1 }
 0x6b7   :  { %5058 = vsyncpa [#allocation10], 1 }
 0x6b8   :  { %5059 = vsyncpa [#allocation5], 1 }
 0x6b9   :  { %5061 = vsyncpa [#allocation5 + $0x1], 1 }

</bundles_post_ra>
